<compile_context>
chip_gen: v6e
topology: v6e:2x2x1
jax: 0.10.0
libtpu: 0.0.40
codegen_flags: <defaults>
</compile_context>

<pallas_src>
import jax
import jax.numpy as jnp
from jax import lax
from jax.experimental import pallas as pl
from jax.experimental.pallas import tpu as pltpu

_LANE = 128
_SUBLANE = 8
# Keep W0 VMEM-resident below this size; above it, K-tile / HBM-stream it
# (generation-aware threshold: safe for v7x's 64 MiB per-core VMEM).
_W0_RESIDENT_BYTES = 24 << 20
_K_TILE_STREAM = 2048


def _round_up(x, m):
    return ((x + m - 1) // m) * m


# ----------------------------------------------------------------------------
# Kernel: one (TB, tk0) x tile and one (tk0, out0_pad) W0 K-tile per grid step.
# Layers 1..3 weights/biases are VMEM-resident (constant index maps).
# ----------------------------------------------------------------------------
def _mlp_kernel(x_ref,
                w0_ref, b0_ref,
                w1_ref, b1_ref,
                w2_ref, b2_ref,
                w3_ref, b3_ref,
                out_ref, acc_ref):
    k = pl.program_id(1)

    @pl.when(k == 0)
    def _():
        acc_ref[...] = jnp.zeros_like(acc_ref)

    # Layer-0 partial product on the MXU (bf16 x bf16 -> f32 accumulate).
    acc_ref[...] += jnp.dot(x_ref[...], w0_ref[...],
                            preferred_element_type=jnp.float32)

    @pl.when(k == pl.num_programs(1) - 1)
    def _():
        # f32 bias-add + tanh epilogue; activations carried in bf16 between layers.
        h = jnp.tanh(acc_ref[...] + b0_ref[...]).astype(jnp.bfloat16)
        for w_ref, b_ref in ((w1_ref, b1_ref), (w2_ref, b2_ref),
                             (w3_ref, b3_ref)):
            z = jnp.dot(h, w_ref[...], preferred_element_type=jnp.float32)
            h = jnp.tanh(z + b_ref[...]).astype(jnp.bfloat16)
        out_ref[...] = h.astype(out_ref.dtype)   # lane-dense (TB, 128) store


def _pad_and_cast_params(weights, biases, in0_pad):
    """Zero-pad every Linear to lane-aligned dims; weights -> bf16, biases -> f32."""
    pw, pb = [], []
    for idx, (w, b) in enumerate(zip(weights, biases)):
        in_f, out_f = w.shape
        in_p = in0_pad if idx == 0 else _round_up(in_f, _LANE)
        out_p = _round_up(out_f, _LANE)
        wp = jnp.zeros((in_p, out_p), jnp.bfloat16).at[:in_f, :out_f].set(
            w.astype(jnp.bfloat16))
        bp = jnp.zeros((1, out_p), jnp.float32).at[:, :out_f].set(
            jnp.reshape(b, (1, -1)).astype(jnp.float32))
        pw.append(wp)
        pb.append(bp)
    return pw, pb


def _const_spec(shape, single_buffer):
    """Constant-index BlockSpec; single-buffered when the API supports it."""
    idx_map = lambda i, k: (0, 0)
    if single_buffer:
        try:
            return pl.BlockSpec(shape, idx_map, pipeline_mode=pl.Buffered(1))
        except Exception:
            pass
    return pl.BlockSpec(shape, idx_map)


def mlp_model_forward(token_ids, emb_table, weights, biases, *, batch_tile=256):
    """Pallas-backed forward pass of MLP_Model (eval mode).

    token_ids : (B, max_len) int32
    emb_table : (max_features, embedding_dim) f32
    weights   : list of 4 arrays, weights[i] has shape (in_f_i, out_f_i) (pre-transposed)
    biases    : list of 4 arrays, biases[i]  has shape (1, out_f_i)
    returns   : (B, num_classes) f32
    """
    B, L = token_ids.shape
    D = emb_table.shape[1]
    num_classes = weights[3].shape[1]
    feat = L * D

    # --- Embedding lookup + Flatten(-2,-1): plain JAX glue, bf16 stream ------
    x = jnp.take(emb_table.astype(jnp.bfloat16), token_ids, axis=0)
    x = x.reshape(B, feat)

    # --- Padded layer dims; decide whether W0 is VMEM-resident or K-streamed -
    out0_pad = _round_up(weights[0].shape[1], _LANE)
    in0_pad = _round_up(feat, _LANE)
    if in0_pad * out0_pad * 2 > _W0_RESIDENT_BYTES:
        tk0 = _K_TILE_STREAM
        in0_pad = _round_up(in0_pad, tk0)
    else:
        tk0 = in0_pad
    num_k = in0_pad // tk0

    pw, pb = _pad_and_cast_params(weights, biases, in0_pad)
    out_pad = pw[-1].shape[1]

    # --- Batch tiling: big tiles for the 256-wide MXU, but >= 2 grid steps ---
    tb = min(batch_tile, _round_up(B, _SUBLANE))
    if B > _SUBLANE and _round_up(B, tb) // tb < 2:
        tb = max(_SUBLANE, _round_up(tb // 2, _SUBLANE))
    b_pad = _round_up(B, tb)
    num_tiles = b_pad // tb

    if b_pad != B or in0_pad != feat:
        x = jnp.pad(x, ((0, b_pad - B), (0, in0_pad - feat)))

    # --- VMEM budget, clamped to physical VMEM (v7x has only 64 MiB/core) ----
    resident = 2 * (sum(int(w.size) * 2 for w in pw[1:])
                    + sum(int(b.size) * 4 for b in pb))
    if num_k == 1:
        resident += 2 * int(pw[0].size) * 2
    streamed = 2 * (tb * tk0 * 2 + tb * out_pad * 4)          # x / out tiles (dbl-buf)
    if num_k > 1:
        streamed += 2 * tk0 * out0_pad * 2                    # streamed W0 K-tiles
    scratch = tb * out0_pad * 4                               # f32 accumulator
    needed = resident + streamed + scratch + (8 << 20)
    try:
        phys = int(pltpu.get_tpu_info().vmem_capacity_bytes)
    except Exception:
        phys = 64 << 20                                       # v7x per-core floor
    vmem_limit = int(min(phys - (8 << 20), max(32 << 20, needed)))

    # --- Cost estimate (bf16 x, f32 out, resident/streamed weights) ----------
    dims = [(w.shape[0], w.shape[1]) for w in pw]
    w_bytes = (sum(int(w.size) * 2 for w in pw[1:])
               + sum(int(b.size) * 4 for b in pb)
               + int(pw[0].size) * 2 * (num_tiles if num_k > 1 else 1))
    cost = pl.CostEstimate(
        flops=int(2 * b_pad * sum(i * o for i, o in dims)),
        transcendentals=int(b_pad * sum(o for _, o in dims)),
        bytes_accessed=int(b_pad * in0_pad * 2 + b_pad * out_pad * 4 + w_bytes),
    )

    def _build_and_call(single_buffer):
        in_specs = [pl.BlockSpec((tb, tk0), lambda i, k: (i, k))]
        if num_k == 1:
            in_specs.append(_const_spec((tk0, out0_pad), single_buffer))
        else:
            in_specs.append(pl.BlockSpec((tk0, out0_pad), lambda i, k: (k, 0)))
        in_specs.append(_const_spec(pb[0].shape, single_buffer))
        for w, b in zip(pw[1:], pb[1:]):
            in_specs.append(_const_spec(w.shape, single_buffer))
            in_specs.append(_const_spec(b.shape, single_buffer))
        return pl.pallas_call(
            _mlp_kernel,
            out_shape=jax.ShapeDtypeStruct((b_pad, out_pad), jnp.float32),
            grid=(num_tiles, num_k),
            in_specs=in_specs,
            out_specs=pl.BlockSpec((tb, out_pad), lambda i, k: (i, 0)),
            scratch_shapes=[pltpu.VMEM((tb, out0_pad), jnp.float32)],
            compiler_params=pltpu.CompilerParams(
                dimension_semantics=("parallel", "arbitrary"),
                vmem_limit_bytes=vmem_limit),
            cost_estimate=cost,
        )(x, pw[0], pb[0], pw[1], pb[1], pw[2], pb[2], pw[3], pb[3])

    try:
        out = _build_and_call(single_buffer=True)
    except Exception:
        # Fallback: default (double-buffered) specs if Buffered(1) is rejected.
        out = _build_and_call(single_buffer=False)

    return out[:B, :num_classes]


def init_params(key, max_features, embedding_dim, max_len, num_classes):
    """Deterministic parameter init (PyTorch-like uniform bounds)."""
    neuron_sizes = [(max_len * embedding_dim, 1000), (1000, 500),
                    (500, 250), (250, num_classes)]
    keys = jax.random.split(key, 1 + 2 * len(neuron_sizes))
    emb_table = jax.random.normal(keys[0], (max_features, embedding_dim),
                                  dtype=jnp.float32)
    weights, biases = [], []
    for i, (in_f, out_f) in enumerate(neuron_sizes):
        bound = 1.0 / (in_f ** 0.5)
        w = jax.random.uniform(keys[1 + 2 * i], (in_f, out_f),
                               minval=-bound, maxval=bound, dtype=jnp.float32)
        b = jax.random.uniform(keys[2 + 2 * i], (1, out_f),
                               minval=-bound, maxval=bound, dtype=jnp.float32)
        weights.append(w)
        biases.append(b)
    return emb_table, weights, biases


def reference_forward(token_ids, emb_table, weights, biases):
    """Pure-JAX f32 reference (eval-mode dropout == identity)."""
    B = token_ids.shape[0]
    x = jnp.take(emb_table, token_ids, axis=0).reshape(B, -1)
    for w, b in zip(weights, biases):
        x = jnp.tanh(x @ w + b)
    return x


def matched_reference(token_ids, emb_table, weights, biases):
    """Pure-JAX reference with the same precision path as the kernel
    (bf16 x / w / inter-layer activations, f32 MXU accumulate, f32 bias+tanh)."""
    B = token_ids.shape[0]
    h = jnp.take(emb_table, token_ids, axis=0).reshape(B, -1).astype(jnp.bfloat16)
    for w, b in zip(weights, biases):
        z = lax.dot_general(h, w.astype(jnp.bfloat16),
                            (((1,), (0,)), ((), ())),
                            preferred_element_type=jnp.float32)
        h = jnp.tanh(z + jnp.reshape(b, (1, -1)).astype(jnp.float32)).astype(jnp.bfloat16)
    return h.astype(jnp.float32)


if __name__ == "__main__":
    # Small shapes consistent with the module's forward.
    batch = 2
    max_len = 8
    embedding_dim = 32
    max_features = 50
    num_classes = 4

    key = jax.random.PRNGKey(0)
    k_tok, k_param = jax.random.split(key)

    token_ids = jax.random.randint(k_tok, (batch, max_len), 0, max_features,
                                   dtype=jnp.int32)
    emb_table, weights, biases = init_params(
        k_param, max_features, embedding_dim, max_len, num_classes)

    out = mlp_model_forward(token_ids, emb_table, weights, biases)
    out = jax.block_until_ready(out)
    assert out.shape == (batch, num_classes)

    # Tight check vs a reference that uses the identical bf16/f32 precision path.
    ref_matched = matched_reference(token_ids, emb_table, weights, biases)
    assert jnp.allclose(out, ref_matched, atol=1e-2, rtol=1e-2), \
        "mismatch vs bf16-matched reference"

    # Looser check vs the full-f32 module semantics (bf16 quantization noise).
    ref_f32 = reference_forward(token_ids, emb_table, weights, biases)
    assert jnp.allclose(out, ref_f32, atol=5e-2, rtol=5e-2), \
        "mismatch vs f32 reference"

    print("KERNEL_OK")
</pallas_src>

<mosaic_0001>
module attributes {stable_mosaic.version = 11 : i64} {
  func.func @_mlp_kernel(%arg0: i32, %arg1: i32, %arg2: memref<8x256xbf16, #tpu.memory_space<vmem>>, %arg3: memref<256x1024xbf16, #tpu.memory_space<vmem>>, %arg4: memref<1x1024xf32, #tpu.memory_space<vmem>>, %arg5: memref<1024x512xbf16, #tpu.memory_space<vmem>>, %arg6: memref<1x512xf32, #tpu.memory_space<vmem>>, %arg7: memref<512x256xbf16, #tpu.memory_space<vmem>>, %arg8: memref<1x256xf32, #tpu.memory_space<vmem>>, %arg9: memref<256x128xbf16, #tpu.memory_space<vmem>>, %arg10: memref<1x128xf32, #tpu.memory_space<vmem>>, %arg11: memref<8x128xf32, #tpu.memory_space<vmem>>, %arg12: memref<8x1024xf32, #tpu.memory_space<vmem>>) attributes {dimension_semantics = [#tpu.dimension_semantics<parallel>, #tpu.dimension_semantics<arbitrary>], iteration_bounds = array<i64: 1, 1>, scalar_prefetch = 0 : i64, scratch_operands = 1 : i64, tpu.core_type = #tpu.core_type<tc>, window_params = [{transform_indices = @transform_0, window_bounds = array<i64: 8, 256>}, {pipeline_mode = #tpu.pipeline_mode<synchronous>, transform_indices = @transform_1, window_bounds = array<i64: 256, 1024>}, {pipeline_mode = #tpu.pipeline_mode<synchronous>, transform_indices = @transform_2, window_bounds = array<i64: 1, 1024>}, {pipeline_mode = #tpu.pipeline_mode<synchronous>, transform_indices = @transform_3, window_bounds = array<i64: 1024, 512>}, {pipeline_mode = #tpu.pipeline_mode<synchronous>, transform_indices = @transform_4, window_bounds = array<i64: 1, 512>}, {pipeline_mode = #tpu.pipeline_mode<synchronous>, transform_indices = @transform_5, window_bounds = array<i64: 512, 256>}, {pipeline_mode = #tpu.pipeline_mode<synchronous>, transform_indices = @transform_6, window_bounds = array<i64: 1, 256>}, {pipeline_mode = #tpu.pipeline_mode<synchronous>, transform_indices = @transform_7, window_bounds = array<i64: 256, 128>}, {pipeline_mode = #tpu.pipeline_mode<synchronous>, transform_indices = @transform_8, window_bounds = array<i64: 1, 128>}, {transform_indices = @transform_9, window_bounds = array<i64: 8, 128>}]} {
    %c0_i32 = arith.constant 0 : i32
    %0 = arith.cmpi eq, %arg1, %c0_i32 : i32
    %1 = arith.extui %0 : i1 to i32
    %c0_i32_0 = arith.constant 0 : i32
    %2 = arith.cmpi ne, %1, %c0_i32_0 : i32
    scf.if %2 {
      %cst_10 = arith.constant 0.000000e+00 : f32
      %12 = vector.broadcast %cst_10 : f32 to vector<8x1024xf32>
      %c0_11 = arith.constant 0 : index
      %c0_12 = arith.constant 0 : index
      %13 = vector.load %arg12[%c0_11, %c0_12] : memref<8x1024xf32, #tpu.memory_space<vmem>>, vector<8x1024xf32>
      tpu.vector_store %arg12[%c0_11, %c0_12], %12 {strides = array<i32>} : memref<8x1024xf32, #tpu.memory_space<vmem>>, vector<8x1024xf32>,
    } else {
    }
    %c0 = arith.constant 0 : index
    %c0_1 = arith.constant 0 : index
    %3 = vector.load %arg12[%c0, %c0_1] : memref<8x1024xf32, #tpu.memory_space<vmem>>, vector<8x1024xf32>
    %c0_2 = arith.constant 0 : index
    %c0_3 = arith.constant 0 : index
    %4 = vector.load %arg2[%c0_2, %c0_3] : memref<8x256xbf16, #tpu.memory_space<vmem>>, vector<8x256xbf16>
    %c0_4 = arith.constant 0 : index
    %c0_5 = arith.constant 0 : index
    %5 = vector.load %arg3[%c0_4, %c0_5] : memref<256x1024xbf16, #tpu.memory_space<vmem>>, vector<256x1024xbf16>
    %cst = arith.constant dense<0.000000e+00> : vector<8x1024xf32>
    %6 = tpu.matmul %4, %5, %cst {dimension_numbers = #tpu.dot_dimension_numbers<[1], [0], [0], [1], [0, 0, 1, 1], [], []>} : vector<8x256xbf16>, vector<256x1024xbf16>, vector<8x1024xf32> -> vector<8x1024xf32>
    %7 = arith.addf %3, %6 : vector<8x1024xf32>
    %c0_6 = arith.constant 0 : index
    %c0_7 = arith.constant 0 : index
    %8 = vector.load %arg12[%c0_6, %c0_7] : memref<8x1024xf32, #tpu.memory_space<vmem>>, vector<8x1024xf32>
    tpu.vector_store %arg12[%c0_6, %c0_7], %7 {strides = array<i32>} : memref<8x1024xf32, #tpu.memory_space<vmem>>, vector<8x1024xf32>,
    %c0_i32_8 = arith.constant 0 : i32
    %9 = arith.cmpi eq, %arg1, %c0_i32_8 : i32
    %10 = arith.extui %9 : i1 to i32
    %c0_i32_9 = arith.constant 0 : i32
    %11 = arith.cmpi ne, %10, %c0_i32_9 : i32
    scf.if %11 {
      %c0_10 = arith.constant 0 : index
      %c0_11 = arith.constant 0 : index
      %12 = vector.load %arg12[%c0_10, %c0_11] : memref<8x1024xf32, #tpu.memory_space<vmem>>, vector<8x1024xf32>
      %c0_12 = arith.constant 0 : index
      %c0_13 = arith.constant 0 : index
      %13 = vector.load %arg4[%c0_12, %c0_13] : memref<1x1024xf32, #tpu.memory_space<vmem>>, vector<1x1024xf32>
      %14 = vector.broadcast %13 : vector<1x1024xf32> to vector<8x1024xf32>
      %15 = arith.addf %12, %14 : vector<8x1024xf32>
      %16 = math.tanh %15 : vector<8x1024xf32>
      %17 = arith.truncf %16 : vector<8x1024xf32> to vector<8x1024xbf16>
      %c0_14 = arith.constant 0 : index
      %c0_15 = arith.constant 0 : index
      %18 = vector.load %arg5[%c0_14, %c0_15] : memref<1024x512xbf16, #tpu.memory_space<vmem>>, vector<1024x512xbf16>
      %cst_16 = arith.constant dense<0.000000e+00> : vector<8x512xf32>
      %19 = tpu.matmul %17, %18, %cst_16 {dimension_numbers = #tpu.dot_dimension_numbers<[1], [0], [0], [1], [0, 0, 1, 1], [], []>} : vector<8x1024xbf16>, vector<1024x512xbf16>, vector<8x512xf32> -> vector<8x512xf32>
      %c0_17 = arith.constant 0 : index
      %c0_18 = arith.constant 0 : index
      %20 = vector.load %arg6[%c0_17, %c0_18] : memref<1x512xf32, #tpu.memory_space<vmem>>, vector<1x512xf32>
      %21 = vector.broadcast %20 : vector<1x512xf32> to vector<8x512xf32>
      %22 = arith.addf %19, %21 : vector<8x512xf32>
      %23 = math.tanh %22 : vector<8x512xf32>
      %24 = arith.truncf %23 : vector<8x512xf32> to vector<8x512xbf16>
      %c0_19 = arith.constant 0 : index
      %c0_20 = arith.constant 0 : index
      %25 = vector.load %arg7[%c0_19, %c0_20] : memref<512x256xbf16, #tpu.memory_space<vmem>>, vector<512x256xbf16>
      %cst_21 = arith.constant dense<0.000000e+00> : vector<8x256xf32>
      %26 = tpu.matmul %24, %25, %cst_21 {dimension_numbers = #tpu.dot_dimension_numbers<[1], [0], [0], [1], [0, 0, 1, 1], [], []>} : vector<8x512xbf16>, vector<512x256xbf16>, vector<8x256xf32> -> vector<8x256xf32>
      %c0_22 = arith.constant 0 : index
      %c0_23 = arith.constant 0 : index
      %27 = vector.load %arg8[%c0_22, %c0_23] : memref<1x256xf32, #tpu.memory_space<vmem>>, vector<1x256xf32>
      %28 = vector.broadcast %27 : vector<1x256xf32> to vector<8x256xf32>
      %29 = arith.addf %26, %28 : vector<8x256xf32>
      %30 = math.tanh %29 : vector<8x256xf32>
      %31 = arith.truncf %30 : vector<8x256xf32> to vector<8x256xbf16>
      %c0_24 = arith.constant 0 : index
      %c0_25 = arith.constant 0 : index
      %32 = vector.load %arg9[%c0_24, %c0_25] : memref<256x128xbf16, #tpu.memory_space<vmem>>, vector<256x128xbf16>
      %cst_26 = arith.constant dense<0.000000e+00> : vector<8x128xf32>
      %33 = tpu.matmul %31, %32, %cst_26 {dimension_numbers = #tpu.dot_dimension_numbers<[1], [0], [0], [1], [0, 0, 1, 1], [], []>} : vector<8x256xbf16>, vector<256x128xbf16>, vector<8x128xf32> -> vector<8x128xf32>
      %c0_27 = arith.constant 0 : index
      %c0_28 = arith.constant 0 : index
      %34 = vector.load %arg10[%c0_27, %c0_28] : memref<1x128xf32, #tpu.memory_space<vmem>>, vector<1x128xf32>
      %35 = vector.broadcast %34 : vector<1x128xf32> to vector<8x128xf32>
      %36 = arith.addf %33, %35 : vector<8x128xf32>
      %37 = math.tanh %36 : vector<8x128xf32>
      %38 = arith.truncf %37 : vector<8x128xf32> to vector<8x128xbf16>
      %39 = arith.extf %38 : vector<8x128xbf16> to vector<8x128xf32>
      %c0_29 = arith.constant 0 : index
      %c0_30 = arith.constant 0 : index
      %40 = vector.load %arg11[%c0_29, %c0_30] : memref<8x128xf32, #tpu.memory_space<vmem>>, vector<8x128xf32>
      tpu.vector_store %arg11[%c0_29, %c0_30], %39 {strides = array<i32>} : memref<8x128xf32, #tpu.memory_space<vmem>>, vector<8x128xf32>,
    } else {
    }
    return
  }
  func.func @transform_0(%arg0: i32, %arg1: i32) -> (i32, i32) {
    %c0_i32 = arith.constant 0 : i32
    return %arg0, %arg1 : i32, i32
  }
  func.func @transform_1(%arg0: i32, %arg1: i32) -> (i32, i32) {
    %c0_i32 = arith.constant 0 : i32
    %c0_i32_0 = arith.constant 0 : i32
    %c0_i32_1 = arith.constant 0 : i32
    return %c0_i32, %c0_i32_0 : i32, i32
  }
  func.func @transform_2(%arg0: i32, %arg1: i32) -> (i32, i32) {
    %c0_i32 = arith.constant 0 : i32
    %c0_i32_0 = arith.constant 0 : i32
    %c0_i32_1 = arith.constant 0 : i32
    return %c0_i32, %c0_i32_0 : i32, i32
  }
  func.func @transform_3(%arg0: i32, %arg1: i32) -> (i32, i32) {
    %c0_i32 = arith.constant 0 : i32
    %c0_i32_0 = arith.constant 0 : i32
    %c0_i32_1 = arith.constant 0 : i32
    return %c0_i32, %c0_i32_0 : i32, i32
  }
  func.func @transform_4(%arg0: i32, %arg1: i32) -> (i32, i32) {
    %c0_i32 = arith.constant 0 : i32
    %c0_i32_0 = arith.constant 0 : i32
    %c0_i32_1 = arith.constant 0 : i32
    return %c0_i32, %c0_i32_0 : i32, i32
  }
  func.func @transform_5(%arg0: i32, %arg1: i32) -> (i32, i32) {
    %c0_i32 = arith.constant 0 : i32
    %c0_i32_0 = arith.constant 0 : i32
    %c0_i32_1 = arith.constant 0 : i32
    return %c0_i32, %c0_i32_0 : i32, i32
  }
  func.func @transform_6(%arg0: i32, %arg1: i32) -> (i32, i32) {
    %c0_i32 = arith.constant 0 : i32
    %c0_i32_0 = arith.constant 0 : i32
    %c0_i32_1 = arith.constant 0 : i32
    return %c0_i32, %c0_i32_0 : i32, i32
  }
  func.func @transform_7(%arg0: i32, %arg1: i32) -> (i32, i32) {
    %c0_i32 = arith.constant 0 : i32
    %c0_i32_0 = arith.constant 0 : i32
    %c0_i32_1 = arith.constant 0 : i32
    return %c0_i32, %c0_i32_0 : i32, i32
  }
  func.func @transform_8(%arg0: i32, %arg1: i32) -> (i32, i32) {
    %c0_i32 = arith.constant 0 : i32
    %c0_i32_0 = arith.constant 0 : i32
    %c0_i32_1 = arith.constant 0 : i32
    return %c0_i32, %c0_i32_0 : i32, i32
  }
  func.func @transform_9(%arg0: i32, %arg1: i32) -> (i32, i32) {
    %c0_i32 = arith.constant 0 : i32
    %c0_i32_0 = arith.constant 0 : i32
    return %arg0, %c0_i32 : i32, i32
  }
}

module attributes {stable_mosaic.version = 11 : i64} {
  func.func @_mlp_kernel(%arg0: i32, %arg1: i32, %arg2: memref<8x256xbf16, #tpu.memory_space<vmem>>, %arg3: memref<256x1024xbf16, #tpu.memory_space<vmem>>, %arg4: memref<1x1024xf32, #tpu.memory_space<vmem>>, %arg5: memref<1024x512xbf16, #tpu.memory_space<vmem>>, %arg6: memref<1x512xf32, #tpu.memory_space<vmem>>, %arg7: memref<512x256xbf16, #tpu.memory_space<vmem>>, %arg8: memref<1x256xf32, #tpu.memory_space<vmem>>, %arg9: memref<256x128xbf16, #tpu.memory_space<vmem>>, %arg10: memref<1x128xf32, #tpu.memory_space<vmem>>, %arg11: memref<8x128xf32, #tpu.memory_space<vmem>>, %arg12: memref<8x1024xf32, #tpu.memory_space<vmem>>) attributes {dimension_semantics = [#tpu.dimension_semantics<parallel>, #tpu.dimension_semantics<arbitrary>], iteration_bounds = array<i64: 1, 1>, scalar_prefetch = 0 : i64, scratch_operands = 1 : i64, tpu.core_type = #tpu.core_type<tc>, window_params = [{transform_indices = @transform_0, window_bounds = array<i64: 8, 256>}, {pipeline_mode = #tpu.pipeline_mode<synchronous>, transform_indices = @transform_1, window_bounds = array<i64: 256, 1024>}, {pipeline_mode = #tpu.pipeline_mode<synchronous>, transform_indices = @transform_2, window_bounds = array<i64: 1, 1024>}, {pipeline_mode = #tpu.pipeline_mode<synchronous>, transform_indices = @transform_3, window_bounds = array<i64: 1024, 512>}, {pipeline_mode = #tpu.pipeline_mode<synchronous>, transform_indices = @transform_4, window_bounds = array<i64: 1, 512>}, {pipeline_mode = #tpu.pipeline_mode<synchronous>, transform_indices = @transform_5, window_bounds = array<i64: 512, 256>}, {pipeline_mode = #tpu.pipeline_mode<synchronous>, transform_indices = @transform_6, window_bounds = array<i64: 1, 256>}, {pipeline_mode = #tpu.pipeline_mode<synchronous>, transform_indices = @transform_7, window_bounds = array<i64: 256, 128>}, {pipeline_mode = #tpu.pipeline_mode<synchronous>, transform_indices = @transform_8, window_bounds = array<i64: 1, 128>}, {transform_indices = @transform_9, window_bounds = array<i64: 8, 128>}]} {
    %c0_i32 = arith.constant 0 : i32
    %0 = arith.cmpi eq, %arg1, %c0_i32 : i32
    %1 = arith.extui %0 : i1 to i32
    %c0_i32_0 = arith.constant 0 : i32
    %2 = arith.cmpi ne, %1, %c0_i32_0 : i32
    scf.if %2 {
      %cst_10 = arith.constant 0.000000e+00 : f32
      %12 = vector.broadcast %cst_10 : f32 to vector<8x1024xf32>
      %c0_11 = arith.constant 0 : index
      %c0_12 = arith.constant 0 : index
      %13 = vector.load %arg12[%c0_11, %c0_12] : memref<8x1024xf32, #tpu.memory_space<vmem>>, vector<8x1024xf32>
      tpu.vector_store %arg12[%c0_11, %c0_12], %12 {strides = array<i32>} : memref<8x1024xf32, #tpu.memory_space<vmem>>, vector<8x1024xf32>,
    } else {
    }
    %c0 = arith.constant 0 : index
    %c0_1 = arith.constant 0 : index
    %3 = vector.load %arg12[%c0, %c0_1] : memref<8x1024xf32, #tpu.memory_space<vmem>>, vector<8x1024xf32>
    %c0_2 = arith.constant 0 : index
    %c0_3 = arith.constant 0 : index
    %4 = vector.load %arg2[%c0_2, %c0_3] : memref<8x256xbf16, #tpu.memory_space<vmem>>, vector<8x256xbf16>
    %c0_4 = arith.constant 0 : index
    %c0_5 = arith.constant 0 : index
    %5 = vector.load %arg3[%c0_4, %c0_5] : memref<256x1024xbf16, #tpu.memory_space<vmem>>, vector<256x1024xbf16>
    %cst = arith.constant dense<0.000000e+00> : vector<8x1024xf32>
    %6 = tpu.matmul %4, %5, %cst {dimension_numbers = #tpu.dot_dimension_numbers<[1], [0], [0], [1], [0, 0, 1, 1], [], []>} : vector<8x256xbf16>, vector<256x1024xbf16>, vector<8x1024xf32> -> vector<8x1024xf32>
    %7 = arith.addf %3, %6 : vector<8x1024xf32>
    %c0_6 = arith.constant 0 : index
    %c0_7 = arith.constant 0 : index
    %8 = vector.load %arg12[%c0_6, %c0_7] : memref<8x1024xf32, #tpu.memory_space<vmem>>, vector<8x1024xf32>
    tpu.vector_store %arg12[%c0_6, %c0_7], %7 {strides = array<i32>} : memref<8x1024xf32, #tpu.memory_space<vmem>>, vector<8x1024xf32>,
    %c0_i32_8 = arith.constant 0 : i32
    %9 = arith.cmpi eq, %arg1, %c0_i32_8 : i32
    %10 = arith.extui %9 : i1 to i32
    %c0_i32_9 = arith.constant 0 : i32
    %11 = arith.cmpi ne, %10, %c0_i32_9 : i32
    scf.if %11 {
      %c0_10 = arith.constant 0 : index
      %c0_11 = arith.constant 0 : index
      %12 = vector.load %arg12[%c0_10, %c0_11] : memref<8x1024xf32, #tpu.memory_space<vmem>>, vector<8x1024xf32>
      %c0_12 = arith.constant 0 : index
      %c0_13 = arith.constant 0 : index
      %13 = vector.load %arg4[%c0_12, %c0_13] : memref<1x1024xf32, #tpu.memory_space<vmem>>, vector<1x1024xf32>
      %14 = vector.broadcast %13 : vector<1x1024xf32> to vector<8x1024xf32>
      %15 = arith.addf %12, %14 : vector<8x1024xf32>
      %16 = math.tanh %15 : vector<8x1024xf32>
      %17 = arith.truncf %16 : vector<8x1024xf32> to vector<8x1024xbf16>
      %c0_14 = arith.constant 0 : index
      %c0_15 = arith.constant 0 : index
      %18 = vector.load %arg5[%c0_14, %c0_15] : memref<1024x512xbf16, #tpu.memory_space<vmem>>, vector<1024x512xbf16>
      %cst_16 = arith.constant dense<0.000000e+00> : vector<8x512xf32>
      %19 = tpu.matmul %17, %18, %cst_16 {dimension_numbers = #tpu.dot_dimension_numbers<[1], [0], [0], [1], [0, 0, 1, 1], [], []>} : vector<8x1024xbf16>, vector<1024x512xbf16>, vector<8x512xf32> -> vector<8x512xf32>
      %c0_17 = arith.constant 0 : index
      %c0_18 = arith.constant 0 : index
      %20 = vector.load %arg6[%c0_17, %c0_18] : memref<1x512xf32, #tpu.memory_space<vmem>>, vector<1x512xf32>
      %21 = vector.broadcast %20 : vector<1x512xf32> to vector<8x512xf32>
      %22 = arith.addf %19, %21 : vector<8x512xf32>
      %23 = math.tanh %22 : vector<8x512xf32>
      %24 = arith.truncf %23 : vector<8x512xf32> to vector<8x512xbf16>
      %c0_19 = arith.constant 0 : index
      %c0_20 = arith.constant 0 : index
      %25 = vector.load %arg7[%c0_19, %c0_20] : memref<512x256xbf16, #tpu.memory_space<vmem>>, vector<512x256xbf16>
      %cst_21 = arith.constant dense<0.000000e+00> : vector<8x256xf32>
      %26 = tpu.matmul %24, %25, %cst_21 {dimension_numbers = #tpu.dot_dimension_numbers<[1], [0], [0], [1], [0, 0, 1, 1], [], []>} : vector<8x512xbf16>, vector<512x256xbf16>, vector<8x256xf32> -> vector<8x256xf32>
      %c0_22 = arith.constant 0 : index
      %c0_23 = arith.constant 0 : index
      %27 = vector.load %arg8[%c0_22, %c0_23] : memref<1x256xf32, #tpu.memory_space<vmem>>, vector<1x256xf32>
      %28 = vector.broadcast %27 : vector<1x256xf32> to vector<8x256xf32>
      %29 = arith.addf %26, %28 : vector<8x256xf32>
      %30 = math.tanh %29 : vector<8x256xf32>
      %31 = arith.truncf %30 : vector<8x256xf32> to vector<8x256xbf16>
      %c0_24 = arith.constant 0 : index
      %c0_25 = arith.constant 0 : index
      %32 = vector.load %arg9[%c0_24, %c0_25] : memref<256x128xbf16, #tpu.memory_space<vmem>>, vector<256x128xbf16>
      %cst_26 = arith.constant dense<0.000000e+00> : vector<8x128xf32>
      %33 = tpu.matmul %31, %32, %cst_26 {dimension_numbers = #tpu.dot_dimension_numbers<[1], [0], [0], [1], [0, 0, 1, 1], [], []>} : vector<8x256xbf16>, vector<256x128xbf16>, vector<8x128xf32> -> vector<8x128xf32>
      %c0_27 = arith.constant 0 : index
      %c0_28 = arith.constant 0 : index
      %34 = vector.load %arg10[%c0_27, %c0_28] : memref<1x128xf32, #tpu.memory_space<vmem>>, vector<1x128xf32>
      %35 = vector.broadcast %34 : vector<1x128xf32> to vector<8x128xf32>
      %36 = arith.addf %33, %35 : vector<8x128xf32>
      %37 = math.tanh %36 : vector<8x128xf32>
      %38 = arith.truncf %37 : vector<8x128xf32> to vector<8x128xbf16>
      %39 = arith.extf %38 : vector<8x128xbf16> to vector<8x128xf32>
      %c0_29 = arith.constant 0 : index
      %c0_30 = arith.constant 0 : index
      %40 = vector.load %arg11[%c0_29, %c0_30] : memref<8x128xf32, #tpu.memory_space<vmem>>, vector<8x128xf32>
      tpu.vector_store %arg11[%c0_29, %c0_30], %39 {strides = array<i32>} : memref<8x128xf32, #tpu.memory_space<vmem>>, vector<8x128xf32>,
    } else {
    }
    return
  }
  func.func @transform_0(%arg0: i32, %arg1: i32) -> (i32, i32) {
    %c0_i32 = arith.constant 0 : i32
    return %arg0, %arg1 : i32, i32
  }
  func.func @transform_1(%arg0: i32, %arg1: i32) -> (i32, i32) {
    %c0_i32 = arith.constant 0 : i32
    %c0_i32_0 = arith.constant 0 : i32
    %c0_i32_1 = arith.constant 0 : i32
    return %c0_i32, %c0_i32_0 : i32, i32
  }
  func.func @transform_2(%arg0: i32, %arg1: i32) -> (i32, i32) {
    %c0_i32 = arith.constant 0 : i32
    %c0_i32_0 = arith.constant 0 : i32
    %c0_i32_1 = arith.constant 0 : i32
    return %c0_i32, %c0_i32_0 : i32, i32
  }
  func.func @transform_3(%arg0: i32, %arg1: i32) -> (i32, i32) {
    %c0_i32 = arith.constant 0 : i32
    %c0_i32_0 = arith.constant 0 : i32
    %c0_i32_1 = arith.constant 0 : i32
    return %c0_i32, %c0_i32_0 : i32, i32
  }
  func.func @transform_4(%arg0: i32, %arg1: i32) -> (i32, i32) {
    %c0_i32 = arith.constant 0 : i32
    %c0_i32_0 = arith.constant 0 : i32
    %c0_i32_1 = arith.constant 0 : i32
    return %c0_i32, %c0_i32_0 : i32, i32
  }
  func.func @transform_5(%arg0: i32, %arg1: i32) -> (i32, i32) {
    %c0_i32 = arith.constant 0 : i32
    %c0_i32_0 = arith.constant 0 : i32
    %c0_i32_1 = arith.constant 0 : i32
    return %c0_i32, %c0_i32_0 : i32, i32
  }
  func.func @transform_6(%arg0: i32, %arg1: i32) -> (i32, i32) {
    %c0_i32 = arith.constant 0 : i32
    %c0_i32_0 = arith.constant 0 : i32
    %c0_i32_1 = arith.constant 0 : i32
    return %c0_i32, %c0_i32_0 : i32, i32
  }
  func.func @transform_7(%arg0: i32, %arg1: i32) -> (i32, i32) {
    %c0_i32 = arith.constant 0 : i32
    %c0_i32_0 = arith.constant 0 : i32
    %c0_i32_1 = arith.constant 0 : i32
    return %c0_i32, %c0_i32_0 : i32, i32
  }
  func.func @transform_8(%arg0: i32, %arg1: i32) -> (i32, i32) {
    %c0_i32 = arith.constant 0 : i32
    %c0_i32_0 = arith.constant 0 : i32
    %c0_i32_1 = arith.constant 0 : i32
    return %c0_i32, %c0_i32_0 : i32, i32
  }
  func.func @transform_9(%arg0: i32, %arg1: i32) -> (i32, i32) {
    %c0_i32 = arith.constant 0 : i32
    %c0_i32_0 = arith.constant 0 : i32
    return %arg0, %c0_i32 : i32, i32
  }
}

</mosaic_0001>

<bundles_post_ra>
// kernel: tpu_custom_call.1
= control target key start
LH: loop header
LB: loop body
LE: loop exit
PB: predicated region body
PF: predicated region fallthrough
CT: control target
= control target key end

     0   :  { %14 = vsyncpa [#allocation4], 0  ;;  %s5121_s0 = inlined_call_operand.hbm [shape: bf16[8,256], index: 0, kind: input, shape index: {}]   ;;  %s5122_s1 = inlined_call_operand.hbm [shape: bf16[256,1024], index: 1, kind: input, shape index: {}]   ;;  %s5123_s2 = inlined_call_operand.hbm [shape: f32[1,1024], index: 2, kind: input, shape index: {}]   ;;  %s5124_s3 = inlined_call_operand.hbm [shape: bf16[1024,512], index: 3, kind: input, shape index: {}]   ;;  %s5125_s4 = inlined_call_operand.vmem [shape: f32[1,512], index: 4, kind: input, shape index: {}]   ;;  %s5126_s5 = inlined_call_operand.hbm [shape: bf16[512,256], index: 5, kind: input, shape index: {}]   ;;  %s5127_s6 = inlined_call_operand.vmem [shape: f32[1,256], index: 6, kind: input, shape index: {}]   ;;  %s5128_s7 = inlined_call_operand.hbm [shape: bf16[256,128], index: 7, kind: input, shape index: {}]   ;;  %s5129_s8 = inlined_call_operand.vmem [shape: f32[1,128], index: 8, kind: input, shape index: {}]   ;;  %s5130_s9 = inlined_call_operand.hbm [shape: f32[8,128], index: 9, kind: output, shape index: {}]  }
   0x1   :  { %15 = vsyncpa [#allocation7], 0 }
   0x2   :  { %16 = vsyncpa [#allocation10], 0 }
   0x3   :  { %17 = vsyncpa [#allocation13], 0 }
   0x4   :  { %18 = vsyncpa [#allocation5], 0  ;;  %s4920_s30 = smov [#allocation6]  }
   0x5   :  { %s34_s10 = sshll.u32 %s4920_s30, 4  ;;  %s35_s10 = int_to_ptr.vmem [resolvable:$true] %s34_s10 }
   0x6   :  { %s4778_s11 = scalar_lea.vmem %s35_s10, 16384  ;;  %p4783_p1 = scmp.lt.s32.totalorder %s35_s10, %s35_s10 }
   0x7   :  { %p4779_p0 = scmp.ne.s32.totalorder %s35_s10, %s4778_s11  ;;  %p4784_p2 = scmp.lt.s32.totalorder %s4778_s11, %s4778_s11 }
   0x9   :  { %p4785_p3 = por %p4784_p2, %p4783_p1 }
   0xb   :  { %p4786_p4 = pnand %p4785_p3, %p4779_p0 }
   0xd   :  { %4789 = shalt.err (!%p4786_p4)
}
   0xe   :  { %s4921_s12 = smov 512   ;;  %s4922_s13 = smov 32  }
   0xf   :  { %40 = dma.hbm_to_vmem [thread:$0]  %s5122_s1, 16384, %s35_s10, [#allocation7], %s4921_s12, %s4921_s12, %s4922_s13  }
  0x10   :  { %s4923_s16 = smov [#allocation9]  }
  0x11   :  { %s56_s17 = sshll.u32 %s4923_s16, 4  ;;  %s57_s17 = int_to_ptr.vmem [resolvable:$true] %s56_s17 }
  0x12   :  { %s4798_s18 = scalar_lea.vmem %s57_s17, 32768  ;;  %p4803_p6 = scmp.lt.s32.totalorder %s57_s17, %s57_s17 }
  0x13   :  { %p4799_p5 = scmp.ne.s32.totalorder %s57_s17, %s4798_s18  ;;  %p4804_p7 = scmp.lt.s32.totalorder %s4798_s18, %s4798_s18 }
  0x15   :  { %p4805_p8 = por %p4804_p7, %p4803_p6 }
  0x17   :  { %p4806_p9 = pnand %p4805_p8, %p4799_p5 }
  0x19   :  { %4809 = shalt.err (!%p4806_p9)
}
  0x1a   :  { %s4924_s19 = smov 256   ;;  %s4925_s20 = smov 16  }
  0x1b   :  { %62 = dma.hbm_to_vmem [thread:$0]  %s5124_s3, 32768, %s57_s17, [#allocation10], %s4924_s19, %s4924_s19, %s4925_s20  }
  0x1c   :  { %s4926_s23 = smov [#allocation3]   ;;  %s4927_s25 = smov [#allocation8]  }
  0x1d   :  { %s25_s24 = sshll.u32 %s4926_s23, 4  ;;  %s47_s1 = sshll.u32 %s4927_s25, 4  ;;  %s26_s24 = int_to_ptr.vmem [resolvable:$true] %s25_s24  ;;  %s48_s1 = int_to_ptr.vmem [resolvable:$true] %s47_s1 }
  0x1e   :  { %s4818_s26 = scalar_lea.vmem %s26_s24, 128  ;;  %p4823_p11 = scmp.lt.s32.totalorder %s26_s24, %s26_s24 }
  0x1f   :  { %p4819_p10 = scmp.ne.s32.totalorder %s26_s24, %s4818_s26  ;;  %p4824_p12 = scmp.lt.s32.totalorder %s4818_s26, %s4818_s26 }
  0x21   :  { %p4825_p13 = por %p4824_p12, %p4823_p11 }
  0x23   :  { %p4826_p0 = pnand %p4825_p13, %p4819_p10 }
  0x25   :  { %4829 = shalt.err (!%p4826_p0)
}
  0x26   :  { %28 = dma.hbm_to_vmem [thread:$0]  %s5121_s0, 128, %s26_s24, [#allocation4]  }
  0x27   :  { %s4838_s29 = scalar_lea.vmem %s48_s1, 128  ;;  %p4843_p2 = scmp.lt.s32.totalorder %s48_s1, %s48_s1 }
  0x28   :  { %p4839_p1 = scmp.ne.s32.totalorder %s48_s1, %s4838_s29  ;;  %p4844_p3 = scmp.lt.s32.totalorder %s4838_s29, %s4838_s29 }
  0x2a   :  { %p4845_p4 = por %p4844_p3, %p4843_p2 }
  0x2c   :  { %p4846_p5 = pnand %p4845_p4, %p4839_p1 }
  0x2e   :  { %4849 = shalt.err (!%p4846_p5)
}
  0x2f   :  { %50 = dma.hbm_to_vmem [thread:$0]  %s5123_s2, 128, %s48_s1, [#allocation7]  }
  0x30   :  { %s4928_s10 = smov [#allocation11]  }
  0x31   :  { %s70_s11 = sshll.u32 %s4928_s10, 4  ;;  %s71_s11 = int_to_ptr.vmem [resolvable:$true] %s70_s11 }
  0x32   :  { %s4858_s12 = scalar_lea.vmem %s71_s11, 8192  ;;  %p4863_p7 = scmp.lt.s32.totalorder %s71_s11, %s71_s11 }
  0x33   :  { %p4859_p6 = scmp.ne.s32.totalorder %s71_s11, %s4858_s12  ;;  %p4864_p8 = scmp.lt.s32.totalorder %s4858_s12, %s4858_s12 }
  0x35   :  { %p4865_p9 = por %p4864_p8, %p4863_p7 }
  0x37   :  { %p4866_p10 = pnand %p4865_p9, %p4859_p6 }
  0x39   :  { %4869 = shalt.err (!%p4866_p10)
}
  0x3a   :  { %s4929_s0 = smov 128   ;;  %s4930_s13 = smov 8  }
  0x3b   :  { %76 = dma.hbm_to_vmem [thread:$0]  %s5126_s5, 8192, %s71_s11, [#allocation10], %s4929_s0, %s4929_s0, %s4930_s13  }
  0x3c   :  { %s4931_s16 = smov [#allocation12]  }
  0x3d   :  { %s84_s17 = sshll.u32 %s4931_s16, 4  ;;  %s85_s17 = int_to_ptr.vmem [resolvable:$true] %s84_s17 }
  0x3e   :  { %s4878_s2 = scalar_lea.vmem %s85_s17, 2048  ;;  %p4883_p12 = scmp.lt.s32.totalorder %s85_s17, %s85_s17 }
  0x3f   :  { %p4879_p11 = scmp.ne.s32.totalorder %s85_s17, %s4878_s2  ;;  %p4884_p13 = scmp.lt.s32.totalorder %s4878_s2, %s4878_s2 }
  0x41   :  { %p4885_p0 = por %p4884_p13, %p4883_p12 }
  0x43   :  { %p4886_p1 = pnand %p4885_p0, %p4879_p11 }
  0x45   :  { %4889 = shalt.err (!%p4886_p1)
}
  0x46   :  { %s4932_s18 = smov 64   ;;  %s4933_s19 = smov 4  }
  0x47   :  { %90 = dma.hbm_to_vmem [thread:$0]  %s5128_s7, 2048, %s85_s17, [#allocation13], %s4932_s18, %s4932_s18, %s4933_s19  }
  0x48   :  { %4910 = dma.done.wait [#allocation4], 128  }
  0x49   :  { %4911 = vsyncadd [#allocation4], 4294967168 }
  0x4a   :  { %4912 = dma.done.wait [#allocation7], 16512  }
  0x4b   :  { %4913 = vsyncadd [#allocation7], 4294950784 }
  0x4c   :  { %4914 = dma.done.wait [#allocation10], 40960  }
  0x4d   :  { %4915 = vsyncadd [#allocation10], 4294926336 }
  0x4e   :  { %4916 = dma.done.wait [#allocation13], 2048  }
  0x4f   :  { %4917 = vsyncadd [#allocation13], 4294965248  ;;  %v189_v0 = vld [vmem:[#allocation6 + $0x1c0] sm:$0xff]  ;;  %v190_v2 = vld [vmem:[#allocation6 + $0x1c8] sm:$0xff]  ;;  %s4934_s24 = smov [#allocation14]  }
  0x50   :  { %v193_v1 = vld [vmem:[#allocation6 + $0x1e0] sm:$0xff]  ;;  %v194_v4 = vld [vmem:[#allocation6 + $0x1e8] sm:$0xff]  ;;  %v5003_v53 = vld [vmem:[#allocation3] sm:$0xff]  ;;  %s3726_s25 = sshll.u32 %s4934_s24, 4  ;;  %s3727_s25 = int_to_ptr.vmem [resolvable:$true] %s3726_s25 }
  0x51   :  { %v3797_v3 = vcombine.high %v189_v0, %v193_v1  ;;  %v3796_v5 = vcombine.low %v189_v0, %v193_v1  ;;  %v181_v6 = vld [vmem:[#allocation6 + $0x180] sm:$0xff]  ;;  %v3799_v8 = vcombine.high %v190_v2, %v194_v4  ;;  %v3798_v9 = vcombine.low %v190_v2, %v194_v4  ;;  %v182_v11 = vld [vmem:[#allocation6 + $0x188] sm:$0xff]  ;;  %s4890_s1 = scalar_lea.vmem %s3727_s25, 128  ;;  %p4895_p3 = scmp.lt.s32.totalorder %s3727_s25, %s3727_s25 }
  0x52   :  { %v185_v7 = vld [vmem:[#allocation6 + $0x1a0] sm:$0xff]  ;;  %v186_v12 = vld [vmem:[#allocation6 + $0x1a8] sm:$0xff]  ;;  %v5007_v57 = vcombine.high %v5003_v53, %v5003_v53  ;;  %p4891_p2 = scmp.ne.s32.totalorder %s3727_s25, %s4890_s1  ;;  %p4896_p4 = scmp.lt.s32.totalorder %s4890_s1, %s4890_s1 }
  0x53   :  { %v3789_v10 = vcombine.high %v181_v6, %v185_v7  ;;  %v173_v13 = vld [vmem:[#allocation6 + $0x140] sm:$0xff]  ;;  %908 = vmatprep.subr.bf16.mxu0 %v3797_v3  ;;  %v3791_v14 = vcombine.high %v182_v11, %v186_v12  ;;  %v174_v16 = vld [vmem:[#allocation6 + $0x148] sm:$0xff]  ;;  %949 = vmatprep.subr.bf16.mxu1 %v3799_v8  ;;  %v3788_v18 = vcombine.low %v181_v6, %v185_v7 }
  0x54   :  { %v177_v15 = vld [vmem:[#allocation6 + $0x160] sm:$0xff]  ;;  %v178_v17 = vld [vmem:[#allocation6 + $0x168] sm:$0xff]  ;;  %909 = vmatpush1.bf16.msra.mxu0 %v3796_v5  ;;  %950 = vmatpush1.bf16.msra.mxu1 %v3798_v9  ;;  %v3790_v19 = vcombine.low %v182_v11, %v186_v12  ;;  %p4897_p5 = por %p4896_p4, %p4895_p3 }
  0x55   :  { %910 = vmatprep.subr.bf16.mxu0 %v3789_v10  ;;  %v3781_v20 = vcombine.high %v173_v13, %v177_v15  ;;  %951 = vmatprep.subr.bf16.mxu1 %v3791_v14  ;;  %v3783_v21 = vcombine.high %v174_v16, %v178_v17  ;;  %v165_v22 = vld [vmem:[#allocation6 + $0x100] sm:$0xff]  ;;  %v166_v24 = vld [vmem:[#allocation6 + $0x108] sm:$0xff]  ;;  %v3780_v26 = vcombine.low %v173_v13, %v177_v15 }
  0x56   :  { %v169_v23 = vld [vmem:[#allocation6 + $0x120] sm:$0xff]  ;;  %v170_v25 = vld [vmem:[#allocation6 + $0x128] sm:$0xff]  ;;  %v3782_v27 = vcombine.low %v174_v16, %v178_v17  ;;  %940 = vmatprep.mubr.bf16.mxu0 %v5007_v57  ;;  %981 = vmatprep.mubr.bf16.mxu1 %v5007_v57  ;;  %p4898_p6 = pnand %p4897_p5, %p4891_p2 }
  0x57   :  { %v3773_v28 = vcombine.high %v165_v22, %v169_v23  ;;  %v3775_v29 = vcombine.high %v166_v24, %v170_v25  ;;  %v157_v30 = vld [vmem:[#allocation6 + $0xc0] sm:$0xff]  ;;  %v158_v32 = vld [vmem:[#allocation6 + $0xc8] sm:$0xff]  ;;  %v3772_v34 = vcombine.low %v165_v22, %v169_v23  ;;  %v3774_v35 = vcombine.low %v166_v24, %v170_v25 }
  0x58   :  { %911 = vmatpush1.bf16.msra.mxu0 %v3788_v18  ;;  %952 = vmatpush1.bf16.msra.mxu1 %v3790_v19  ;;  %v161_v31 = vld [vmem:[#allocation6 + $0xe0] sm:$0xff]  ;;  %v162_v33 = vld [vmem:[#allocation6 + $0xe8] sm:$0xff] }
  0x59   :  { %912 = vmatprep.subr.bf16.mxu0 %v3781_v20  ;;  %953 = vmatprep.subr.bf16.mxu1 %v3783_v21  ;;  %v3765_v36 = vcombine.high %v157_v30, %v161_v31  ;;  %v3767_v37 = vcombine.high %v158_v32, %v162_v33  ;;  %v149_v38 = vld [vmem:[#allocation6 + $0x80] sm:$0xff]  ;;  %v150_v40 = vld [vmem:[#allocation6 + $0x88] sm:$0xff]  ;;  %v3764_v42 = vcombine.low %v157_v30, %v161_v31 }
  0x5a   :  { %v153_v39 = vld [vmem:[#allocation6 + $0xa0] sm:$0xff]  ;;  %v154_v41 = vld [vmem:[#allocation6 + $0xa8] sm:$0xff]  ;;  %v3766_v43 = vcombine.low %v158_v32, %v162_v33 }
  0x5b   :  { %v3757_v44 = vcombine.high %v149_v38, %v153_v39  ;;  %v3759_v45 = vcombine.high %v150_v40, %v154_v41  ;;  %v141_v46 = vld [vmem:[#allocation6 + $0x40] sm:$0xff]  ;;  %v142_v48 = vld [vmem:[#allocation6 + $0x48] sm:$0xff]  ;;  %v3756_v50 = vcombine.low %v149_v38, %v153_v39  ;;  %v3758_v51 = vcombine.low %v150_v40, %v154_v41 }
  0x5c   :  { %913 = vmatpush1.bf16.msra.mxu0 %v3780_v26  ;;  %954 = vmatpush1.bf16.msra.mxu1 %v3782_v27  ;;  %v145_v47 = vld [vmem:[#allocation6 + $0x60] sm:$0xff]  ;;  %v146_v49 = vld [vmem:[#allocation6 + $0x68] sm:$0xff] }
  0x5d   :  { %914 = vmatprep.subr.bf16.mxu0 %v3773_v28  ;;  %955 = vmatprep.subr.bf16.mxu1 %v3775_v29  ;;  %v3749_v52 = vcombine.high %v141_v46, %v145_v47  ;;  %v3751_v54 = vcombine.high %v142_v48, %v146_v49  ;;  %v133_v55 = vld [vmem:[#allocation6] sm:$0xff]  ;;  %v134_v58 = vld [vmem:[#allocation6 + $0x8] sm:$0xff]  ;;  %v3748_v60 = vcombine.low %v141_v46, %v145_v47 }
  0x5e   :  { %v137_v56 = vld [vmem:[#allocation6 + $0x20] sm:$0xff]  ;;  %v138_v59 = vld [vmem:[#allocation6 + $0x28] sm:$0xff]  ;;  %v3750_v61 = vcombine.low %v142_v48, %v146_v49 }
  0x5f   :  { %v3741_v62 = vcombine.high %v133_v55, %v137_v56  ;;  %v3743_v63 = vcombine.high %v134_v58, %v138_v59  ;;  %v253_v0 = vld [vmem:[#allocation6 + $0x3c0] sm:$0xff]  ;;  %v254_v2 = vld [vmem:[#allocation6 + $0x3c8] sm:$0xff]  ;;  %v3740_v4 = vcombine.low %v133_v55, %v137_v56  ;;  %v3742_v5 = vcombine.low %v134_v58, %v138_v59 }
  0x60   :  { %915 = vmatpush1.bf16.msra.mxu0 %v3772_v34  ;;  %956 = vmatpush1.bf16.msra.mxu1 %v3774_v35  ;;  %v257_v1 = vld [vmem:[#allocation6 + $0x3e0] sm:$0xff]  ;;  %v258_v3 = vld [vmem:[#allocation6 + $0x3e8] sm:$0xff] }
  0x61   :  { %916 = vmatprep.subr.bf16.mxu0 %v3765_v36  ;;  %957 = vmatprep.subr.bf16.mxu1 %v3767_v37  ;;  %v3861_v6 = vcombine.high %v253_v0, %v257_v1  ;;  %v3863_v7 = vcombine.high %v254_v2, %v258_v3  ;;  %v245_v8 = vld [vmem:[#allocation6 + $0x380] sm:$0xff]  ;;  %v246_v10 = vld [vmem:[#allocation6 + $0x388] sm:$0xff]  ;;  %v3860_v12 = vcombine.low %v253_v0, %v257_v1  ;;  %v191_v1 = vld [vmem:[#allocation6 + $0x1d0] sm:$0xff] }
  0x62   :  { %v249_v9 = vld [vmem:[#allocation6 + $0x3a0] sm:$0xff]  ;;  %v250_v11 = vld [vmem:[#allocation6 + $0x3a8] sm:$0xff]  ;;  %v3862_v13 = vcombine.low %v254_v2, %v258_v3  ;;  %v195_v3 = vld [vmem:[#allocation6 + $0x1f0] sm:$0xff] }
  0x63   :  { %v3853_v14 = vcombine.high %v245_v8, %v249_v9  ;;  %v3855_v15 = vcombine.high %v246_v10, %v250_v11  ;;  %v237_v16 = vld [vmem:[#allocation6 + $0x340] sm:$0xff]  ;;  %v238_v18 = vld [vmem:[#allocation6 + $0x348] sm:$0xff]  ;;  %v3852_v20 = vcombine.low %v245_v8, %v249_v9  ;;  %v3854_v21 = vcombine.low %v246_v10, %v250_v11  ;;  %v183_v9 = vld [vmem:[#allocation6 + $0x190] sm:$0xff] }
  0x64   :  { %917 = vmatpush1.bf16.msra.mxu0 %v3764_v42  ;;  %958 = vmatpush1.bf16.msra.mxu1 %v3766_v43  ;;  %v241_v17 = vld [vmem:[#allocation6 + $0x360] sm:$0xff]  ;;  %v242_v19 = vld [vmem:[#allocation6 + $0x368] sm:$0xff]  ;;  %v3801_v8 = vcombine.high %v191_v1, %v195_v3  ;;  %v187_v11 = vld [vmem:[#allocation6 + $0x1b0] sm:$0xff] }
  0x65   :  { %918 = vmatprep.subr.bf16.mxu0 %v3757_v44  ;;  %959 = vmatprep.subr.bf16.mxu1 %v3759_v45  ;;  %v3845_v22 = vcombine.high %v237_v16, %v241_v17  ;;  %v3847_v23 = vcombine.high %v238_v18, %v242_v19  ;;  %v229_v24 = vld [vmem:[#allocation6 + $0x300] sm:$0xff]  ;;  %v230_v26 = vld [vmem:[#allocation6 + $0x308] sm:$0xff]  ;;  %v3844_v28 = vcombine.low %v237_v16, %v241_v17 }
  0x66   :  { %v233_v25 = vld [vmem:[#allocation6 + $0x320] sm:$0xff]  ;;  %v234_v27 = vld [vmem:[#allocation6 + $0x328] sm:$0xff]  ;;  %v3846_v29 = vcombine.low %v238_v18, %v242_v19  ;;  %v3793_v17 = vcombine.high %v183_v9, %v187_v11  ;;  %v175_v18 = vld [vmem:[#allocation6 + $0x150] sm:$0xff] }
  0x67   :  { %v3837_v30 = vcombine.high %v229_v24, %v233_v25  ;;  %v3839_v31 = vcombine.high %v230_v26, %v234_v27  ;;  %v221_v32 = vld [vmem:[#allocation6 + $0x2c0] sm:$0xff]  ;;  %v222_v34 = vld [vmem:[#allocation6 + $0x2c8] sm:$0xff]  ;;  %v3836_v36 = vcombine.low %v229_v24, %v233_v25  ;;  %v3838_v37 = vcombine.low %v230_v26, %v234_v27  ;;  %v167_v25 = vld [vmem:[#allocation6 + $0x110] sm:$0xff] }
  0x68   :  { %919 = vmatpush1.bf16.msra.mxu0 %v3756_v50  ;;  %960 = vmatpush1.bf16.msra.mxu1 %v3758_v51  ;;  %v225_v33 = vld [vmem:[#allocation6 + $0x2e0] sm:$0xff]  ;;  %v226_v35 = vld [vmem:[#allocation6 + $0x2e8] sm:$0xff]  ;;  %v171_v27 = vld [vmem:[#allocation6 + $0x130] sm:$0xff] }
  0x69   :  { %920 = vmatprep.subr.bf16.mxu0 %v3749_v52  ;;  %961 = vmatprep.subr.bf16.mxu1 %v3751_v54  ;;  %v3829_v38 = vcombine.high %v221_v32, %v225_v33  ;;  %v213_v39 = vld [vmem:[#allocation6 + $0x280] sm:$0xff]  ;;  %v3831_v40 = vcombine.high %v222_v34, %v226_v35  ;;  %v214_v42 = vld [vmem:[#allocation6 + $0x288] sm:$0xff]  ;;  %v3828_v44 = vcombine.low %v221_v32, %v225_v33  ;;  %v163_v32 = vld [vmem:[#allocation6 + $0xf0] sm:$0xff] }
  0x6a   :  { %v217_v41 = vld [vmem:[#allocation6 + $0x2a0] sm:$0xff]  ;;  %v218_v43 = vld [vmem:[#allocation6 + $0x2a8] sm:$0xff]  ;;  %v3830_v45 = vcombine.low %v222_v34, %v226_v35  ;;  %v3777_v34 = vcombine.high %v167_v25, %v171_v27  ;;  %v160_v35 = vld [vmem:[#allocation6 + $0xd8] sm:$0xff] }
  0x6b   :  { %v3821_v46 = vcombine.high %v213_v39, %v217_v41  ;;  %v205_v47 = vld [vmem:[#allocation6 + $0x240] sm:$0xff]  ;;  %v3823_v48 = vcombine.high %v214_v42, %v218_v43  ;;  %v206_v50 = vld [vmem:[#allocation6 + $0x248] sm:$0xff]  ;;  %v3820_v52 = vcombine.low %v213_v39, %v217_v41  ;;  %v3822_v54 = vcombine.low %v214_v42, %v218_v43  ;;  %v151_v39 = vld [vmem:[#allocation6 + $0x90] sm:$0xff] }
  0x6c   :  { %921 = vmatpush1.bf16.msra.mxu0 %v3748_v60  ;;  %962 = vmatpush1.bf16.msra.mxu1 %v3750_v61  ;;  %v209_v49 = vld [vmem:[#allocation6 + $0x260] sm:$0xff]  ;;  %v210_v51 = vld [vmem:[#allocation6 + $0x268] sm:$0xff]  ;;  %v152_v42 = vld [vmem:[#allocation6 + $0x98] sm:$0xff] }
  0x6d   :  { %922 = vmatprep.subr.bf16.mxu0 %v3741_v62  ;;  %963 = vmatprep.subr.bf16.mxu1 %v3743_v63  ;;  %v3813_v55 = vcombine.high %v205_v47, %v209_v49  ;;  %v197_v56 = vld [vmem:[#allocation6 + $0x200] sm:$0xff]  ;;  %v3815_v58 = vcombine.high %v206_v50, %v210_v51  ;;  %v198_v60 = vld [vmem:[#allocation6 + $0x208] sm:$0xff]  ;;  %v3812_v62 = vcombine.low %v205_v47, %v209_v49  ;;  %v156_v43 = vld [vmem:[#allocation6 + $0xb8] sm:$0xff] }
  0x6e   :  { %v201_v59 = vld [vmem:[#allocation6 + $0x220] sm:$0xff]  ;;  %v202_v61 = vld [vmem:[#allocation6 + $0x228] sm:$0xff]  ;;  %v3814_v63 = vcombine.low %v206_v50, %v210_v51  ;;  %v147_v47 = vld [vmem:[#allocation6 + $0x70] sm:$0xff] }
  0x6f   :  { %v3805_v0 = vcombine.high %v197_v56, %v201_v59  ;;  %v3807_v2 = vcombine.high %v198_v60, %v202_v61  ;;  %v144_v50 = vld [vmem:[#allocation6 + $0x58] sm:$0xff] }
  0x70   :  { %923 = vmatpush1.bf16.msra.mxu0 %v3740_v4  ;;  %964 = vmatpush1.bf16.msra.mxu1 %v3742_v5  ;;  %v192_v4 = vld [vmem:[#allocation6 + $0x1d8] sm:$0xff] }
  0x71   :  { %924 = vmatprep.subr.bf16.mxu0 %v3861_v6  ;;  %965 = vmatprep.subr.bf16.mxu1 %v3863_v7  ;;  %v196_v5 = vld [vmem:[#allocation6 + $0x1f8] sm:$0xff]  ;;  %v3804_v6 = vcombine.low %v197_v56, %v201_v59  ;;  %v3806_v7 = vcombine.low %v198_v60, %v202_v61  ;;  %v139_v56 = vld [vmem:[#allocation6 + $0x30] sm:$0xff] }
  0x72   :  { %v3803_v10 = vcombine.high %v192_v4, %v196_v5  ;;  %v3802_v16 = vcombine.low %v192_v4, %v196_v5  ;;  %v148_v51 = vld [vmem:[#allocation6 + $0x78] sm:$0xff] }
  0x73   :  { %v136_v60 = vld [vmem:[#allocation6 + $0x18] sm:$0xff] }
  0x74   :  { %925 = vmatpush2.bf16.msra.mxu0 %v3860_v12  ;;  %966 = vmatpush2.bf16.msra.mxu1 %v3862_v13  ;;  %v184_v12 = vld [vmem:[#allocation6 + $0x198] sm:$0xff]  ;;  %v5013_v13 = vcombine.low %v5003_v53, %v5003_v53  ;;  %v3792_v53 = vcombine.low %v183_v9, %v187_v11  ;;  %v251_v9 = vld [vmem:[#allocation6 + $0x3b0] sm:$0xff] }
  0x75   :  { %926 = vmatprep.subr.bf16.mxu0 %v3853_v14  ;;  %967 = vmatprep.subr.bf16.mxu1 %v3855_v15  ;;  %v188_v14 = vld [vmem:[#allocation6 + $0x1b8] sm:$0xff]  ;;  %v3800_v15 = vcombine.low %v191_v1, %v195_v3  ;;  %v259_v1 = vld [vmem:[#allocation6 + $0x3f0] sm:$0xff] }
  0x76   :  { %v3795_v19 = vcombine.high %v184_v12, %v188_v14  ;;  %v140_v61 = vld [vmem:[#allocation6 + $0x38] sm:$0xff] }
  0x77   :  { %v256_v4 = vld [vmem:[#allocation6 + $0x3d8] sm:$0xff] }
  0x78   :  { %927 = vmatpush2.bf16.msra.mxu0 %v3852_v20  ;;  %968 = vmatpush2.bf16.msra.mxu1 %v3854_v21  ;;  %v179_v20 = vld [vmem:[#allocation6 + $0x170] sm:$0xff]  ;;  %v176_v21 = vld [vmem:[#allocation6 + $0x158] sm:$0xff] }
  0x79   :  { %928 = vmatprep.subr.bf16.mxu0 %v3845_v22  ;;  %969 = vmatprep.subr.bf16.mxu1 %v3847_v23  ;;  %v180_v22 = vld [vmem:[#allocation6 + $0x178] sm:$0xff]  ;;  %v3794_v23 = vcombine.low %v184_v12, %v188_v14  ;;  %v3785_v24 = vcombine.high %v175_v18, %v179_v20 }
  0x7a   :  { %v3787_v26 = vcombine.high %v176_v21, %v180_v22  ;;  %v3786_v33 = vcombine.low %v176_v21, %v180_v22  ;;  %v260_v5 = vld [vmem:[#allocation6 + $0x3f8] sm:$0xff] }
  0x7b   :  { %v248_v12 = vld [vmem:[#allocation6 + $0x398] sm:$0xff] }
  0x7c   :  { %929 = vmatpush2.bf16.msra.mxu0 %v3844_v28  ;;  %970 = vmatpush2.bf16.msra.mxu1 %v3846_v29  ;;  %v168_v28 = vld [vmem:[#allocation6 + $0x118] sm:$0xff] }
  0x7d   :  { %930 = vmatprep.subr.bf16.mxu0 %v3837_v30  ;;  %971 = vmatprep.subr.bf16.mxu1 %v3839_v31  ;;  %v172_v29 = vld [vmem:[#allocation6 + $0x138] sm:$0xff]  ;;  %v3784_v30 = vcombine.low %v175_v18, %v179_v20  ;;  %v159_v31 = vld [vmem:[#allocation6 + $0xd0] sm:$0xff] }
  0x7e   :  { %v3778_v41 = vcombine.low %v168_v28, %v172_v29  ;;  %v252_v14 = vld [vmem:[#allocation6 + $0x3b8] sm:$0xff]  ;;  %v243_v18 = vld [vmem:[#allocation6 + $0x370] sm:$0xff] }
  0x7f   :  { %v240_v21 = vld [vmem:[#allocation6 + $0x358] sm:$0xff] }
  0x80   :  { %931 = vmatpush2.bf16.msra.mxu0 %v3836_v36  ;;  %972 = vmatpush2.bf16.msra.mxu1 %v3838_v37  ;;  %v164_v36 = vld [vmem:[#allocation6 + $0xf8] sm:$0xff]  ;;  %v3779_v37 = vcombine.high %v168_v28, %v172_v29 }
  0x81   :  { %932 = vmatprep.subr.bf16.mxu0 %v3829_v38  ;;  %973 = vmatprep.subr.bf16.mxu1 %v3831_v40  ;;  %v3776_v38 = vcombine.low %v167_v25, %v171_v27  ;;  %v155_v40 = vld [vmem:[#allocation6 + $0xb0] sm:$0xff]  ;;  %v244_v22 = vld [vmem:[#allocation6 + $0x378] sm:$0xff] }
  0x82   :  { %v3761_v49 = vcombine.high %v151_v39, %v155_v40  ;;  %v235_v25 = vld [vmem:[#allocation6 + $0x330] sm:$0xff]  ;;  %v232_v28 = vld [vmem:[#allocation6 + $0x318] sm:$0xff] }
  0x83   :  { %v236_v29 = vld [vmem:[#allocation6 + $0x338] sm:$0xff] }
  0x84   :  { %933 = vmatpush2.bf16.msra.mxu0 %v3828_v44  ;;  %974 = vmatpush2.bf16.msra.mxu1 %v3830_v45  ;;  %v3771_v44 = vcombine.high %v160_v35, %v164_v36  ;;  %v3768_v45 = vcombine.low %v159_v31, %v163_v32 }
  0x85   :  { %934 = vmatprep.subr.bf16.mxu0 %v3821_v46  ;;  %975 = vmatprep.subr.bf16.mxu1 %v3823_v48  ;;  %v143_v46 = vld [vmem:[#allocation6 + $0x50] sm:$0xff]  ;;  %v3770_v48 = vcombine.low %v160_v35, %v164_v36  ;;  %v224_v36 = vld [vmem:[#allocation6 + $0x2d8] sm:$0xff] }
  0x86   :  { %v3753_v59 = vcombine.high %v143_v46, %v147_v47 }
  0x88   :  { %935 = vmatpush2.bf16.msra.mxu0 %v3820_v52  ;;  %976 = vmatpush2.bf16.msra.mxu1 %v3822_v54  ;;  %v3763_v52 = vcombine.high %v152_v42, %v156_v43  ;;  %v3760_v54 = vcombine.low %v151_v39, %v155_v40  ;;  %v215_v40 = vld [vmem:[#allocation6 + $0x290] sm:$0xff] }
  0x89   :  { %936 = vmatprep.subr.bf16.mxu0 %v3813_v55  ;;  %977 = vmatprep.subr.bf16.mxu1 %v3815_v58  ;;  %v135_v55 = vld [vmem:[#allocation6 + $0x10] sm:$0xff]  ;;  %v3762_v58 = vcombine.low %v152_v42, %v156_v43  ;;  %v216_v43 = vld [vmem:[#allocation6 + $0x298] sm:$0xff] }
  0x8a   :  { %v3745_v3 = vcombine.high %v135_v55, %v139_v56 }
  0x8c   :  { %937 = vmatpush2.bf16.msra.mxu0 %v3812_v62  ;;  %978 = vmatpush2.bf16.msra.mxu1 %v3814_v63  ;;  %v3755_v62 = vcombine.high %v144_v50, %v148_v51  ;;  %v3752_v63 = vcombine.low %v143_v46, %v147_v47  ;;  %v207_v47 = vld [vmem:[#allocation6 + $0x250] sm:$0xff] }
  0x8d   :  { %938 = vmatprep.subr.bf16.mxu0 %v3805_v0  ;;  %979 = vmatprep.subr.bf16.mxu1 %v3807_v2  ;;  %v255_v0 = vld [vmem:[#allocation6 + $0x3d0] sm:$0xff]  ;;  %v3754_v2 = vcombine.low %v144_v50, %v148_v51  ;;  %v208_v51 = vld [vmem:[#allocation6 + $0x258] sm:$0xff] }
  0x8e   :  { %v3865_v11 = vcombine.high %v255_v0, %v259_v1 }
  0x90   :  { %939 = vmatpush2.bf16.msra.mxu0 %v3804_v6  ;;  %980 = vmatpush2.bf16.msra.mxu1 %v3806_v7  ;;  %v3747_v6 = vcombine.high %v136_v60, %v140_v61  ;;  %v3744_v7 = vcombine.low %v135_v55, %v139_v56  ;;  %v199_v56 = vld [vmem:[#allocation6 + $0x210] sm:$0xff] }
  0x91   :  { %990 = vmatprep.subr.bf16.mxu0 %v3801_v8  ;;  %1031 = vmatprep.subr.bf16.mxu1 %v3803_v10  ;;  %v247_v8 = vld [vmem:[#allocation6 + $0x390] sm:$0xff]  ;;  %v3746_v10 = vcombine.low %v136_v60, %v140_v61  ;;  %v200_v61 = vld [vmem:[#allocation6 + $0x218] sm:$0xff] }
  0x92   :  { %v3857_v20 = vcombine.high %v247_v8, %v251_v9 }
  0x93   :  { %941 = vmatmul.mubr.bf16.vlgmr.msra.gmra.mxu0 %v5013_v13  ;;  %982 = vmatmul.mubr.bf16.vlgmr.msra.gmra.mxu1 %v5013_v13 }
  0x94   :  { %991 = vmatpush1.bf16.msra.mxu0 %v3800_v15  ;;  %1032 = vmatpush1.bf16.msra.mxu1 %v3802_v16  ;;  %v3867_v15 = vcombine.high %v256_v4, %v260_v5  ;;  %v3864_v16 = vcombine.low %v255_v0, %v259_v1 }
  0x95   :  { %992 = vmatprep.subr.bf16.mxu0 %v3793_v17  ;;  %1033 = vmatprep.subr.bf16.mxu1 %v3795_v19  ;;  %v239_v17 = vld [vmem:[#allocation6 + $0x350] sm:$0xff]  ;;  %v3866_v19 = vcombine.low %v256_v4, %v260_v5  ;;  %v4246_v4 = vld [vmem:[#allocation9 + $0xe4] ss:$16 sps:$4 sm:$0xff]  }
  0x96   :  { %1022 = vmatprep.mubr.bf16.mxu0 %v5007_v57  ;;  %1063 = vmatprep.mubr.bf16.mxu1 %v5007_v57  ;;  %v3769_v57 = vcombine.high %v159_v31, %v163_v32  ;;  %v3849_v27 = vcombine.high %v239_v17, %v243_v18  ;;  %v3848_v31 = vcombine.low %v239_v17, %v243_v18  ;;  %v223_v32 = vld [vmem:[#allocation6 + $0x2d0] sm:$0xff]  ;;  %v4256_v17 = vld [vmem:[#allocation9 + $0xa0] ss:$16 sps:$4 sm:$0xff]  }
  0x97   :  { %v4259_v18 = vld [vmem:[#allocation9 + $0x2a0] ss:$16 sps:$4 sm:$0xff]  }
  0x98   :  { %993 = vmatpush1.bf16.msra.mxu0 %v3792_v53  ;;  %1034 = vmatpush1.bf16.msra.mxu1 %v3794_v23  ;;  %v3859_v53 = vcombine.high %v248_v12, %v252_v14  ;;  %v3856_v23 = vcombine.low %v247_v8, %v251_v9  ;;  %v4244_v8 = vld [vmem:[#allocation9 + $0xe0] ss:$16 sps:$4 sm:$0xff]  }
  0x99   :  { %994 = vmatprep.subr.bf16.mxu0 %v3785_v24  ;;  %1035 = vmatprep.subr.bf16.mxu1 %v3787_v26  ;;  %v231_v24 = vld [vmem:[#allocation6 + $0x310] sm:$0xff]  ;;  %v3858_v26 = vcombine.low %v248_v12, %v252_v14  ;;  %v4247_v9 = vld [vmem:[#allocation9 + $0x2e0] ss:$16 sps:$4 sm:$0xff]  }
  0x9a   :  { %v3841_v35 = vcombine.high %v231_v24, %v235_v25  ;;  %v3840_v39 = vcombine.low %v231_v24, %v235_v25  ;;  %v4250_v12 = vld [vmem:[#allocation9 + $0xc0] ss:$16 sps:$4 sm:$0xff]   ;;  %v4276_v25 = vld [vmem:[#allocation9 + $0x44] ss:$16 sps:$4 sm:$0xff]  }
  0x9b   :  { %v4253_v14 = vld [vmem:[#allocation9 + $0x2c0] ss:$16 sps:$4 sm:$0xff]  }
  0x9c   :  { %995 = vmatpush1.bf16.msra.mxu0 %v3784_v30  ;;  %1036 = vmatpush1.bf16.msra.mxu1 %v3786_v33  ;;  %v3851_v30 = vcombine.high %v240_v21, %v244_v22  ;;  %v227_v33 = vld [vmem:[#allocation6 + $0x2f0] sm:$0xff]  ;;  %v4271_v24 = vld [vmem:[#allocation9 + $0x260] ss:$16 sps:$4 sm:$0xff]  }
  0x9d   :  { %996 = vmatprep.subr.bf16.mxu0 %v3777_v34  ;;  %1037 = vmatprep.subr.bf16.mxu1 %v3779_v37  ;;  %v3850_v34 = vcombine.low %v240_v21, %v244_v22  ;;  %v228_v37 = vld [vmem:[#allocation6 + $0x2f8] sm:$0xff]  ;;  %v3833_v42 = vcombine.high %v223_v32, %v227_v33  ;;  %v3832_v46 = vcombine.low %v223_v32, %v227_v33 }
  0x9e   :  { %v4262_v21 = vld [vmem:[#allocation9 + $0x80] ss:$16 sps:$4 sm:$0xff]   ;;  %v4288_v33 = vld [vmem:[#allocation9 + $0x4] ss:$16 sps:$4 sm:$0xff]  }
  0x9f   :  { %v4265_v22 = vld [vmem:[#allocation9 + $0x280] ss:$16 sps:$4 sm:$0xff]  }
  0xa0   :  { %997 = vmatpush1.bf16.msra.mxu0 %v3776_v38  ;;  %1038 = vmatpush1.bf16.msra.mxu1 %v3778_v41  ;;  %v3843_v38 = vcombine.high %v232_v28, %v236_v29  ;;  %v219_v41 = vld [vmem:[#allocation6 + $0x2b0] sm:$0xff]  ;;  %v4283_v32 = vld [vmem:[#allocation9 + $0x220] ss:$16 sps:$4 sm:$0xff]  }
  0xa1   :  { %998 = vmatprep.subr.bf16.mxu0 %v3769_v57  ;;  %1039 = vmatprep.subr.bf16.mxu1 %v3771_v44  ;;  %v3842_v57 = vcombine.low %v232_v28, %v236_v29  ;;  %v220_v44 = vld [vmem:[#allocation6 + $0x2b8] sm:$0xff]  ;;  %v3825_v50 = vcombine.high %v215_v40, %v219_v41  ;;  %v3824_v55 = vcombine.low %v215_v40, %v219_v41 }
  0xa2   :  { %v4277_v28 = vld [vmem:[#allocation9 + $0x240] ss:$16 sps:$4 sm:$0xff]   ;;  %v4282_v29 = vld [vmem:[#allocation9 + $0x24] ss:$16 sps:$4 sm:$0xff]  }
  0xa3   :  { %v4295_v40 = vld [vmem:[#allocation9 + $0x3e0] ss:$16 sps:$4 sm:$0xff]   ;;  %v4300_v41 = vld [vmem:[#allocation9 + $0x1c4] ss:$16 sps:$4 sm:$0xff]  }
  0xa4   :  { %999 = vmatpush1.bf16.msra.mxu0 %v3768_v45  ;;  %1040 = vmatpush1.bf16.msra.mxu1 %v3770_v48  ;;  %v3835_v45 = vcombine.high %v224_v36, %v228_v37  ;;  %v211_v48 = vld [vmem:[#allocation6 + $0x270] sm:$0xff] }
  0xa5   :  { %1000 = vmatprep.subr.bf16.mxu0 %v3761_v49  ;;  %1041 = vmatprep.subr.bf16.mxu1 %v3763_v52  ;;  %v3834_v49 = vcombine.low %v224_v36, %v228_v37  ;;  %v212_v52 = vld [vmem:[#allocation6 + $0x278] sm:$0xff]  ;;  %v3817_v60 = vcombine.high %v207_v47, %v211_v48  ;;  %v3816_v0 = vcombine.low %v207_v47, %v211_v48 }
  0xa6   :  { %v3818_v1 = vcombine.low %v208_v51, %v212_v52  ;;  %v4289_v36 = vld [vmem:[#allocation9 + $0x200] ss:$16 sps:$4 sm:$0xff]   ;;  %v4294_v37 = vld [vmem:[#allocation9 + $0x1e4] ss:$16 sps:$4 sm:$0xff]  }
  0xa7   :  { %v4307_v47 = vld [vmem:[#allocation9 + $0x3a0] ss:$16 sps:$4 sm:$0xff]   ;;  %v4312_v48 = vld [vmem:[#allocation9 + $0x184] ss:$16 sps:$4 sm:$0xff]  }
  0xa8   :  { %1001 = vmatpush1.bf16.msra.mxu0 %v3760_v54  ;;  %1042 = vmatpush1.bf16.msra.mxu1 %v3762_v58  ;;  %v3827_v54 = vcombine.high %v216_v43, %v220_v44  ;;  %v203_v58 = vld [vmem:[#allocation6 + $0x230] sm:$0xff] }
  0xa9   :  { %1002 = vmatprep.subr.bf16.mxu0 %v3753_v59  ;;  %1043 = vmatprep.subr.bf16.mxu1 %v3755_v62  ;;  %v3826_v59 = vcombine.low %v216_v43, %v220_v44  ;;  %v204_v62 = vld [vmem:[#allocation6 + $0x238] sm:$0xff]  ;;  %v3808_v5 = vcombine.low %v199_v56, %v203_v58 }
  0xaa   :  { %v4301_v43 = vld [vmem:[#allocation9 + $0x3c0] ss:$16 sps:$4 sm:$0xff]   ;;  %v4306_v44 = vld [vmem:[#allocation9 + $0x1a4] ss:$16 sps:$4 sm:$0xff]  }
  0xac   :  { %1003 = vmatpush1.bf16.msra.mxu0 %v3752_v63  ;;  %1044 = vmatpush1.bf16.msra.mxu1 %v3754_v2  ;;  %v3819_v63 = vcombine.high %v208_v51, %v212_v52  ;;  %v3809_v2 = vcombine.high %v199_v56, %v203_v58  ;;  %v4313_v51 = vld [vmem:[#allocation9 + $0x380] ss:$16 sps:$4 sm:$0xff]   ;;  %v4318_v52 = vld [vmem:[#allocation9 + $0x164] ss:$16 sps:$4 sm:$0xff]  }
  0xad   :  { %1004 = vmatprep.subr.bf16.mxu0 %v3745_v3  ;;  %1045 = vmatprep.subr.bf16.mxu1 %v3747_v6  ;;  %v3811_v3 = vcombine.high %v200_v61, %v204_v62  ;;  %v4249_v6 = vld [vmem:[#allocation9 + $0x2e4] ss:$16 sps:$4 sm:$0xff]   ;;  %v4319_v56 = vld [vmem:[#allocation9 + $0x360] ss:$16 sps:$4 sm:$0xff]  }
  0xae   :  { %v4324_v58 = vld [vmem:[#allocation9 + $0x144] ss:$16 sps:$4 sm:$0xff]  }
  0xb0   :  { %1005 = vmatpush1.bf16.msra.mxu0 %v3744_v7  ;;  %1046 = vmatpush1.bf16.msra.mxu1 %v3746_v10  ;;  %v3810_v7 = vcombine.low %v200_v61, %v204_v62  ;;  %v4252_v10 = vld [vmem:[#allocation9 + $0xc4] ss:$16 sps:$4 sm:$0xff]   ;;  %v4325_v61 = vld [vmem:[#allocation9 + $0x340] ss:$16 sps:$4 sm:$0xff]  }
  0xb1   :  { %1006 = vmatprep.subr.bf16.mxu0 %v3865_v11  ;;  %1047 = vmatprep.subr.bf16.mxu1 %v3867_v15  ;;  %v4255_v11 = vld [vmem:[#allocation9 + $0x2c4] ss:$16 sps:$4 sm:$0xff]  }
  0xb2   :  { %v4258_v15 = vld [vmem:[#allocation9 + $0xa4] ss:$16 sps:$4 sm:$0xff]  }
  0xb3   :  { %v4330_v62 = vld [vmem:[#allocation9 + $0x124] ss:$16 sps:$4 sm:$0xff]  }
  0xb4   :  { %1007 = vmatpush2.bf16.msra.mxu0 %v3864_v16  ;;  %1048 = vmatpush2.bf16.msra.mxu1 %v3866_v19  ;;  %v4261_v16 = vld [vmem:[#allocation9 + $0x2a4] ss:$16 sps:$4 sm:$0xff]  }
  0xb5   :  { %1008 = vmatprep.subr.bf16.mxu0 %v3857_v20  ;;  %1049 = vmatprep.subr.bf16.mxu1 %v3859_v53  ;;  %v4264_v19 = vld [vmem:[#allocation9 + $0x84] ss:$16 sps:$4 sm:$0xff]  }
  0xb6   :  { %v4267_v20 = vld [vmem:[#allocation9 + $0x284] ss:$16 sps:$4 sm:$0xff]  }
  0xb7   :  { %v4270_v53 = vld [vmem:[#allocation9 + $0x64] ss:$16 sps:$4 sm:$0xff]  }
  0xb8   :  { %1009 = vmatpush2.bf16.msra.mxu0 %v3856_v23  ;;  %1050 = vmatpush2.bf16.msra.mxu1 %v3858_v26  ;;  %v4273_v23 = vld [vmem:[#allocation9 + $0x264] ss:$16 sps:$4 sm:$0xff]  }
  0xb9   :  { %1010 = vmatprep.subr.bf16.mxu0 %v3849_v27  ;;  %1051 = vmatprep.subr.bf16.mxu1 %v3851_v30  ;;  %v4279_v26 = vld [vmem:[#allocation9 + $0x244] ss:$16 sps:$4 sm:$0xff]   ;;  %v4274_v27 = vld [vmem:[#allocation9 + $0x40] ss:$16 sps:$4 sm:$0xff]  }
  0xba   :  { %v4285_v30 = vld [vmem:[#allocation9 + $0x224] ss:$16 sps:$4 sm:$0xff]  }
  0xbc   :  { %1011 = vmatpush2.bf16.msra.mxu0 %v3848_v31  ;;  %1052 = vmatpush2.bf16.msra.mxu1 %v3850_v34  ;;  %v4280_v31 = vld [vmem:[#allocation9 + $0x20] ss:$16 sps:$4 sm:$0xff]   ;;  %v4291_v34 = vld [vmem:[#allocation9 + $0x204] ss:$16 sps:$4 sm:$0xff]  }
  0xbd   :  { %1012 = vmatprep.subr.bf16.mxu0 %v3841_v35  ;;  %1053 = vmatprep.subr.bf16.mxu1 %v3843_v38  ;;  %v4286_v35 = vld [vmem:[#allocation9] ss:$16 sps:$4 sm:$0xff]   ;;  %v4297_v38 = vld [vmem:[#allocation9 + $0x3e4] ss:$16 sps:$4 sm:$0xff]  }
  0xc0   :  { %1013 = vmatpush2.bf16.msra.mxu0 %v3840_v39  ;;  %1054 = vmatpush2.bf16.msra.mxu1 %v3842_v57  ;;  %v4292_v39 = vld [vmem:[#allocation9 + $0x1e0] ss:$16 sps:$4 sm:$0xff]   ;;  %v4303_v57 = vld [vmem:[#allocation9 + $0x3c4] ss:$16 sps:$4 sm:$0xff]  }
  0xc1   :  { %1014 = vmatprep.subr.bf16.mxu0 %v3833_v42  ;;  %1055 = vmatprep.subr.bf16.mxu1 %v3835_v45  ;;  %v4298_v42 = vld [vmem:[#allocation9 + $0x1c0] ss:$16 sps:$4 sm:$0xff]   ;;  %v4309_v45 = vld [vmem:[#allocation9 + $0x3a4] ss:$16 sps:$4 sm:$0xff]  }
  0xc4   :  { %1015 = vmatpush2.bf16.msra.mxu0 %v3832_v46  ;;  %1056 = vmatpush2.bf16.msra.mxu1 %v3834_v49  ;;  %v4304_v46 = vld [vmem:[#allocation9 + $0x1a0] ss:$16 sps:$4 sm:$0xff]   ;;  %v4315_v49 = vld [vmem:[#allocation9 + $0x384] ss:$16 sps:$4 sm:$0xff]  }
  0xc5   :  { %1016 = vmatprep.subr.bf16.mxu0 %v3825_v50  ;;  %1057 = vmatprep.subr.bf16.mxu1 %v3827_v54  ;;  %v4310_v50 = vld [vmem:[#allocation9 + $0x180] ss:$16 sps:$4 sm:$0xff]   ;;  %v4321_v54 = vld [vmem:[#allocation9 + $0x364] ss:$16 sps:$4 sm:$0xff]  }
  0xc8   :  { %1017 = vmatpush2.bf16.msra.mxu0 %v3824_v55  ;;  %1058 = vmatpush2.bf16.msra.mxu1 %v3826_v59  ;;  %v4316_v55 = vld [vmem:[#allocation9 + $0x160] ss:$16 sps:$4 sm:$0xff]   ;;  %v4327_v59 = vld [vmem:[#allocation9 + $0x344] ss:$16 sps:$4 sm:$0xff]  }
  0xc9   :  { %1018 = vmatprep.subr.bf16.mxu0 %v3817_v60  ;;  %1059 = vmatprep.subr.bf16.mxu1 %v3819_v63  ;;  %v4322_v60 = vld [vmem:[#allocation9 + $0x140] ss:$16 sps:$4 sm:$0xff]   ;;  %v4333_v63 = vld [vmem:[#allocation9 + $0x324] ss:$16 sps:$4 sm:$0xff]  }
  0xcc   :  { %1019 = vmatpush2.bf16.msra.mxu0 %v3816_v0  ;;  %1060 = vmatpush2.bf16.msra.mxu1 %v3818_v1  ;;  %v4328_v0 = vld [vmem:[#allocation9 + $0x120] ss:$16 sps:$4 sm:$0xff]  }
  0xcd   :  { %1020 = vmatprep.subr.bf16.mxu0 %v3809_v2  ;;  %1061 = vmatprep.subr.bf16.mxu1 %v3811_v3  ;;  %v4331_v1 = vld [vmem:[#allocation9 + $0x320] ss:$16 sps:$4 sm:$0xff]   ;;  %v4336_v2 = vld [vmem:[#allocation9 + $0x104] ss:$16 sps:$4 sm:$0xff]  }
  0xce   :  { %v4339_v3 = vld [vmem:[#allocation9 + $0x304] ss:$16 sps:$4 sm:$0xff]  }
  0xd0   :  { %1021 = vmatpush2.bf16.msra.mxu0 %v3808_v5  ;;  %1062 = vmatpush2.bf16.msra.mxu1 %v3810_v7  ;;  %v4337_v5 = vld [vmem:[#allocation9 + $0x300] ss:$16 sps:$4 sm:$0xff]   ;;  %v4345_v7 = vld [vmem:[#allocation9 + $0x6e4] ss:$16 sps:$4 sm:$0xff]  }
  0xd1   :  { %2723 = vmatprep.subr.bf16.mxu0 %v4246_v4  ;;  %2764 = vmatprep.subr.bf16.mxu1 %v4249_v6  ;;  %v4334_v4 = vld [vmem:[#allocation9 + $0x100] ss:$16 sps:$4 sm:$0xff]   ;;  %v4342_v6 = vld [vmem:[#allocation9 + $0x4e4] ss:$16 sps:$4 sm:$0xff]  }
  0xd3   :  { %1023 = vmatmul.mubr.bf16.vlgmr.msra.gmra.mxu0 %v5013_v13  ;;  %1064 = vmatmul.mubr.bf16.vlgmr.msra.gmra.mxu1 %v5013_v13  ;;  %v4268_v13 = vld [vmem:[#allocation9 + $0x60] ss:$16 sps:$4 sm:$0xff]  }
  0xd4   :  { %2724 = vmatpush1.bf16.msra.mxu0 %v4244_v8  ;;  %2765 = vmatpush1.bf16.msra.mxu1 %v4247_v9  ;;  %v1101_v8 = vlaneseq }
  0xd5   :  { %2725 = vmatprep.subr.bf16.mxu0 %v4252_v10  ;;  %2766 = vmatprep.subr.bf16.mxu1 %v4255_v11  ;;  %v5026_v11 = vld [vmem:[#allocation8] sm:$0xff] }
  0xd6   :  { %v5021_v9 = vshrl.u32 %v1101_v8, 7  ;;  %v4391_v8 = vld [vmem:[#allocation9 + $0x7e0] ss:$16 sps:$4 sm:$0xff]  }
  0xd8   :  { %2726 = vmatpush1.bf16.msra.mxu0 %v4250_v12  ;;  %2767 = vmatpush1.bf16.msra.mxu1 %v4253_v14  ;;  %v5024_v10 = vsub.s32 0, %v5021_v9  ;;  %v1111_v12 = vsub.s32 2, %v5021_v9  ;;  %v5030_v14 = vsub.s32 1, %v5021_v9 }
  0xd9   :  { %2727 = vmatprep.subr.bf16.mxu0 %v4258_v15  ;;  %2768 = vmatprep.subr.bf16.mxu1 %v4261_v16  ;;  %v1115_v15 = vsub.s32 3, %v5021_v9 }
  0xda   :  { %v1104_v16 = vrot.slane %v5026_v11, %v5024_v10 }
  0xdc   :  { %2728 = vmatpush1.bf16.msra.mxu0 %v4256_v17  ;;  %2769 = vmatpush1.bf16.msra.mxu1 %v4259_v18  ;;  %v1112_v17 = vrot.slane %v5026_v11, %v1111_v12  ;;  %v1108_v18 = vrot.slane %v5026_v11, %v5030_v14 }
  0xdd   :  { %2729 = vmatprep.subr.bf16.mxu0 %v4264_v19  ;;  %2770 = vmatprep.subr.bf16.mxu1 %v4267_v20  ;;  %v1116_v20 = vrot.slane %v5026_v11, %v1115_v15 }
  0xe0   :  { %2730 = vmatpush1.bf16.msra.mxu0 %v4262_v21  ;;  %2771 = vmatpush1.bf16.msra.mxu1 %v4265_v22 }
  0xe1   :  { %2731 = vmatprep.subr.bf16.mxu0 %v4270_v53  ;;  %2772 = vmatprep.subr.bf16.mxu1 %v4273_v23 }
  0xe4   :  { %2732 = vmatpush1.bf16.msra.mxu0 %v4268_v13  ;;  %2773 = vmatpush1.bf16.msra.mxu1 %v4271_v24 }
  0xe5   :  { %2733 = vmatprep.subr.bf16.mxu0 %v4276_v25  ;;  %2774 = vmatprep.subr.bf16.mxu1 %v4279_v26 }
  0xe8   :  { %2734 = vmatpush1.bf16.msra.mxu0 %v4274_v27  ;;  %2775 = vmatpush1.bf16.msra.mxu1 %v4277_v28 }
  0xe9   :  { %2735 = vmatprep.subr.bf16.mxu0 %v4282_v29  ;;  %2776 = vmatprep.subr.bf16.mxu1 %v4285_v30 }
  0xec   :  { %2736 = vmatpush1.bf16.msra.mxu0 %v4280_v31  ;;  %2777 = vmatpush1.bf16.msra.mxu1 %v4283_v32 }
  0xed   :  { %2737 = vmatprep.subr.bf16.mxu0 %v4288_v33  ;;  %2778 = vmatprep.subr.bf16.mxu1 %v4291_v34 }
  0xf0   :  { %2738 = vmatpush1.bf16.msra.mxu0 %v4286_v35  ;;  %2779 = vmatpush1.bf16.msra.mxu1 %v4289_v36  ;;  %v4340_v36 = vld [vmem:[#allocation9 + $0x4e0] ss:$16 sps:$4 sm:$0xff]  }
  0xf1   :  { %2739 = vmatprep.subr.bf16.mxu0 %v4294_v37  ;;  %2780 = vmatprep.subr.bf16.mxu1 %v4297_v38 }
  0xf4   :  { %2740 = vmatpush2.bf16.msra.mxu0 %v4292_v39  ;;  %2781 = vmatpush2.bf16.msra.mxu1 %v4295_v40  ;;  %v4343_v39 = vld [vmem:[#allocation9 + $0x6e0] ss:$16 sps:$4 sm:$0xff]   ;;  %v4348_v40 = vld [vmem:[#allocation9 + $0x4c4] ss:$16 sps:$4 sm:$0xff]  }
  0xf5   :  { %2741 = vmatprep.subr.bf16.mxu0 %v4300_v41  ;;  %2782 = vmatprep.subr.bf16.mxu1 %v4303_v57  ;;  %v4351_v41 = vld [vmem:[#allocation9 + $0x6c4] ss:$16 sps:$4 sm:$0xff]   ;;  %v4346_v57 = vld [vmem:[#allocation9 + $0x4c0] ss:$16 sps:$4 sm:$0xff]  }
  0xf8   :  { %2742 = vmatpush2.bf16.msra.mxu0 %v4298_v42  ;;  %2783 = vmatpush2.bf16.msra.mxu1 %v4301_v43  ;;  %v4349_v42 = vld [vmem:[#allocation9 + $0x6c0] ss:$16 sps:$4 sm:$0xff]   ;;  %v4354_v43 = vld [vmem:[#allocation9 + $0x4a4] ss:$16 sps:$4 sm:$0xff]  }
  0xf9   :  { %2743 = vmatprep.subr.bf16.mxu0 %v4306_v44  ;;  %2784 = vmatprep.subr.bf16.mxu1 %v4309_v45  ;;  %v4357_v44 = vld [vmem:[#allocation9 + $0x6a4] ss:$16 sps:$4 sm:$0xff]   ;;  %v4352_v45 = vld [vmem:[#allocation9 + $0x4a0] ss:$16 sps:$4 sm:$0xff]  }
  0xfc   :  { %2744 = vmatpush2.bf16.msra.mxu0 %v4304_v46  ;;  %2785 = vmatpush2.bf16.msra.mxu1 %v4307_v47  ;;  %v4355_v46 = vld [vmem:[#allocation9 + $0x6a0] ss:$16 sps:$4 sm:$0xff]   ;;  %v4360_v47 = vld [vmem:[#allocation9 + $0x484] ss:$16 sps:$4 sm:$0xff]  }
  0xfd   :  { %2745 = vmatprep.subr.bf16.mxu0 %v4312_v48  ;;  %2786 = vmatprep.subr.bf16.mxu1 %v4315_v49  ;;  %v4363_v48 = vld [vmem:[#allocation9 + $0x684] ss:$16 sps:$4 sm:$0xff]   ;;  %v4358_v49 = vld [vmem:[#allocation9 + $0x480] ss:$16 sps:$4 sm:$0xff]  }
 0x100   :  { %2746 = vmatpush2.bf16.msra.mxu0 %v4310_v50  ;;  %2787 = vmatpush2.bf16.msra.mxu1 %v4313_v51  ;;  %v4361_v50 = vld [vmem:[#allocation9 + $0x680] ss:$16 sps:$4 sm:$0xff]   ;;  %v4366_v51 = vld [vmem:[#allocation9 + $0x464] ss:$16 sps:$4 sm:$0xff]  }
 0x101   :  { %2747 = vmatprep.subr.bf16.mxu0 %v4318_v52  ;;  %2788 = vmatprep.subr.bf16.mxu1 %v4321_v54  ;;  %v4369_v52 = vld [vmem:[#allocation9 + $0x664] ss:$16 sps:$4 sm:$0xff]   ;;  %v4364_v54 = vld [vmem:[#allocation9 + $0x460] ss:$16 sps:$4 sm:$0xff]  }
 0x104   :  { %2748 = vmatpush2.bf16.msra.mxu0 %v4316_v55  ;;  %2789 = vmatpush2.bf16.msra.mxu1 %v4319_v56  ;;  %v4367_v55 = vld [vmem:[#allocation9 + $0x660] ss:$16 sps:$4 sm:$0xff]   ;;  %v4372_v56 = vld [vmem:[#allocation9 + $0x444] ss:$16 sps:$4 sm:$0xff]  }
 0x105   :  { %2749 = vmatprep.subr.bf16.mxu0 %v4324_v58  ;;  %2790 = vmatprep.subr.bf16.mxu1 %v4327_v59  ;;  %v4375_v58 = vld [vmem:[#allocation9 + $0x644] ss:$16 sps:$4 sm:$0xff]   ;;  %v4370_v59 = vld [vmem:[#allocation9 + $0x440] ss:$16 sps:$4 sm:$0xff]  }
 0x108   :  { %2750 = vmatpush2.bf16.msra.mxu0 %v4322_v60  ;;  %2791 = vmatpush2.bf16.msra.mxu1 %v4325_v61  ;;  %v4373_v60 = vld [vmem:[#allocation9 + $0x640] ss:$16 sps:$4 sm:$0xff]   ;;  %v4378_v61 = vld [vmem:[#allocation9 + $0x424] ss:$16 sps:$4 sm:$0xff]  }
 0x109   :  { %2751 = vmatprep.subr.bf16.mxu0 %v4330_v62  ;;  %2792 = vmatprep.subr.bf16.mxu1 %v4333_v63  ;;  %v4381_v62 = vld [vmem:[#allocation9 + $0x624] ss:$16 sps:$4 sm:$0xff]   ;;  %v4376_v63 = vld [vmem:[#allocation9 + $0x420] ss:$16 sps:$4 sm:$0xff]  }
 0x10c   :  { %2752 = vmatpush2.bf16.msra.mxu0 %v4328_v0  ;;  %2793 = vmatpush2.bf16.msra.mxu1 %v4331_v1  ;;  %v4379_v0 = vld [vmem:[#allocation9 + $0x620] ss:$16 sps:$4 sm:$0xff]   ;;  %v4384_v1 = vld [vmem:[#allocation9 + $0x404] ss:$16 sps:$4 sm:$0xff]  }
 0x10d   :  { %2753 = vmatprep.subr.bf16.mxu0 %v4336_v2  ;;  %2794 = vmatprep.subr.bf16.mxu1 %v4339_v3  ;;  %v4387_v2 = vld [vmem:[#allocation9 + $0x604] ss:$16 sps:$4 sm:$0xff]   ;;  %v4382_v3 = vld [vmem:[#allocation9 + $0x400] ss:$16 sps:$4 sm:$0xff]  }
 0x110   :  { %2754 = vmatpush2.bf16.msra.mxu0 %v4334_v4  ;;  %2795 = vmatpush2.bf16.msra.mxu1 %v4337_v5  ;;  %v4385_v4 = vld [vmem:[#allocation9 + $0x600] ss:$16 sps:$4 sm:$0xff]   ;;  %v4390_v5 = vld [vmem:[#allocation9 + $0x5e4] ss:$16 sps:$4 sm:$0xff]  }
 0x111   :  { %2805 = vmatprep.subr.bf16.mxu0 %v4342_v6  ;;  %2846 = vmatprep.subr.bf16.mxu1 %v4345_v7  ;;  %v4393_v6 = vld [vmem:[#allocation9 + $0x7e4] ss:$16 sps:$4 sm:$0xff]   ;;  %v4388_v7 = vld [vmem:[#allocation9 + $0x5e0] ss:$16 sps:$4 sm:$0xff]  }
 0x153   :  { %v942_v19 = vpop.f32.mrf.mxu0  ;;  %v983_v22 = vpop.f32.mrf.mxu1 }
 0x154   :  { %v1141_v21 = vadd.f32 %v1104_v16, %v942_v19  ;;  %v1143_v53 = vadd.f32 %v1112_v17, %v983_v22  ;;  %v4396_v16 = vld [vmem:[#allocation9 + $0x5c4] ss:$16 sps:$4 sm:$0xff]   ;;  %v4397_v19 = vld [vmem:[#allocation9 + $0x7c0] ss:$16 sps:$4 sm:$0xff]   ;;  %v1119_v22 = vsub.s32 4, %v5021_v9 }
 0x155   :  { %v944_v23 = vpop.f32.mrf.mxu0  ;;  %v985_v24 = vpop.f32.mrf.mxu1  ;;  %v4399_v17 = vld [vmem:[#allocation9 + $0x7c4] ss:$16 sps:$4 sm:$0xff]  }
 0x156   :  { %4740 = vtanh.f32 %v1141_v21  ;;  %v1142_v13 = vadd.f32 %v1108_v18, %v944_v23  ;;  %v1144_v25 = vadd.f32 %v1116_v20, %v985_v24  ;;  %v4394_v18 = vld [vmem:[#allocation9 + $0x5c0] ss:$16 sps:$4 sm:$0xff]   ;;  %v4402_v20 = vld [vmem:[#allocation9 + $0x5a4] ss:$16 sps:$4 sm:$0xff]  }
 0x157   :  { %4742 = vtanh.f32 %v1143_v53  ;;  %v946_v26 = vpop.f32.mrf.mxu0  ;;  %v987_v27 = vpop.f32.mrf.mxu1  ;;  %v4405_v21 = vld [vmem:[#allocation9 + $0x7a4] ss:$16 sps:$4 sm:$0xff]   ;;  %v1127_v53 = vsub.s32 6, %v5021_v9  ;;  %v4400_v23 = vld [vmem:[#allocation9 + $0x5a0] ss:$16 sps:$4 sm:$0xff]  }
 0x158   :  { %4744 = vtanh.f32 %v1142_v13  ;;  %v1123_v13 = vsub.s32 5, %v5021_v9  ;;  %v4403_v24 = vld [vmem:[#allocation9 + $0x7a0] ss:$16 sps:$4 sm:$0xff]   ;;  %v1131_v26 = vsub.s32 7, %v5021_v9  ;;  %v1120_v27 = vrot.slane %v5026_v11, %v1119_v22  ;;  %v4447_v22 = vld [vmem:[#allocation9 + $0x2cc] ss:$16 sps:$4 sm:$0xff]  }
 0x159   :  { %4746 = vtanh.f32 %v1144_v25  ;;  %v947_v28 = vpop.f32.mrf.mxu0  ;;  %v988_v29 = vpop.f32.mrf.mxu1  ;;  %v4408_v25 = vld [vmem:[#allocation9 + $0x584] ss:$16 sps:$4 sm:$0xff]  }
 0x15a   :  { %v4411_v28 = vld [vmem:[#allocation9 + $0x784] ss:$16 sps:$4 sm:$0xff]   ;;  %v1128_v29 = vrot.slane %v5026_v11, %v1127_v53  ;;  %v4442_v53 = vld [vmem:[#allocation9 + $0xc8] ss:$16 sps:$4 sm:$0xff]  }
 0x163   :  { %v4741_v30 = vpop.eup %4740 }
 0x164   :  { %v4743_v31 = vpop.eup %4742  ;;  %v5047_v37 = vpack.c.bf16 %v4741_v30, %v4741_v30  ;;  %v4406_v30 = vld [vmem:[#allocation9 + $0x580] ss:$16 sps:$4 sm:$0xff]  }
 0x165   :  { %v4745_v32 = vpop.eup %4744  ;;  %v5043_v34 = vpack.c.bf16 %v4743_v31, %v4743_v31  ;;  %v1124_v31 = vrot.slane %v5026_v11, %v1123_v13  ;;  %v4450_v13 = vld [vmem:[#allocation9 + $0xac] ss:$16 sps:$4 sm:$0xff]  }
 0x166   :  { %v4747_v33 = vpop.eup %4746  ;;  %v5045_v35 = vpack.c.bf16 %v4745_v32, %v4745_v32 }
 0x167   :  { %v5049_v38 = vpack.c.bf16 %v4747_v33, %v4747_v33  ;;  %v4409_v33 = vld [vmem:[#allocation9 + $0x780] ss:$16 sps:$4 sm:$0xff]  }
 0x168   :  { %2755 = vmatprep.mubr.bf16.mxu0 %v5045_v35 }
 0x169   :  { %2796 = vmatprep.mubr.bf16.mxu1 %v5049_v38  ;;  %2756 = vmatmul.mubr.bf16.vlgmr.msra.gmra.mxu0 %v5047_v37 }
 0x16a   :  { %2797 = vmatmul.mubr.bf16.vlgmr.msra.gmra.mxu1 %v5043_v34  ;;  %2806 = vmatpush1.bf16.msra.mxu0 %v4340_v36  ;;  %v1132_v36 = vrot.slane %v5026_v11, %v1131_v26  ;;  %v4451_v26 = vld [vmem:[#allocation9 + $0x2a8] ss:$16 sps:$4 sm:$0xff]  }
 0x16b   :  { %2847 = vmatpush1.bf16.msra.mxu1 %v4343_v39  ;;  %2807 = vmatprep.subr.bf16.mxu0 %v4348_v40  ;;  %v4414_v39 = vld [vmem:[#allocation9 + $0x564] ss:$16 sps:$4 sm:$0xff]  }
 0x16c   :  { %2848 = vmatprep.subr.bf16.mxu1 %v4351_v41 }
 0x16e   :  { %2808 = vmatpush1.bf16.msra.mxu0 %v4346_v57  ;;  %v4417_v57 = vld [vmem:[#allocation9 + $0x764] ss:$16 sps:$4 sm:$0xff]  }
 0x16f   :  { %2849 = vmatpush1.bf16.msra.mxu1 %v4349_v42  ;;  %2809 = vmatprep.subr.bf16.mxu0 %v4354_v43 }
 0x170   :  { %2850 = vmatprep.subr.bf16.mxu1 %v4357_v44 }
 0x172   :  { %2810 = vmatpush1.bf16.msra.mxu0 %v4352_v45 }
 0x173   :  { %2851 = vmatpush1.bf16.msra.mxu1 %v4355_v46  ;;  %2811 = vmatprep.subr.bf16.mxu0 %v4360_v47  ;;  %v4412_v46 = vld [vmem:[#allocation9 + $0x560] ss:$16 sps:$4 sm:$0xff]  }
 0x174   :  { %2852 = vmatprep.subr.bf16.mxu1 %v4363_v48 }
 0x176   :  { %2812 = vmatpush1.bf16.msra.mxu0 %v4358_v49  ;;  %v4415_v49 = vld [vmem:[#allocation9 + $0x760] ss:$16 sps:$4 sm:$0xff]  }
 0x177   :  { %2853 = vmatpush1.bf16.msra.mxu1 %v4361_v50  ;;  %2813 = vmatprep.subr.bf16.mxu0 %v4366_v51  ;;  %v4420_v50 = vld [vmem:[#allocation9 + $0x544] ss:$16 sps:$4 sm:$0xff]  }
 0x178   :  { %2854 = vmatprep.subr.bf16.mxu1 %v4369_v52  ;;  %v4423_v51 = vld [vmem:[#allocation9 + $0x744] ss:$16 sps:$4 sm:$0xff]  }
 0x17a   :  { %2814 = vmatpush1.bf16.msra.mxu0 %v4364_v54 }
 0x17b   :  { %2855 = vmatpush1.bf16.msra.mxu1 %v4367_v55  ;;  %2815 = vmatprep.subr.bf16.mxu0 %v4372_v56  ;;  %v4418_v55 = vld [vmem:[#allocation9 + $0x540] ss:$16 sps:$4 sm:$0xff]  }
 0x17c   :  { %2856 = vmatprep.subr.bf16.mxu1 %v4375_v58  ;;  %v4421_v56 = vld [vmem:[#allocation9 + $0x740] ss:$16 sps:$4 sm:$0xff]   ;;  %v4426_v58 = vld [vmem:[#allocation9 + $0x524] ss:$16 sps:$4 sm:$0xff]  }
 0x17e   :  { %2816 = vmatpush1.bf16.msra.mxu0 %v4370_v59  ;;  %v4429_v59 = vld [vmem:[#allocation9 + $0x724] ss:$16 sps:$4 sm:$0xff]  }
 0x17f   :  { %2857 = vmatpush1.bf16.msra.mxu1 %v4373_v60  ;;  %2817 = vmatprep.subr.bf16.mxu0 %v4378_v61  ;;  %v4424_v60 = vld [vmem:[#allocation9 + $0x520] ss:$16 sps:$4 sm:$0xff]  }
 0x180   :  { %2858 = vmatprep.subr.bf16.mxu1 %v4381_v62  ;;  %v4427_v61 = vld [vmem:[#allocation9 + $0x720] ss:$16 sps:$4 sm:$0xff]   ;;  %v4432_v62 = vld [vmem:[#allocation9 + $0x504] ss:$16 sps:$4 sm:$0xff]  }
 0x182   :  { %2818 = vmatpush1.bf16.msra.mxu0 %v4376_v63  ;;  %v4435_v63 = vld [vmem:[#allocation9 + $0x704] ss:$16 sps:$4 sm:$0xff]  }
 0x183   :  { %2859 = vmatpush1.bf16.msra.mxu1 %v4379_v0  ;;  %2819 = vmatprep.subr.bf16.mxu0 %v4384_v1  ;;  %v4430_v0 = vld [vmem:[#allocation9 + $0x500] ss:$16 sps:$4 sm:$0xff]  }
 0x184   :  { %2860 = vmatprep.subr.bf16.mxu1 %v4387_v2  ;;  %v4433_v2 = vld [vmem:[#allocation9 + $0x700] ss:$16 sps:$4 sm:$0xff]  }
 0x186   :  { %2820 = vmatpush1.bf16.msra.mxu0 %v4382_v3  ;;  %v4438_v3 = vld [vmem:[#allocation9 + $0xec] ss:$16 sps:$4 sm:$0xff]  }
 0x187   :  { %2861 = vmatpush1.bf16.msra.mxu1 %v4385_v4  ;;  %2821 = vmatprep.subr.bf16.mxu0 %v4390_v5  ;;  %v4441_v5 = vld [vmem:[#allocation9 + $0x2ec] ss:$16 sps:$4 sm:$0xff]  }
 0x188   :  { %2862 = vmatprep.subr.bf16.mxu1 %v4393_v6 }
 0x18a   :  { %2822 = vmatpush2.bf16.msra.mxu0 %v4388_v7 }
 0x18b   :  { %2863 = vmatpush2.bf16.msra.mxu1 %v4391_v8  ;;  %2823 = vmatprep.subr.bf16.mxu0 %v4396_v16 }
 0x18c   :  { %2864 = vmatprep.subr.bf16.mxu1 %v4399_v17  ;;  %v4436_v17 = vld [vmem:[#allocation9 + $0xe8] ss:$16 sps:$4 sm:$0xff]  }
 0x18e   :  { %2824 = vmatpush2.bf16.msra.mxu0 %v4394_v18 }
 0x18f   :  { %2865 = vmatpush2.bf16.msra.mxu1 %v4397_v19  ;;  %2825 = vmatprep.subr.bf16.mxu0 %v4402_v20  ;;  %v4439_v20 = vld [vmem:[#allocation9 + $0x2e8] ss:$16 sps:$4 sm:$0xff]  }
 0x190   :  { %2866 = vmatprep.subr.bf16.mxu1 %v4405_v21  ;;  %v4444_v21 = vld [vmem:[#allocation9 + $0xcc] ss:$16 sps:$4 sm:$0xff]  }
 0x192   :  { %2826 = vmatpush2.bf16.msra.mxu0 %v4400_v23  ;;  %v4445_v23 = vld [vmem:[#allocation9 + $0x2c8] ss:$16 sps:$4 sm:$0xff]  }
 0x193   :  { %2867 = vmatpush2.bf16.msra.mxu1 %v4403_v24  ;;  %v1024_v32 = vpop.f32.mrf.mxu0  ;;  %2827 = vmatprep.subr.bf16.mxu0 %v4408_v25  ;;  %v1065_v41 = vpop.f32.mrf.mxu1  ;;  %v4453_v24 = vld [vmem:[#allocation9 + $0x2ac] ss:$16 sps:$4 sm:$0xff]   ;;  %v4448_v25 = vld [vmem:[#allocation9 + $0xa8] ss:$16 sps:$4 sm:$0xff]  }
 0x194   :  { %v1145_v40 = vadd.f32 %v1120_v27, %v1024_v32  ;;  %2868 = vmatprep.subr.bf16.mxu1 %v4411_v28  ;;  %v1147_v42 = vadd.f32 %v1128_v29, %v1065_v41  ;;  %v4456_v27 = vld [vmem:[#allocation9 + $0x8c] ss:$16 sps:$4 sm:$0xff]   ;;  %v4454_v29 = vld [vmem:[#allocation9 + $0x88] ss:$16 sps:$4 sm:$0xff]  }
 0x195   :  { %v1026_v43 = vpop.f32.mrf.mxu0  ;;  %v1067_v45 = vpop.f32.mrf.mxu1  ;;  %v4459_v28 = vld [vmem:[#allocation9 + $0x28c] ss:$16 sps:$4 sm:$0xff]   ;;  %v4463_v32 = vld [vmem:[#allocation9 + $0x268] ss:$16 sps:$4 sm:$0xff]  }
 0x196   :  { %4748 = vtanh.f32 %v1145_v40  ;;  %v1146_v44 = vadd.f32 %v1124_v31, %v1026_v43  ;;  %2828 = vmatpush2.bf16.msra.mxu0 %v4406_v30  ;;  %v1148_v47 = vadd.f32 %v1132_v36, %v1067_v45  ;;  %v4462_v30 = vld [vmem:[#allocation9 + $0x6c] ss:$16 sps:$4 sm:$0xff]   ;;  %v4469_v40 = vld [vmem:[#allocation9 + $0x248] ss:$16 sps:$4 sm:$0xff]  }
 0x197   :  { %4750 = vtanh.f32 %v1147_v42  ;;  %2869 = vmatpush2.bf16.msra.mxu1 %v4409_v33  ;;  %v1028_v48 = vpop.f32.mrf.mxu0  ;;  %2829 = vmatprep.subr.bf16.mxu0 %v4414_v39  ;;  %v1069_v11 = vpop.f32.mrf.mxu1  ;;  %v4465_v31 = vld [vmem:[#allocation9 + $0x26c] ss:$16 sps:$4 sm:$0xff]   ;;  %v4466_v39 = vld [vmem:[#allocation9 + $0x48] ss:$16 sps:$4 sm:$0xff]  }
 0x198   :  { %4752 = vtanh.f32 %v1146_v44  ;;  %2870 = vmatprep.subr.bf16.mxu1 %v4417_v57  ;;  %v4468_v33 = vld [vmem:[#allocation9 + $0x4c] ss:$16 sps:$4 sm:$0xff]   ;;  %v4472_v42 = vld [vmem:[#allocation9 + $0x28] ss:$16 sps:$4 sm:$0xff]  }
 0x199   :  { %4754 = vtanh.f32 %v1148_v47  ;;  %v1029_v52 = vpop.f32.mrf.mxu0  ;;  %v1070_v54 = vpop.f32.mrf.mxu1  ;;  %v4471_v36 = vld [vmem:[#allocation9 + $0x24c] ss:$16 sps:$4 sm:$0xff]   ;;  %v4475_v43 = vld [vmem:[#allocation9 + $0x228] ss:$16 sps:$4 sm:$0xff]  }
 0x19a   :  { %2830 = vmatpush2.bf16.msra.mxu0 %v4412_v46  ;;  %v4474_v41 = vld [vmem:[#allocation9 + $0x2c] ss:$16 sps:$4 sm:$0xff]   ;;  %v4478_v46 = vld [vmem:[#allocation9 + $0x8] ss:$16 sps:$4 sm:$0xff]  }
 0x19b   :  { %2871 = vmatpush2.bf16.msra.mxu1 %v4415_v49  ;;  %2831 = vmatprep.subr.bf16.mxu0 %v4420_v50  ;;  %v4477_v57 = vld [vmem:[#allocation9 + $0x22c] ss:$16 sps:$4 sm:$0xff]   ;;  %v4481_v47 = vld [vmem:[#allocation9 + $0x208] ss:$16 sps:$4 sm:$0xff]  }
 0x19c   :  { %2872 = vmatprep.subr.bf16.mxu1 %v4423_v51  ;;  %v4480_v44 = vld [vmem:[#allocation9 + $0xc] ss:$16 sps:$4 sm:$0xff]   ;;  %v4484_v50 = vld [vmem:[#allocation9 + $0x1e8] ss:$16 sps:$4 sm:$0xff]  }
 0x19d   :  { %v4483_v45 = vld [vmem:[#allocation9 + $0x20c] ss:$16 sps:$4 sm:$0xff]   ;;  %v4487_v11 = vld [vmem:[#allocation9 + $0x3e8] ss:$16 sps:$4 sm:$0xff]  }
 0x19e   :  { %2832 = vmatpush2.bf16.msra.mxu0 %v4418_v55  ;;  %v4486_v48 = vld [vmem:[#allocation9 + $0x1ec] ss:$16 sps:$4 sm:$0xff]   ;;  %v4490_v54 = vld [vmem:[#allocation9 + $0x1c8] ss:$16 sps:$4 sm:$0xff]  }
 0x19f   :  { %2873 = vmatpush2.bf16.msra.mxu1 %v4421_v56  ;;  %2833 = vmatprep.subr.bf16.mxu0 %v4426_v58  ;;  %v4489_v49 = vld [vmem:[#allocation9 + $0x3ec] ss:$16 sps:$4 sm:$0xff]   ;;  %v4493_v55 = vld [vmem:[#allocation9 + $0x3c8] ss:$16 sps:$4 sm:$0xff]  }
 0x1a0   :  { %2874 = vmatprep.subr.bf16.mxu1 %v4429_v59  ;;  %v4492_v51 = vld [vmem:[#allocation9 + $0x1cc] ss:$16 sps:$4 sm:$0xff]   ;;  %v4496_v59 = vld [vmem:[#allocation9 + $0x1a8] ss:$16 sps:$4 sm:$0xff]  }
 0x1a1   :  { %v4495_v52 = vld [vmem:[#allocation9 + $0x3cc] ss:$16 sps:$4 sm:$0xff]  }
 0x1a2   :  { %2834 = vmatpush2.bf16.msra.mxu0 %v4424_v60  ;;  %v4498_v56 = vld [vmem:[#allocation9 + $0x1ac] ss:$16 sps:$4 sm:$0xff]   ;;  %v4499_v60 = vld [vmem:[#allocation9 + $0x3a8] ss:$16 sps:$4 sm:$0xff]  }
 0x1a3   :  { %v4749_v1 = vpop.eup %4748  ;;  %2875 = vmatpush2.bf16.msra.mxu1 %v4427_v61  ;;  %2835 = vmatprep.subr.bf16.mxu0 %v4432_v62  ;;  %v4501_v58 = vld [vmem:[#allocation9 + $0x3ac] ss:$16 sps:$4 sm:$0xff]  }
 0x1a4   :  { %v4751_v4 = vpop.eup %4750  ;;  %2876 = vmatprep.subr.bf16.mxu1 %v4435_v63  ;;  %v5067_v18 = vpack.c.bf16 %v4749_v1, %v4749_v1  ;;  %v4504_v61 = vld [vmem:[#allocation9 + $0x18c] ss:$16 sps:$4 sm:$0xff]   ;;  %v4502_v63 = vld [vmem:[#allocation9 + $0x188] ss:$16 sps:$4 sm:$0xff]  }
 0x1a5   :  { %v4753_v6 = vpop.eup %4752  ;;  %v5063_v8 = vpack.c.bf16 %v4751_v4, %v4751_v4  ;;  %v4507_v62 = vld [vmem:[#allocation9 + $0x38c] ss:$16 sps:$4 sm:$0xff]   ;;  %v4511_v4 = vld [vmem:[#allocation9 + $0x368] ss:$16 sps:$4 sm:$0xff]  }
 0x1a6   :  { %v4755_v7 = vpop.eup %4754  ;;  %2836 = vmatpush2.bf16.msra.mxu0 %v4430_v0  ;;  %v5065_v16 = vpack.c.bf16 %v4753_v6, %v4753_v6  ;;  %v4505_v0 = vld [vmem:[#allocation9 + $0x388] ss:$16 sps:$4 sm:$0xff]   ;;  %v4510_v1 = vld [vmem:[#allocation9 + $0x16c] ss:$16 sps:$4 sm:$0xff]  }
 0x1a7   :  { %2877 = vmatpush2.bf16.msra.mxu1 %v4433_v2  ;;  %v5069_v19 = vpack.c.bf16 %v4755_v7, %v4755_v7  ;;  %2887 = vmatprep.subr.bf16.mxu0 %v4438_v3  ;;  %v4513_v2 = vld [vmem:[#allocation9 + $0x36c] ss:$16 sps:$4 sm:$0xff]   ;;  %v4508_v3 = vld [vmem:[#allocation9 + $0x168] ss:$16 sps:$4 sm:$0xff]  }
 0x1a8   :  { %2837 = vmatprep.mubr.bf16.mxu0 %v5065_v16  ;;  %2928 = vmatprep.subr.bf16.mxu1 %v4441_v5  ;;  %v4516_v5 = vld [vmem:[#allocation9 + $0x14c] ss:$16 sps:$4 sm:$0xff]   ;;  %v4514_v7 = vld [vmem:[#allocation9 + $0x148] ss:$16 sps:$4 sm:$0xff]  }
 0x1a9   :  { %2878 = vmatprep.mubr.bf16.mxu1 %v5069_v19  ;;  %2838 = vmatmul.mubr.bf16.vlgmr.msra.gmra.mxu0 %v5067_v18  ;;  %v4519_v6 = vld [vmem:[#allocation9 + $0x34c] ss:$16 sps:$4 sm:$0xff]  }
 0x1aa   :  { %2879 = vmatmul.mubr.bf16.vlgmr.msra.gmra.mxu1 %v5063_v8  ;;  %2888 = vmatpush1.bf16.msra.mxu0 %v4436_v17  ;;  %v4517_v17 = vld [vmem:[#allocation9 + $0x348] ss:$16 sps:$4 sm:$0xff]  }
 0x1ab   :  { %2929 = vmatpush1.bf16.msra.mxu1 %v4439_v20  ;;  %2919 = vmatprep.mubr.bf16.mxu0 %v5045_v35  ;;  %v4457_v35 = vld [vmem:[#allocation9 + $0x288] ss:$16 sps:$4 sm:$0xff]   ;;  %v4522_v20 = vld [vmem:[#allocation9 + $0x12c] ss:$16 sps:$4 sm:$0xff]  }
 0x1ac   :  { %2960 = vmatprep.mubr.bf16.mxu1 %v5049_v38  ;;  %2889 = vmatprep.subr.bf16.mxu0 %v4444_v21  ;;  %v4460_v38 = vld [vmem:[#allocation9 + $0x68] ss:$16 sps:$4 sm:$0xff]   ;;  %v4525_v21 = vld [vmem:[#allocation9 + $0x32c] ss:$16 sps:$4 sm:$0xff]  }
 0x1ad   :  { %2930 = vmatprep.subr.bf16.mxu1 %v4447_v22  ;;  %v4520_v22 = vld [vmem:[#allocation9 + $0x128] ss:$16 sps:$4 sm:$0xff]  }
 0x1ae   :  { %2890 = vmatpush1.bf16.msra.mxu0 %v4442_v53  ;;  %v4523_v53 = vld [vmem:[#allocation9 + $0x328] ss:$16 sps:$4 sm:$0xff]  }
 0x1af   :  { %2931 = vmatpush1.bf16.msra.mxu1 %v4445_v23  ;;  %2891 = vmatprep.subr.bf16.mxu0 %v4450_v13  ;;  %v4528_v23 = vld [vmem:[#allocation9 + $0x10c] ss:$16 sps:$4 sm:$0xff]  }
 0x1b0   :  { %2932 = vmatprep.subr.bf16.mxu1 %v4453_v24  ;;  %v4531_v13 = vld [vmem:[#allocation9 + $0x30c] ss:$16 sps:$4 sm:$0xff]   ;;  %v4526_v24 = vld [vmem:[#allocation9 + $0x108] ss:$16 sps:$4 sm:$0xff]  }
 0x1b2   :  { %2892 = vmatpush1.bf16.msra.mxu0 %v4448_v25  ;;  %v4529_v25 = vld [vmem:[#allocation9 + $0x308] ss:$16 sps:$4 sm:$0xff]  }
 0x1b3   :  { %2933 = vmatpush1.bf16.msra.mxu1 %v4451_v26  ;;  %2893 = vmatprep.subr.bf16.mxu0 %v4456_v27  ;;  %v4534_v26 = vld [vmem:[#allocation9 + $0x4ec] ss:$16 sps:$4 sm:$0xff]  }
 0x1b4   :  { %2934 = vmatprep.subr.bf16.mxu1 %v4459_v28  ;;  %v4537_v27 = vld [vmem:[#allocation9 + $0x6ec] ss:$16 sps:$4 sm:$0xff]   ;;  %v4532_v28 = vld [vmem:[#allocation9 + $0x4e8] ss:$16 sps:$4 sm:$0xff]  }
 0x1b6   :  { %2894 = vmatpush1.bf16.msra.mxu0 %v4454_v29  ;;  %v4535_v29 = vld [vmem:[#allocation9 + $0x6e8] ss:$16 sps:$4 sm:$0xff]  }
 0x1b7   :  { %2935 = vmatpush1.bf16.msra.mxu1 %v4457_v35  ;;  %2895 = vmatprep.subr.bf16.mxu0 %v4462_v30  ;;  %v4540_v35 = vld [vmem:[#allocation9 + $0x4cc] ss:$16 sps:$4 sm:$0xff]  }
 0x1b8   :  { %2936 = vmatprep.subr.bf16.mxu1 %v4465_v31  ;;  %v4543_v30 = vld [vmem:[#allocation9 + $0x6cc] ss:$16 sps:$4 sm:$0xff]   ;;  %v4538_v31 = vld [vmem:[#allocation9 + $0x4c8] ss:$16 sps:$4 sm:$0xff]  }
 0x1ba   :  { %2896 = vmatpush1.bf16.msra.mxu0 %v4460_v38  ;;  %v4541_v38 = vld [vmem:[#allocation9 + $0x6c8] ss:$16 sps:$4 sm:$0xff]  }
 0x1bb   :  { %2937 = vmatpush1.bf16.msra.mxu1 %v4463_v32  ;;  %2897 = vmatprep.subr.bf16.mxu0 %v4468_v33  ;;  %v4546_v32 = vld [vmem:[#allocation9 + $0x4ac] ss:$16 sps:$4 sm:$0xff]  }
 0x1bc   :  { %2938 = vmatprep.subr.bf16.mxu1 %v4471_v36  ;;  %v4549_v33 = vld [vmem:[#allocation9 + $0x6ac] ss:$16 sps:$4 sm:$0xff]   ;;  %v4544_v36 = vld [vmem:[#allocation9 + $0x4a8] ss:$16 sps:$4 sm:$0xff]  }
 0x1be   :  { %2898 = vmatpush1.bf16.msra.mxu0 %v4466_v39  ;;  %v4552_v39 = vld [vmem:[#allocation9 + $0x48c] ss:$16 sps:$4 sm:$0xff]  }
 0x1bf   :  { %2939 = vmatpush1.bf16.msra.mxu1 %v4469_v40  ;;  %2899 = vmatprep.subr.bf16.mxu0 %v4474_v41  ;;  %v4550_v40 = vld [vmem:[#allocation9 + $0x488] ss:$16 sps:$4 sm:$0xff]   ;;  %v4558_v41 = vld [vmem:[#allocation9 + $0x46c] ss:$16 sps:$4 sm:$0xff]  }
 0x1c0   :  { %2940 = vmatprep.subr.bf16.mxu1 %v4477_v57  ;;  %v4561_v57 = vld [vmem:[#allocation9 + $0x66c] ss:$16 sps:$4 sm:$0xff]  }
 0x1c2   :  { %2900 = vmatpush1.bf16.msra.mxu0 %v4472_v42  ;;  %v4559_v42 = vld [vmem:[#allocation9 + $0x668] ss:$16 sps:$4 sm:$0xff]  }
 0x1c3   :  { %2941 = vmatpush1.bf16.msra.mxu1 %v4475_v43  ;;  %2901 = vmatprep.subr.bf16.mxu0 %v4480_v44  ;;  %v4564_v43 = vld [vmem:[#allocation9 + $0x44c] ss:$16 sps:$4 sm:$0xff]  }
 0x1c4   :  { %2942 = vmatprep.subr.bf16.mxu1 %v4483_v45  ;;  %v4567_v44 = vld [vmem:[#allocation9 + $0x64c] ss:$16 sps:$4 sm:$0xff]   ;;  %v4562_v45 = vld [vmem:[#allocation9 + $0x448] ss:$16 sps:$4 sm:$0xff]  }
 0x1c6   :  { %2902 = vmatpush1.bf16.msra.mxu0 %v4478_v46  ;;  %v4565_v46 = vld [vmem:[#allocation9 + $0x648] ss:$16 sps:$4 sm:$0xff]  }
 0x1c7   :  { %2943 = vmatpush1.bf16.msra.mxu1 %v4481_v47  ;;  %2903 = vmatprep.subr.bf16.mxu0 %v4486_v48  ;;  %v4570_v47 = vld [vmem:[#allocation9 + $0x42c] ss:$16 sps:$4 sm:$0xff]  }
 0x1c8   :  { %2944 = vmatprep.subr.bf16.mxu1 %v4489_v49  ;;  %v4573_v48 = vld [vmem:[#allocation9 + $0x62c] ss:$16 sps:$4 sm:$0xff]   ;;  %v4568_v49 = vld [vmem:[#allocation9 + $0x428] ss:$16 sps:$4 sm:$0xff]  }
 0x1ca   :  { %2904 = vmatpush2.bf16.msra.mxu0 %v4484_v50  ;;  %v4571_v50 = vld [vmem:[#allocation9 + $0x628] ss:$16 sps:$4 sm:$0xff]  }
 0x1cb   :  { %2945 = vmatpush2.bf16.msra.mxu1 %v4487_v11  ;;  %2905 = vmatprep.subr.bf16.mxu0 %v4492_v51  ;;  %v4576_v11 = vld [vmem:[#allocation9 + $0x40c] ss:$16 sps:$4 sm:$0xff]  }
 0x1cc   :  { %2946 = vmatprep.subr.bf16.mxu1 %v4495_v52  ;;  %v4579_v51 = vld [vmem:[#allocation9 + $0x60c] ss:$16 sps:$4 sm:$0xff]   ;;  %v4574_v52 = vld [vmem:[#allocation9 + $0x408] ss:$16 sps:$4 sm:$0xff]  }
 0x1ce   :  { %2906 = vmatpush2.bf16.msra.mxu0 %v4490_v54  ;;  %v4577_v54 = vld [vmem:[#allocation9 + $0x608] ss:$16 sps:$4 sm:$0xff]  }
 0x1cf   :  { %2947 = vmatpush2.bf16.msra.mxu1 %v4493_v55  ;;  %2907 = vmatprep.subr.bf16.mxu0 %v4498_v56  ;;  %v4582_v55 = vld [vmem:[#allocation9 + $0x5ec] ss:$16 sps:$4 sm:$0xff]  }
 0x1d0   :  { %2948 = vmatprep.subr.bf16.mxu1 %v4501_v58  ;;  %v4585_v56 = vld [vmem:[#allocation9 + $0x7ec] ss:$16 sps:$4 sm:$0xff]   ;;  %v4580_v58 = vld [vmem:[#allocation9 + $0x5e8] ss:$16 sps:$4 sm:$0xff]  }
 0x1d2   :  { %2908 = vmatpush2.bf16.msra.mxu0 %v4496_v59  ;;  %v4583_v59 = vld [vmem:[#allocation9 + $0x7e8] ss:$16 sps:$4 sm:$0xff]  }
 0x1d3   :  { %2949 = vmatpush2.bf16.msra.mxu1 %v4499_v60  ;;  %2909 = vmatprep.subr.bf16.mxu0 %v4504_v61  ;;  %v4588_v60 = vld [vmem:[#allocation9 + $0x5cc] ss:$16 sps:$4 sm:$0xff]  }
 0x1d4   :  { %2950 = vmatprep.subr.bf16.mxu1 %v4507_v62  ;;  %v4591_v61 = vld [vmem:[#allocation9 + $0x7cc] ss:$16 sps:$4 sm:$0xff]   ;;  %v4586_v62 = vld [vmem:[#allocation9 + $0x5c8] ss:$16 sps:$4 sm:$0xff]  }
 0x1d6   :  { %2910 = vmatpush2.bf16.msra.mxu0 %v4502_v63  ;;  %v4589_v63 = vld [vmem:[#allocation9 + $0x7c8] ss:$16 sps:$4 sm:$0xff]  }
 0x1d7   :  { %2951 = vmatpush2.bf16.msra.mxu1 %v4505_v0  ;;  %2911 = vmatprep.subr.bf16.mxu0 %v4510_v1  ;;  %v4594_v0 = vld [vmem:[#allocation9 + $0x5ac] ss:$16 sps:$4 sm:$0xff]  }
 0x1d8   :  { %2952 = vmatprep.subr.bf16.mxu1 %v4513_v2  ;;  %v4597_v1 = vld [vmem:[#allocation9 + $0x7ac] ss:$16 sps:$4 sm:$0xff]   ;;  %v4592_v2 = vld [vmem:[#allocation9 + $0x5a8] ss:$16 sps:$4 sm:$0xff]  }
 0x1da   :  { %2912 = vmatpush2.bf16.msra.mxu0 %v4508_v3  ;;  %v4595_v3 = vld [vmem:[#allocation9 + $0x7a8] ss:$16 sps:$4 sm:$0xff]  }
 0x1db   :  { %2953 = vmatpush2.bf16.msra.mxu1 %v4511_v4  ;;  %2913 = vmatprep.subr.bf16.mxu0 %v4516_v5  ;;  %v4600_v4 = vld [vmem:[#allocation9 + $0x58c] ss:$16 sps:$4 sm:$0xff]  }
 0x1dc   :  { %2954 = vmatprep.subr.bf16.mxu1 %v4519_v6  ;;  %v4603_v5 = vld [vmem:[#allocation9 + $0x78c] ss:$16 sps:$4 sm:$0xff]   ;;  %v4598_v6 = vld [vmem:[#allocation9 + $0x588] ss:$16 sps:$4 sm:$0xff]  }
 0x1de   :  { %2914 = vmatpush2.bf16.msra.mxu0 %v4514_v7  ;;  %v4601_v7 = vld [vmem:[#allocation9 + $0x788] ss:$16 sps:$4 sm:$0xff]  }
 0x1df   :  { %2955 = vmatpush2.bf16.msra.mxu1 %v4517_v17  ;;  %2915 = vmatprep.subr.bf16.mxu0 %v4522_v20  ;;  %v4606_v17 = vld [vmem:[#allocation9 + $0x56c] ss:$16 sps:$4 sm:$0xff]  }
 0x1e0   :  { %2956 = vmatprep.subr.bf16.mxu1 %v4525_v21  ;;  %v4609_v20 = vld [vmem:[#allocation9 + $0x76c] ss:$16 sps:$4 sm:$0xff]   ;;  %v4604_v21 = vld [vmem:[#allocation9 + $0x568] ss:$16 sps:$4 sm:$0xff]  }
 0x1e2   :  { %2916 = vmatpush2.bf16.msra.mxu0 %v4520_v22  ;;  %v4607_v22 = vld [vmem:[#allocation9 + $0x768] ss:$16 sps:$4 sm:$0xff]  }
 0x1e3   :  { %2957 = vmatpush2.bf16.msra.mxu1 %v4523_v53  ;;  %2917 = vmatprep.subr.bf16.mxu0 %v4528_v23  ;;  %v4612_v53 = vld [vmem:[#allocation9 + $0x54c] ss:$16 sps:$4 sm:$0xff]  }
 0x1e4   :  { %2958 = vmatprep.subr.bf16.mxu1 %v4531_v13  ;;  %v4615_v23 = vld [vmem:[#allocation9 + $0x74c] ss:$16 sps:$4 sm:$0xff]   ;;  %v4610_v13 = vld [vmem:[#allocation9 + $0x548] ss:$16 sps:$4 sm:$0xff]  }
 0x1e6   :  { %2918 = vmatpush2.bf16.msra.mxu0 %v4526_v24  ;;  %v4613_v24 = vld [vmem:[#allocation9 + $0x748] ss:$16 sps:$4 sm:$0xff]  }
 0x1e7   :  { %2959 = vmatpush2.bf16.msra.mxu1 %v4529_v25  ;;  %2969 = vmatprep.subr.bf16.mxu0 %v4534_v26  ;;  %v4618_v25 = vld [vmem:[#allocation9 + $0x52c] ss:$16 sps:$4 sm:$0xff]  }
 0x1e8   :  { %3010 = vmatprep.subr.bf16.mxu1 %v4537_v27  ;;  %v4621_v26 = vld [vmem:[#allocation9 + $0x72c] ss:$16 sps:$4 sm:$0xff]   ;;  %v4616_v27 = vld [vmem:[#allocation9 + $0x528] ss:$16 sps:$4 sm:$0xff]  }
 0x1e9   :  { %2920 = vmatmul.mubr.bf16.vlgmr.msra.gmra.mxu0 %v5047_v37  ;;  %v4547_v37 = vld [vmem:[#allocation9 + $0x6a8] ss:$16 sps:$4 sm:$0xff]  }
 0x1ea   :  { %2961 = vmatmul.mubr.bf16.vlgmr.msra.gmra.mxu1 %v5043_v34  ;;  %2970 = vmatpush1.bf16.msra.mxu0 %v4532_v28  ;;  %v4555_v34 = vld [vmem:[#allocation9 + $0x68c] ss:$16 sps:$4 sm:$0xff]   ;;  %v4619_v28 = vld [vmem:[#allocation9 + $0x728] ss:$16 sps:$4 sm:$0xff]  }
 0x1eb   :  { %3001 = vmatprep.mubr.bf16.mxu0 %v5065_v16  ;;  %3011 = vmatpush1.bf16.msra.mxu1 %v4535_v29  ;;  %v4553_v16 = vld [vmem:[#allocation9 + $0x688] ss:$16 sps:$4 sm:$0xff]   ;;  %v4624_v29 = vld [vmem:[#allocation9 + $0x50c] ss:$16 sps:$4 sm:$0xff]  }
 0x1ec   :  { %3042 = vmatprep.mubr.bf16.mxu1 %v5069_v19  ;;  %2971 = vmatprep.subr.bf16.mxu0 %v4540_v35  ;;  %v4556_v19 = vld [vmem:[#allocation9 + $0x468] ss:$16 sps:$4 sm:$0xff]   ;;  %v4627_v35 = vld [vmem:[#allocation9 + $0x70c] ss:$16 sps:$4 sm:$0xff]  }
 0x1ed   :  { %3012 = vmatprep.subr.bf16.mxu1 %v4543_v30  ;;  %v4622_v30 = vld [vmem:[#allocation9 + $0x508] ss:$16 sps:$4 sm:$0xff]  }
 0x1ee   :  { %2972 = vmatpush1.bf16.msra.mxu0 %v4538_v31  ;;  %v4625_v31 = vld [vmem:[#allocation9 + $0x708] ss:$16 sps:$4 sm:$0xff]  }
 0x1ef   :  { %3013 = vmatpush1.bf16.msra.mxu1 %v4541_v38  ;;  %2973 = vmatprep.subr.bf16.mxu0 %v4546_v32  ;;  %v4630_v38 = vld [vmem:[#allocation11 + $0x74] ss:$8 sps:$4 sm:$0xff]   ;;  %v4628_v32 = vld [vmem:[#allocation11 + $0x70] ss:$8 sps:$4 sm:$0xff]  }
 0x1f0   :  { %3014 = vmatprep.subr.bf16.mxu1 %v4549_v33  ;;  %v4633_v33 = vld [vmem:[#allocation11 + $0x64] ss:$8 sps:$4 sm:$0xff]  }
 0x1f2   :  { %2974 = vmatpush1.bf16.msra.mxu0 %v4544_v36 }
 0x1f3   :  { %3015 = vmatpush1.bf16.msra.mxu1 %v4547_v37  ;;  %2975 = vmatprep.subr.bf16.mxu0 %v4552_v39  ;;  %v4631_v39 = vld [vmem:[#allocation11 + $0x60] ss:$8 sps:$4 sm:$0xff]  }
 0x1f4   :  { %3016 = vmatprep.subr.bf16.mxu1 %v4555_v34 }
 0x1f6   :  { %2976 = vmatpush1.bf16.msra.mxu0 %v4550_v40  ;;  %v4636_v40 = vld [vmem:[#allocation11 + $0x54] ss:$8 sps:$4 sm:$0xff]  }
 0x1f7   :  { %3017 = vmatpush1.bf16.msra.mxu1 %v4553_v16  ;;  %2977 = vmatprep.subr.bf16.mxu0 %v4558_v41 }
 0x1f8   :  { %3018 = vmatprep.subr.bf16.mxu1 %v4561_v57 }
 0x1fa   :  { %2978 = vmatpush1.bf16.msra.mxu0 %v4556_v19  ;;  %v4634_v19 = vld [vmem:[#allocation11 + $0x50] ss:$8 sps:$4 sm:$0xff]  }
 0x1fb   :  { %3019 = vmatpush1.bf16.msra.mxu1 %v4559_v42  ;;  %2979 = vmatprep.subr.bf16.mxu0 %v4564_v43 }
 0x1fc   :  { %3020 = vmatprep.subr.bf16.mxu1 %v4567_v44  ;;  %v4676_v44 = vld [vmem:[#allocation11 + $0x170] ss:$8 sps:$4 sm:$0xff]  }
 0x1fe   :  { %2980 = vmatpush1.bf16.msra.mxu0 %v4562_v45  ;;  %v4681_v45 = vld [vmem:[#allocation11 + $0x164] ss:$8 sps:$4 sm:$0xff]  }
 0x1ff   :  { %3021 = vmatpush1.bf16.msra.mxu1 %v4565_v46  ;;  %2981 = vmatprep.subr.bf16.mxu0 %v4570_v47  ;;  %v4637_v46 = vld [vmem:[#allocation11 + $0x40] ss:$8 sps:$4 sm:$0xff]   ;;  %v4642_v47 = vld [vmem:[#allocation11 + $0x34] ss:$8 sps:$4 sm:$0xff]  }
 0x200   :  { %3022 = vmatprep.subr.bf16.mxu1 %v4573_v48  ;;  %v4679_v48 = vld [vmem:[#allocation11 + $0x160] ss:$8 sps:$4 sm:$0xff]  }
 0x202   :  { %2982 = vmatpush1.bf16.msra.mxu0 %v4568_v49  ;;  %v4684_v49 = vld [vmem:[#allocation11 + $0x154] ss:$8 sps:$4 sm:$0xff]  }
 0x203   :  { %3023 = vmatpush1.bf16.msra.mxu1 %v4571_v50  ;;  %2983 = vmatprep.subr.bf16.mxu0 %v4576_v11  ;;  %v4640_v50 = vld [vmem:[#allocation11 + $0x30] ss:$8 sps:$4 sm:$0xff]   ;;  %v4645_v11 = vld [vmem:[#allocation11 + $0x24] ss:$8 sps:$4 sm:$0xff]  }
 0x204   :  { %3024 = vmatprep.subr.bf16.mxu1 %v4579_v51  ;;  %v4682_v51 = vld [vmem:[#allocation11 + $0x150] ss:$8 sps:$4 sm:$0xff]  }
 0x206   :  { %2984 = vmatpush1.bf16.msra.mxu0 %v4574_v52  ;;  %v4687_v52 = vld [vmem:[#allocation11 + $0x144] ss:$8 sps:$4 sm:$0xff]  }
 0x207   :  { %3025 = vmatpush1.bf16.msra.mxu1 %v4577_v54  ;;  %2985 = vmatprep.subr.bf16.mxu0 %v4582_v55  ;;  %v4643_v54 = vld [vmem:[#allocation11 + $0x20] ss:$8 sps:$4 sm:$0xff]   ;;  %v4648_v55 = vld [vmem:[#allocation11 + $0x14] ss:$8 sps:$4 sm:$0xff]  }
 0x208   :  { %3026 = vmatprep.subr.bf16.mxu1 %v4585_v56  ;;  %v4685_v56 = vld [vmem:[#allocation11 + $0x140] ss:$8 sps:$4 sm:$0xff]  }
 0x20a   :  { %2986 = vmatpush2.bf16.msra.mxu0 %v4580_v58  ;;  %v4690_v58 = vld [vmem:[#allocation11 + $0x134] ss:$8 sps:$4 sm:$0xff]  }
 0x20b   :  { %3027 = vmatpush2.bf16.msra.mxu1 %v4583_v59  ;;  %2987 = vmatprep.subr.bf16.mxu0 %v4588_v60  ;;  %v4646_v59 = vld [vmem:[#allocation11 + $0x10] ss:$8 sps:$4 sm:$0xff]   ;;  %v4651_v60 = vld [vmem:[#allocation11 + $0x4] ss:$8 sps:$4 sm:$0xff]  }
 0x20c   :  { %3028 = vmatprep.subr.bf16.mxu1 %v4591_v61  ;;  %v4688_v61 = vld [vmem:[#allocation11 + $0x130] ss:$8 sps:$4 sm:$0xff]  }
 0x20e   :  { %2988 = vmatpush2.bf16.msra.mxu0 %v4586_v62  ;;  %v4693_v62 = vld [vmem:[#allocation11 + $0x124] ss:$8 sps:$4 sm:$0xff]  }
 0x20f   :  { %3029 = vmatpush2.bf16.msra.mxu1 %v4589_v63  ;;  %2989 = vmatprep.subr.bf16.mxu0 %v4594_v0  ;;  %v4649_v63 = vld [vmem:[#allocation11] ss:$8 sps:$4 sm:$0xff]   ;;  %v4654_v0 = vld [vmem:[#allocation11 + $0xf4] ss:$8 sps:$4 sm:$0xff]  }
 0x210   :  { %3030 = vmatprep.subr.bf16.mxu1 %v4597_v1  ;;  %v4691_v1 = vld [vmem:[#allocation11 + $0x120] ss:$8 sps:$4 sm:$0xff]  }
 0x212   :  { %2990 = vmatpush2.bf16.msra.mxu0 %v4592_v2  ;;  %v4696_v2 = vld [vmem:[#allocation11 + $0x114] ss:$8 sps:$4 sm:$0xff]  }
 0x213   :  { %3031 = vmatpush2.bf16.msra.mxu1 %v4595_v3  ;;  %2991 = vmatprep.subr.bf16.mxu0 %v4600_v4  ;;  %v4652_v3 = vld [vmem:[#allocation11 + $0xf0] ss:$8 sps:$4 sm:$0xff]   ;;  %v4657_v4 = vld [vmem:[#allocation11 + $0xe4] ss:$8 sps:$4 sm:$0xff]  }
 0x214   :  { %3032 = vmatprep.subr.bf16.mxu1 %v4603_v5  ;;  %v4694_v5 = vld [vmem:[#allocation11 + $0x110] ss:$8 sps:$4 sm:$0xff]  }
 0x216   :  { %2992 = vmatpush2.bf16.msra.mxu0 %v4598_v6  ;;  %v4699_v6 = vld [vmem:[#allocation11 + $0x104] ss:$8 sps:$4 sm:$0xff]  }
 0x217   :  { %3033 = vmatpush2.bf16.msra.mxu1 %v4601_v7  ;;  %2993 = vmatprep.subr.bf16.mxu0 %v4606_v17  ;;  %v4655_v7 = vld [vmem:[#allocation11 + $0xe0] ss:$8 sps:$4 sm:$0xff]   ;;  %v4660_v17 = vld [vmem:[#allocation11 + $0xd4] ss:$8 sps:$4 sm:$0xff]  }
 0x218   :  { %3034 = vmatprep.subr.bf16.mxu1 %v4609_v20  ;;  %v4697_v20 = vld [vmem:[#allocation11 + $0x100] ss:$8 sps:$4 sm:$0xff]  }
 0x21a   :  { %2994 = vmatpush2.bf16.msra.mxu0 %v4604_v21  ;;  %v4702_v21 = vld [vmem:[#allocation11 + $0x1f4] ss:$8 sps:$4 sm:$0xff]  }
 0x21b   :  { %3035 = vmatpush2.bf16.msra.mxu1 %v4607_v22  ;;  %2995 = vmatprep.subr.bf16.mxu0 %v4612_v53  ;;  %v4658_v22 = vld [vmem:[#allocation11 + $0xd0] ss:$8 sps:$4 sm:$0xff]   ;;  %v4663_v53 = vld [vmem:[#allocation11 + $0xc4] ss:$8 sps:$4 sm:$0xff]  }
 0x21c   :  { %3036 = vmatprep.subr.bf16.mxu1 %v4615_v23  ;;  %v4700_v23 = vld [vmem:[#allocation11 + $0x1f0] ss:$8 sps:$4 sm:$0xff]  }
 0x21e   :  { %2996 = vmatpush2.bf16.msra.mxu0 %v4610_v13  ;;  %v4705_v13 = vld [vmem:[#allocation11 + $0x1e4] ss:$8 sps:$4 sm:$0xff]  }
 0x21f   :  { %3037 = vmatpush2.bf16.msra.mxu1 %v4613_v24  ;;  %2997 = vmatprep.subr.bf16.mxu0 %v4618_v25  ;;  %v4661_v24 = vld [vmem:[#allocation11 + $0xc0] ss:$8 sps:$4 sm:$0xff]   ;;  %v4666_v25 = vld [vmem:[#allocation11 + $0xb4] ss:$8 sps:$4 sm:$0xff]  }
 0x220   :  { %3038 = vmatprep.subr.bf16.mxu1 %v4621_v26  ;;  %v4703_v26 = vld [vmem:[#allocation11 + $0x1e0] ss:$8 sps:$4 sm:$0xff]  }
 0x222   :  { %2998 = vmatpush2.bf16.msra.mxu0 %v4616_v27  ;;  %v4664_v27 = vld [vmem:[#allocation11 + $0xb0] ss:$8 sps:$4 sm:$0xff]  }
 0x223   :  { %3039 = vmatpush2.bf16.msra.mxu1 %v4619_v28  ;;  %2999 = vmatprep.subr.bf16.mxu0 %v4624_v29  ;;  %v4669_v28 = vld [vmem:[#allocation11 + $0xa4] ss:$8 sps:$4 sm:$0xff]   ;;  %v4667_v29 = vld [vmem:[#allocation11 + $0xa0] ss:$8 sps:$4 sm:$0xff]  }
 0x224   :  { %3040 = vmatprep.subr.bf16.mxu1 %v4627_v35  ;;  %v4672_v35 = vld [vmem:[#allocation11 + $0x94] ss:$8 sps:$4 sm:$0xff]  }
 0x226   :  { %3000 = vmatpush2.bf16.msra.mxu0 %v4622_v30  ;;  %v5094_v30 = vld [vmem:[%s5125_s4] sm:$0xf] }
 0x227   :  { %3041 = vmatpush2.bf16.msra.mxu1 %v4625_v31  ;;  %3455 = vmatprep.subr.bf16.mxu0 %v4630_v38  ;;  %v4670_v31 = vld [vmem:[#allocation11 + $0x90] ss:$8 sps:$4 sm:$0xff]   ;;  %v4675_v38 = vld [vmem:[#allocation11 + $0x84] ss:$8 sps:$4 sm:$0xff]  }
 0x229   :  { %3002 = vmatmul.mubr.bf16.vlgmr.msra.gmra.mxu0 %v5067_v18  ;;  %v5082_v36 = vpop.f32.mrf.mxu0  ;;  %v4639_v18 = vld [vmem:[#allocation11 + $0x44] ss:$8 sps:$4 sm:$0xff]  }
 0x22a   :  { %3043 = vmatmul.mubr.bf16.vlgmr.msra.gmra.mxu1 %v5063_v8  ;;  %v5085_v37 = vpop.f32.mrf.mxu1  ;;  %3456 = vmatpush1.bf16.msra.mxu0 %v4628_v32  ;;  %v4678_v8 = vld [vmem:[#allocation11 + $0x174] ss:$8 sps:$4 sm:$0xff]   ;;  %v1426_v32 = vrot.slane %v5094_v30, %v5024_v10 }
 0x22b   :  { %v5087_v34 = vpop.f32.mrf.mxu0  ;;  %3457 = vmatprep.subr.bf16.mxu0 %v4633_v33  ;;  %3496 = vmatprep.subr.bf16.mxu1 %v4678_v8  ;;  %v1430_v33 = vrot.slane %v5094_v30, %v5030_v14  ;;  %v4706_v8 = vld [vmem:[#allocation11 + $0x1d0] ss:$8 sps:$4 sm:$0xff]  }
 0x22c   :  { %v5089_v16 = vpop.f32.mrf.mxu1  ;;  %3497 = vmatpush1.bf16.msra.mxu1 %v4676_v44 }
 0x22d   :  { %v2761_v41 = vpop.f32.mrf.mxu0  ;;  %3498 = vmatprep.subr.bf16.mxu1 %v4681_v45 }
 0x22e   :  { %v2802_v57 = vpop.f32.mrf.mxu1  ;;  %3458 = vmatpush1.bf16.msra.mxu0 %v4631_v39  ;;  %v4673_v39 = vld [vmem:[#allocation11 + $0x80] ss:$8 sps:$4 sm:$0xff]   ;;  %v2760_v41 = vadd.f32 %v5087_v34, %v1430_v33 }
 0x22f   :  { %v2762_v42 = vpop.f32.mrf.mxu0  ;;  %3459 = vmatprep.subr.bf16.mxu0 %v4636_v40  ;;  %v2758_v40 = vadd.f32 %v5082_v36, %v1426_v32  ;;  %v4711_v36 = vld [vmem:[#allocation11 + $0x1c4] ss:$8 sps:$4 sm:$0xff]  }
 0x230   :  { %v2803_v43 = vpop.f32.mrf.mxu1  ;;  %3499 = vmatpush1.bf16.msra.mxu1 %v4679_v48  ;;  %v4708_v42 = vld [vmem:[#allocation11 + $0x1d4] ss:$8 sps:$4 sm:$0xff]  }
 0x231   :  { %3500 = vmatprep.subr.bf16.mxu1 %v4684_v49  ;;  %v2799_v57 = vadd.f32 %v5085_v37, %v2758_v40 }
 0x232   :  { %3460 = vmatpush1.bf16.msra.mxu0 %v4634_v19 }
 0x233   :  { %3461 = vmatprep.subr.bf16.mxu0 %v4639_v18  ;;  %v2801_v18 = vadd.f32 %v5089_v16, %v2760_v41  ;;  %v4714_v16 = vld [vmem:[#allocation11 + $0x1b4] ss:$8 sps:$4 sm:$0xff]  }
 0x234   :  { %3501 = vmatpush1.bf16.msra.mxu1 %v4682_v51 }
 0x235   :  { %3502 = vmatprep.subr.bf16.mxu1 %v4687_v52  ;;  %v4712_v52 = vld [vmem:[#allocation11 + $0x1b0] ss:$8 sps:$4 sm:$0xff]  }
 0x236   :  { %3462 = vmatpush1.bf16.msra.mxu0 %v4637_v46 }
 0x237   :  { %3463 = vmatprep.subr.bf16.mxu0 %v4642_v47 }
 0x238   :  { %3503 = vmatpush1.bf16.msra.mxu1 %v4685_v56  ;;  %v4720_v56 = vld [vmem:[#allocation11 + $0x194] ss:$8 sps:$4 sm:$0xff]  }
 0x239   :  { %3504 = vmatprep.subr.bf16.mxu1 %v4690_v58  ;;  %v4718_v58 = vld [vmem:[#allocation11 + $0x190] ss:$8 sps:$4 sm:$0xff]  }
 0x23a   :  { %3464 = vmatpush1.bf16.msra.mxu0 %v4640_v50 }
 0x23b   :  { %3465 = vmatprep.subr.bf16.mxu0 %v4645_v11  ;;  %v4709_v11 = vld [vmem:[#allocation11 + $0x1c0] ss:$8 sps:$4 sm:$0xff]  }
 0x23c   :  { %3505 = vmatpush1.bf16.msra.mxu1 %v4688_v61  ;;  %v4723_v61 = vld [vmem:[#allocation11 + $0x184] ss:$8 sps:$4 sm:$0xff]  }
 0x23d   :  { %3506 = vmatprep.subr.bf16.mxu1 %v4693_v62 }
 0x23e   :  { %3466 = vmatpush1.bf16.msra.mxu0 %v4643_v54  ;;  %v4717_v54 = vld [vmem:[#allocation11 + $0x1a4] ss:$8 sps:$4 sm:$0xff]  }
 0x23f   :  { %3467 = vmatprep.subr.bf16.mxu0 %v4648_v55  ;;  %v4715_v55 = vld [vmem:[#allocation11 + $0x1a0] ss:$8 sps:$4 sm:$0xff]  }
 0x240   :  { %3507 = vmatpush1.bf16.msra.mxu1 %v4691_v1 }
 0x241   :  { %3508 = vmatprep.subr.bf16.mxu1 %v4696_v2 }
 0x242   :  { %3468 = vmatpush1.bf16.msra.mxu0 %v4646_v59 }
 0x243   :  { %3469 = vmatprep.subr.bf16.mxu0 %v4651_v60  ;;  %v4721_v60 = vld [vmem:[#allocation11 + $0x180] ss:$8 sps:$4 sm:$0xff]  }
 0x244   :  { %3509 = vmatpush1.bf16.msra.mxu1 %v4694_v5 }
 0x245   :  { %3510 = vmatprep.subr.bf16.mxu1 %v4699_v6 }
 0x246   :  { %3470 = vmatpush1.bf16.msra.mxu0 %v4649_v63 }
 0x247   :  { %3471 = vmatprep.subr.bf16.mxu0 %v4654_v0 }
 0x248   :  { %3511 = vmatpush1.bf16.msra.mxu1 %v4697_v20  ;;  %v4724_v20 = vld [vmem:[#allocation12 + $0x78] sm:$0xff]  }
 0x249   :  { %3512 = vmatprep.subr.bf16.mxu1 %v4702_v21  ;;  %v4725_v21 = vld [vmem:[#allocation12 + $0x38] sm:$0xff]  }
 0x24a   :  { %3472 = vmatpush2.bf16.msra.mxu0 %v4652_v3 }
 0x24b   :  { %3473 = vmatprep.subr.bf16.mxu0 %v4657_v4 }
 0x24c   :  { %3513 = vmatpush2.bf16.msra.mxu1 %v4700_v23  ;;  %v4728_v23 = vld [vmem:[#allocation12 + $0x68] sm:$0xff]  }
 0x24d   :  { %3514 = vmatprep.subr.bf16.mxu1 %v4705_v13  ;;  %v4729_v13 = vld [vmem:[#allocation12 + $0x28] sm:$0xff]  }
 0x24e   :  { %3474 = vmatpush2.bf16.msra.mxu0 %v4655_v7 }
 0x24f   :  { %3475 = vmatprep.subr.bf16.mxu0 %v4660_v17 }
 0x250   :  { %3515 = vmatpush2.bf16.msra.mxu1 %v4703_v26 }
 0x251   :  { %3516 = vmatprep.subr.bf16.mxu1 %v4708_v42 }
 0x252   :  { %3476 = vmatpush2.bf16.msra.mxu0 %v4658_v22  ;;  %v4726_v22 = vld [vmem:[#allocation12 + $0x70] sm:$0xff]  }
 0x253   :  { %3477 = vmatprep.subr.bf16.mxu0 %v4663_v53  ;;  %v4727_v53 = vld [vmem:[#allocation12 + $0x30] sm:$0xff]  }
 0x254   :  { %3517 = vmatpush2.bf16.msra.mxu1 %v4706_v8  ;;  %v4730_v8 = vld [vmem:[#allocation12 + $0x60] sm:$0xff]  }
 0x255   :  { %3518 = vmatprep.subr.bf16.mxu1 %v4711_v36  ;;  %v4734_v36 = vld [vmem:[#allocation12 + $0x50] sm:$0xff]  }
 0x256   :  { %3478 = vmatpush2.bf16.msra.mxu0 %v4661_v24  ;;  %v1434_v24 = vrot.slane %v5094_v30, %v1111_v12 }
 0x257   :  { %3479 = vmatprep.subr.bf16.mxu0 %v4666_v25  ;;  %v1438_v25 = vrot.slane %v5094_v30, %v1115_v15 }
 0x258   :  { %3519 = vmatpush2.bf16.msra.mxu1 %v4709_v11  ;;  %v4737_v11 = vld [vmem:[#allocation12 + $0x8] sm:$0xff]  }
 0x259   :  { %3520 = vmatprep.subr.bf16.mxu1 %v4714_v16  ;;  %v3123_v16 = vld [vmem:[%s5127_s6] sm:$0x3] }
 0x25a   :  { %3480 = vmatpush2.bf16.msra.mxu0 %v4664_v27 }
 0x25b   :  { %3481 = vmatprep.subr.bf16.mxu0 %v4669_v28 }
 0x25c   :  { %3521 = vmatpush2.bf16.msra.mxu1 %v4712_v52  ;;  %v3128_v52 = vrot.slane %v3123_v16, %v5024_v10  ;;  %v4188_v10 = vld [vmem:[%s5129_s8] ss:$0 sm:$0xff] }
 0x25d   :  { %3522 = vmatprep.subr.bf16.mxu1 %v4717_v54  ;;  %v3132_v54 = vrot.slane %v3123_v16, %v5030_v14 }
 0x25e   :  { %3482 = vmatpush2.bf16.msra.mxu0 %v4667_v29 }
 0x25f   :  { %3483 = vmatprep.subr.bf16.mxu0 %v4672_v35 }
 0x260   :  { %3523 = vmatpush2.bf16.msra.mxu1 %v4715_v55 }
 0x261   :  { %3524 = vmatprep.subr.bf16.mxu1 %v4720_v56 }
 0x262   :  { %3484 = vmatpush2.bf16.msra.mxu0 %v4670_v31 }
 0x263   :  { %3485 = vmatprep.subr.bf16.mxu0 %v4675_v38 }
 0x264   :  { %3525 = vmatpush2.bf16.msra.mxu1 %v4718_v58 }
 0x265   :  { %3526 = vmatprep.subr.bf16.mxu1 %v4723_v61 }
 0x266   :  { %3486 = vmatpush2.bf16.msra.mxu0 %v4673_v39 }
 0x267   :  { %4205 = vmatprep.subr.bf16.mxu0 %v4724_v20 }
 0x268   :  { %3527 = vmatpush2.bf16.msra.mxu1 %v4721_v60 }
 0x269   :  { %v2839_v19 = vpop.f32.mrf.mxu0 }
 0x26a   :  { %v2840_v43 = vadd.f32 %v2839_v19, %v2799_v57  ;;  %v2880_v44 = vpop.f32.mrf.mxu1 }
 0x26b   :  { %v2841_v45 = vpop.f32.mrf.mxu0 }
 0x26c   :  { %v2881_v46 = vadd.f32 %v2880_v44, %v2840_v43  ;;  %v2842_v47 = vadd.f32 %v2841_v45, %v2801_v18  ;;  %v2882_v48 = vpop.f32.mrf.mxu1  ;;  %v4731_v45 = vld [vmem:[#allocation12 + $0x20] sm:$0xff]  }
 0x26d   :  { %v2843_v49 = vpop.f32.mrf.mxu0 }
 0x26e   :  { %v2883_v50 = vadd.f32 %v2882_v48, %v2842_v47  ;;  %v2884_v34 = vpop.f32.mrf.mxu1  ;;  %4756 = vtanh.f32 %v2881_v46  ;;  %v4732_v48 = vld [vmem:[#allocation12 + $0x58] sm:$0xff]  }
 0x26f   :  { %v2844_v37 = vpop.f32.mrf.mxu0  ;;  %v4733_v49 = vld [vmem:[#allocation12 + $0x18] sm:$0xff]   ;;  %v4736_v34 = vld [vmem:[#allocation12 + $0x48] sm:$0xff]  }
 0x270   :  { %4758 = vtanh.f32 %v2883_v50  ;;  %v2885_v51 = vpop.f32.mrf.mxu1  ;;  %v4735_v50 = vld [vmem:[#allocation12 + $0x10] sm:$0xff]   ;;  %v4738_v37 = vld [vmem:[#allocation12 + $0x40] sm:$0xff]  }
 0x271   :  { %v4739_v51 = vld [vmem:[#allocation12] sm:$0xff]  }
 0x27b   :  { %v4757_v59 = vpop.eup %4756 }
 0x27c   :  { %v3055_v0 = vpack.c.bf16 %v4757_v59, %v4757_v59 }
 0x27d   :  { %v4759_v62 = vpop.eup %4758 }
 0x27e   :  { %v3056_v63 = vpack.c.bf16 %v4759_v62, %v4759_v62 }
 0x280   :  { %3487 = vmatprep.mubr.bf16.mxu0 %v3056_v63 }
 0x281   :  { %3488 = vmatmul.mubr.bf16.vlgmr.msra.gmra.mxu0 %v3055_v0 }
 0x282   :  { %4206 = vmatpush3.bf16.msra.mxu0 %v4725_v21 }
 0x283   :  { %4207 = vmatprep.subr.bf16.mxu0 %v4726_v22 }
 0x286   :  { %4208 = vmatpush3.bf16.msra.mxu0 %v4727_v53 }
 0x287   :  { %4209 = vmatprep.subr.bf16.mxu0 %v4728_v23 }
 0x28a   :  { %4210 = vmatpush3.bf16.msra.mxu0 %v4729_v13 }
 0x28b   :  { %4211 = vmatprep.subr.bf16.mxu0 %v4730_v8 }
 0x28e   :  { %4212 = vmatpush3.bf16.msra.mxu0 %v4731_v45 }
 0x28f   :  { %4213 = vmatprep.subr.bf16.mxu0 %v4732_v48 }
 0x292   :  { %4214 = vmatpush3.bf16.msra.mxu0 %v4733_v49 }
 0x293   :  { %4215 = vmatprep.subr.bf16.mxu0 %v4734_v36 }
 0x296   :  { %4216 = vmatpush3.bf16.msra.mxu0 %v4735_v50 }
 0x297   :  { %4217 = vmatprep.subr.bf16.mxu0 %v4736_v34 }
 0x29a   :  { %4218 = vmatpush3.bf16.msra.mxu0 %v4737_v11 }
 0x29b   :  { %4219 = vmatprep.subr.bf16.mxu0 %v4738_v37 }
 0x29e   :  { %4220 = vmatpush3.bf16.msra.mxu0 %v4739_v51 }
 0x2a9   :  { %v2921_v1 = vpop.f32.mrf.mxu0 }
 0x2aa   :  { %v2962_v2 = vpop.f32.mrf.mxu1  ;;  %v2922_v26 = vadd.f32 %v2921_v1, %v1434_v24 }
 0x2ab   :  { %v2923_v3 = vpop.f32.mrf.mxu0 }
 0x2ac   :  { %v2964_v4 = vpop.f32.mrf.mxu1  ;;  %v2924_v27 = vadd.f32 %v2923_v3, %v1438_v25  ;;  %v2963_v28 = vadd.f32 %v2962_v2, %v2922_v26 }
 0x2ad   :  { %v2925_v5 = vpop.f32.mrf.mxu0 }
 0x2ae   :  { %v2966_v6 = vpop.f32.mrf.mxu1  ;;  %v2965_v35 = vadd.f32 %v2964_v4, %v2924_v27 }
 0x2af   :  { %v2926_v7 = vpop.f32.mrf.mxu0 }
 0x2b0   :  { %v2967_v17 = vpop.f32.mrf.mxu1 }
 0x2e9   :  { %v3003_v29 = vpop.f32.mrf.mxu0 }
 0x2ea   :  { %v3004_v31 = vadd.f32 %v3003_v29, %v2963_v28  ;;  %v3044_v38 = vpop.f32.mrf.mxu1 }
 0x2eb   :  { %v3005_v32 = vpop.f32.mrf.mxu0 }
 0x2ec   :  { %v3045_v33 = vadd.f32 %v3044_v38, %v3004_v31  ;;  %v3006_v39 = vadd.f32 %v3005_v32, %v2965_v35  ;;  %v3046_v40 = vpop.f32.mrf.mxu1 }
 0x2ed   :  { %v3007_v41 = vpop.f32.mrf.mxu0 }
 0x2ee   :  { %v3047_v57 = vadd.f32 %v3046_v40, %v3006_v39  ;;  %v3048_v19 = vpop.f32.mrf.mxu1  ;;  %4760 = vtanh.f32 %v3045_v33 }
 0x2ef   :  { %v3008_v12 = vpop.f32.mrf.mxu0 }
 0x2f0   :  { %4762 = vtanh.f32 %v3047_v57  ;;  %v3049_v9 = vpop.f32.mrf.mxu1 }
 0x2fb   :  { %v4761_v42 = vpop.eup %4760 }
 0x2fc   :  { %v3057_v18 = vpack.c.bf16 %v4761_v42, %v4761_v42 }
 0x2fd   :  { %v4763_v15 = vpop.eup %4762 }
 0x2fe   :  { %v3058_v30 = vpack.c.bf16 %v4763_v15, %v4763_v15 }
 0x300   :  { %3528 = vmatprep.mubr.bf16.mxu1 %v3058_v30 }
 0x301   :  { %3529 = vmatmul.mubr.bf16.vlgmr.msra.gmra.mxu1 %v3057_v18 }
 0x341   :  { %v3489_v43 = vpop.f32.mrf.mxu0 }
 0x342   :  { %v3490_v55 = vadd.f32 %v3489_v43, %v3128_v52 }
 0x343   :  { %v3491_v44 = vpop.f32.mrf.mxu0 }
 0x344   :  { %v3492_v58 = vadd.f32 %v3491_v44, %v3132_v54 }
 0x345   :  { %v3493_v46 = vpop.f32.mrf.mxu0 }
 0x347   :  { %v3494_v47 = vpop.f32.mrf.mxu0 }
 0x3c1   :  { %v3530_v56 = vpop.f32.mrf.mxu1 }
 0x3c2   :  { %v3531_v59 = vadd.f32 %v3530_v56, %v3490_v55 }
 0x3c3   :  { %v3532_v60 = vpop.f32.mrf.mxu1 }
 0x3c4   :  { %v3533_v61 = vadd.f32 %v3532_v60, %v3492_v58  ;;  %4764 = vtanh.f32 %v3531_v59 }
 0x3c5   :  { %v3534_v62 = vpop.f32.mrf.mxu1 }
 0x3c6   :  { %4766 = vtanh.f32 %v3533_v61 }
 0x3c7   :  { %v3535_v63 = vpop.f32.mrf.mxu1 }
 0x3d1   :  { %v4765_v0 = vpop.eup %4764 }
 0x3d2   :  { %v3539_v3 = vpack.c.bf16 %v4765_v0, %v4765_v0 }
 0x3d3   :  { %v4767_v1 = vpop.eup %4766 }
 0x3d4   :  { %v3540_v2 = vpack.c.bf16 %v4767_v1, %v4767_v1 }
 0x3d6   :  { %3708 = vmatprep.mubr.bf16.mxu0 %v3540_v2 }
 0x3d7   :  { %3709 = vmatmul.mubr.bf16.vlgmr.msra.gmra.mxu0 %v3539_v3 }
 0x497   :  { %v4221_v4 = vpop.f32.mrf.mxu0 }
 0x499   :  { %v4222_v14 = vpop.f32.mrf.mxu0 }
 0x49a   :  { %v4223_v5 = vadd.f32 %v4222_v14, %v4221_v4 }
 0x49b   :  { %v4224_v6 = vpop.f32.mrf.mxu0 }
 0x49c   :  { %v3711_v7 = vadd.f32 %v4223_v5, %v4188_v10 }
 0x49d   :  { %v4225_v17 = vpop.f32.mrf.mxu0 }
 0x49e   :  { %4768 = vtanh.f32 %v3711_v7 }
 0x4ab   :  { %v4769_v20 = vpop.eup %4768 }
 0x4ac   :  { %v3717_v21 = vpack.c.bf16 %v4769_v20, %v4769_v20 }
 0x4ae   :  { %v3718_v22 = vunpack.c.l.bf16 %v3717_v21 }
 0x4b0   :  { %3719 = vst [vmem:[#allocation14] sm:$0xff] %v3718_v22 }
 0x4b1   :  { %4901 = shalt.err (!%p4898_p6)
}
 0x4b2   :  { %3729 = dma.vmem_to_hbm [thread:$0]  %s3727_s25, 128, %s5130_s9, [#allocation5]  }
 0x4b3   :  { %4918 = dma.done.wait [#allocation5], 128  }
 0x4b4   :  { %4919 = vsyncadd [#allocation5], 4294967168 }
 0x4b5   :  { %3733 = vsyncpa [#allocation4], 1 }
 0x4b6   :  { %3734 = vsyncpa [#allocation7], 1 }
 0x4b7   :  { %3735 = vsyncpa [#allocation10], 1 }
 0x4b8   :  { %3736 = vsyncpa [#allocation13], 1 }
 0x4b9   :  { %3737 = vsyncpa [#allocation5], 1 }

// kernel: tpu_custom_call.1
= control target key start
LH: loop header
LB: loop body
LE: loop exit
PB: predicated region body
PF: predicated region fallthrough
CT: control target
= control target key end

     0   :  { %14 = vsyncpa [#allocation4], 0  ;;  %s5121_s0 = inlined_call_operand.hbm [shape: bf16[8,256], index: 0, kind: input, shape index: {}]   ;;  %s5122_s1 = inlined_call_operand.hbm [shape: bf16[256,1024], index: 1, kind: input, shape index: {}]   ;;  %s5123_s2 = inlined_call_operand.hbm [shape: f32[1,1024], index: 2, kind: input, shape index: {}]   ;;  %s5124_s3 = inlined_call_operand.hbm [shape: bf16[1024,512], index: 3, kind: input, shape index: {}]   ;;  %s5125_s4 = inlined_call_operand.vmem [shape: f32[1,512], index: 4, kind: input, shape index: {}]   ;;  %s5126_s5 = inlined_call_operand.hbm [shape: bf16[512,256], index: 5, kind: input, shape index: {}]   ;;  %s5127_s6 = inlined_call_operand.vmem [shape: f32[1,256], index: 6, kind: input, shape index: {}]   ;;  %s5128_s7 = inlined_call_operand.hbm [shape: bf16[256,128], index: 7, kind: input, shape index: {}]   ;;  %s5129_s8 = inlined_call_operand.vmem [shape: f32[1,128], index: 8, kind: input, shape index: {}]   ;;  %s5130_s9 = inlined_call_operand.hbm [shape: f32[8,128], index: 9, kind: output, shape index: {}]  }
   0x1   :  { %15 = vsyncpa [#allocation7], 0 }
   0x2   :  { %16 = vsyncpa [#allocation10], 0 }
   0x3   :  { %17 = vsyncpa [#allocation13], 0 }
   0x4   :  { %18 = vsyncpa [#allocation5], 0  ;;  %s4920_s30 = smov [#allocation6]  }
   0x5   :  { %s34_s10 = sshll.u32 %s4920_s30, 4  ;;  %s35_s10 = int_to_ptr.vmem [resolvable:$true] %s34_s10 }
   0x6   :  { %s4778_s11 = scalar_lea.vmem %s35_s10, 16384  ;;  %p4783_p1 = scmp.lt.s32.totalorder %s35_s10, %s35_s10 }
   0x7   :  { %p4779_p0 = scmp.ne.s32.totalorder %s35_s10, %s4778_s11  ;;  %p4784_p2 = scmp.lt.s32.totalorder %s4778_s11, %s4778_s11 }
   0x9   :  { %p4785_p3 = por %p4784_p2, %p4783_p1 }
   0xb   :  { %p4786_p4 = pnand %p4785_p3, %p4779_p0 }
   0xd   :  { %4789 = shalt.err (!%p4786_p4)
}
   0xe   :  { %s4921_s12 = smov 512   ;;  %s4922_s13 = smov 32  }
   0xf   :  { %40 = dma.hbm_to_vmem [thread:$0]  %s5122_s1, 16384, %s35_s10, [#allocation7], %s4921_s12, %s4921_s12, %s4922_s13  }
  0x10   :  { %s4923_s16 = smov [#allocation9]  }
  0x11   :  { %s56_s17 = sshll.u32 %s4923_s16, 4  ;;  %s57_s17 = int_to_ptr.vmem [resolvable:$true] %s56_s17 }
  0x12   :  { %s4798_s18 = scalar_lea.vmem %s57_s17, 32768  ;;  %p4803_p6 = scmp.lt.s32.totalorder %s57_s17, %s57_s17 }
  0x13   :  { %p4799_p5 = scmp.ne.s32.totalorder %s57_s17, %s4798_s18  ;;  %p4804_p7 = scmp.lt.s32.totalorder %s4798_s18, %s4798_s18 }
  0x15   :  { %p4805_p8 = por %p4804_p7, %p4803_p6 }
  0x17   :  { %p4806_p9 = pnand %p4805_p8, %p4799_p5 }
  0x19   :  { %4809 = shalt.err (!%p4806_p9)
}
  0x1a   :  { %s4924_s19 = smov 256   ;;  %s4925_s20 = smov 16  }
  0x1b   :  { %62 = dma.hbm_to_vmem [thread:$0]  %s5124_s3, 32768, %s57_s17, [#allocation10], %s4924_s19, %s4924_s19, %s4925_s20  }
  0x1c   :  { %s4926_s23 = smov [#allocation3]   ;;  %s4927_s25 = smov [#allocation8]  }
  0x1d   :  { %s25_s24 = sshll.u32 %s4926_s23, 4  ;;  %s47_s1 = sshll.u32 %s4927_s25, 4  ;;  %s26_s24 = int_to_ptr.vmem [resolvable:$true] %s25_s24  ;;  %s48_s1 = int_to_ptr.vmem [resolvable:$true] %s47_s1 }
  0x1e   :  { %s4818_s26 = scalar_lea.vmem %s26_s24, 128  ;;  %p4823_p11 = scmp.lt.s32.totalorder %s26_s24, %s26_s24 }
  0x1f   :  { %p4819_p10 = scmp.ne.s32.totalorder %s26_s24, %s4818_s26  ;;  %p4824_p12 = scmp.lt.s32.totalorder %s4818_s26, %s4818_s26 }
  0x21   :  { %p4825_p13 = por %p4824_p12, %p4823_p11 }
  0x23   :  { %p4826_p0 = pnand %p4825_p13, %p4819_p10 }
  0x25   :  { %4829 = shalt.err (!%p4826_p0)
}
  0x26   :  { %28 = dma.hbm_to_vmem [thread:$0]  %s5121_s0, 128, %s26_s24, [#allocation4]  }
  0x27   :  { %s4838_s29 = scalar_lea.vmem %s48_s1, 128  ;;  %p4843_p2 = scmp.lt.s32.totalorder %s48_s1, %s48_s1 }
  0x28   :  { %p4839_p1 = scmp.ne.s32.totalorder %s48_s1, %s4838_s29  ;;  %p4844_p3 = scmp.lt.s32.totalorder %s4838_s29, %s4838_s29 }
  0x2a   :  { %p4845_p4 = por %p4844_p3, %p4843_p2 }
  0x2c   :  { %p4846_p5 = pnand %p4845_p4, %p4839_p1 }
  0x2e   :  { %4849 = shalt.err (!%p4846_p5)
}
  0x2f   :  { %50 = dma.hbm_to_vmem [thread:$0]  %s5123_s2, 128, %s48_s1, [#allocation7]  }
  0x30   :  { %s4928_s10 = smov [#allocation11]  }
  0x31   :  { %s70_s11 = sshll.u32 %s4928_s10, 4  ;;  %s71_s11 = int_to_ptr.vmem [resolvable:$true] %s70_s11 }
  0x32   :  { %s4858_s12 = scalar_lea.vmem %s71_s11, 8192  ;;  %p4863_p7 = scmp.lt.s32.totalorder %s71_s11, %s71_s11 }
  0x33   :  { %p4859_p6 = scmp.ne.s32.totalorder %s71_s11, %s4858_s12  ;;  %p4864_p8 = scmp.lt.s32.totalorder %s4858_s12, %s4858_s12 }
  0x35   :  { %p4865_p9 = por %p4864_p8, %p4863_p7 }
  0x37   :  { %p4866_p10 = pnand %p4865_p9, %p4859_p6 }
  0x39   :  { %4869 = shalt.err (!%p4866_p10)
}
  0x3a   :  { %s4929_s0 = smov 128   ;;  %s4930_s13 = smov 8  }
  0x3b   :  { %76 = dma.hbm_to_vmem [thread:$0]  %s5126_s5, 8192, %s71_s11, [#allocation10], %s4929_s0, %s4929_s0, %s4930_s13  }
  0x3c   :  { %s4931_s16 = smov [#allocation12]  }
  0x3d   :  { %s84_s17 = sshll.u32 %s4931_s16, 4  ;;  %s85_s17 = int_to_ptr.vmem [resolvable:$true] %s84_s17 }
  0x3e   :  { %s4878_s2 = scalar_lea.vmem %s85_s17, 2048  ;;  %p4883_p12 = scmp.lt.s32.totalorder %s85_s17, %s85_s17 }
  0x3f   :  { %p4879_p11 = scmp.ne.s32.totalorder %s85_s17, %s4878_s2  ;;  %p4884_p13 = scmp.lt.s32.totalorder %s4878_s2, %s4878_s2 }
  0x41   :  { %p4885_p0 = por %p4884_p13, %p4883_p12 }
  0x43   :  { %p4886_p1 = pnand %p4885_p0, %p4879_p11 }
  0x45   :  { %4889 = shalt.err (!%p4886_p1)
}
  0x46   :  { %s4932_s18 = smov 64   ;;  %s4933_s19 = smov 4  }
  0x47   :  { %90 = dma.hbm_to_vmem [thread:$0]  %s5128_s7, 2048, %s85_s17, [#allocation13], %s4932_s18, %s4932_s18, %s4933_s19  }
  0x48   :  { %4910 = dma.done.wait [#allocation4], 128  }
  0x49   :  { %4911 = vsyncadd [#allocation4], 4294967168 }
  0x4a   :  { %4912 = dma.done.wait [#allocation7], 16512  }
  0x4b   :  { %4913 = vsyncadd [#allocation7], 4294950784 }
  0x4c   :  { %4914 = dma.done.wait [#allocation10], 40960  }
  0x4d   :  { %4915 = vsyncadd [#allocation10], 4294926336 }
  0x4e   :  { %4916 = dma.done.wait [#allocation13], 2048  }
  0x4f   :  { %4917 = vsyncadd [#allocation13], 4294965248  ;;  %v189_v0 = vld [vmem:[#allocation6 + $0x1c0] sm:$0xff]  ;;  %v190_v2 = vld [vmem:[#allocation6 + $0x1c8] sm:$0xff]  ;;  %s4934_s24 = smov [#allocation14]  }
  0x50   :  { %v193_v1 = vld [vmem:[#allocation6 + $0x1e0] sm:$0xff]  ;;  %v194_v4 = vld [vmem:[#allocation6 + $0x1e8] sm:$0xff]  ;;  %v5003_v53 = vld [vmem:[#allocation3] sm:$0xff]  ;;  %s3726_s25 = sshll.u32 %s4934_s24, 4  ;;  %s3727_s25 = int_to_ptr.vmem [resolvable:$true] %s3726_s25 }
  0x51   :  { %v3797_v3 = vcombine.high %v189_v0, %v193_v1  ;;  %v3796_v5 = vcombine.low %v189_v0, %v193_v1  ;;  %v181_v6 = vld [vmem:[#allocation6 + $0x180] sm:$0xff]  ;;  %v3799_v8 = vcombine.high %v190_v2, %v194_v4  ;;  %v3798_v9 = vcombine.low %v190_v2, %v194_v4  ;;  %v182_v11 = vld [vmem:[#allocation6 + $0x188] sm:$0xff]  ;;  %s4890_s1 = scalar_lea.vmem %s3727_s25, 128  ;;  %p4895_p3 = scmp.lt.s32.totalorder %s3727_s25, %s3727_s25 }
  0x52   :  { %v185_v7 = vld [vmem:[#allocation6 + $0x1a0] sm:$0xff]  ;;  %v186_v12 = vld [vmem:[#allocation6 + $0x1a8] sm:$0xff]  ;;  %v5007_v57 = vcombine.high %v5003_v53, %v5003_v53  ;;  %p4891_p2 = scmp.ne.s32.totalorder %s3727_s25, %s4890_s1  ;;  %p4896_p4 = scmp.lt.s32.totalorder %s4890_s1, %s4890_s1 }
  0x53   :  { %v3789_v10 = vcombine.high %v181_v6, %v185_v7  ;;  %v173_v13 = vld [vmem:[#allocation6 + $0x140] sm:$0xff]  ;;  %908 = vmatprep.subr.bf16.mxu0 %v3797_v3  ;;  %v3791_v14 = vcombine.high %v182_v11, %v186_v12  ;;  %v174_v16 = vld [vmem:[#allocation6 + $0x148] sm:$0xff]  ;;  %949 = vmatprep.subr.bf16.mxu1 %v3799_v8  ;;  %v3788_v18 = vcombine.low %v181_v6, %v185_v7 }
  0x54   :  { %v177_v15 = vld [vmem:[#allocation6 + $0x160] sm:$0xff]  ;;  %v178_v17 = vld [vmem:[#allocation6 + $0x168] sm:$0xff]  ;;  %909 = vmatpush1.bf16.msra.mxu0 %v3796_v5  ;;  %950 = vmatpush1.bf16.msra.mxu1 %v3798_v9  ;;  %v3790_v19 = vcombine.low %v182_v11, %v186_v12  ;;  %p4897_p5 = por %p4896_p4, %p4895_p3 }
  0x55   :  { %910 = vmatprep.subr.bf16.mxu0 %v3789_v10  ;;  %v3781_v20 = vcombine.high %v173_v13, %v177_v15  ;;  %951 = vmatprep.subr.bf16.mxu1 %v3791_v14  ;;  %v3783_v21 = vcombine.high %v174_v16, %v178_v17  ;;  %v165_v22 = vld [vmem:[#allocation6 + $0x100] sm:$0xff]  ;;  %v166_v24 = vld [vmem:[#allocation6 + $0x108] sm:$0xff]  ;;  %v3780_v26 = vcombine.low %v173_v13, %v177_v15 }
  0x56   :  { %v169_v23 = vld [vmem:[#allocation6 + $0x120] sm:$0xff]  ;;  %v170_v25 = vld [vmem:[#allocation6 + $0x128] sm:$0xff]  ;;  %v3782_v27 = vcombine.low %v174_v16, %v178_v17  ;;  %940 = vmatprep.mubr.bf16.mxu0 %v5007_v57  ;;  %981 = vmatprep.mubr.bf16.mxu1 %v5007_v57  ;;  %p4898_p6 = pnand %p4897_p5, %p4891_p2 }
  0x57   :  { %v3773_v28 = vcombine.high %v165_v22, %v169_v23  ;;  %v3775_v29 = vcombine.high %v166_v24, %v170_v25  ;;  %v157_v30 = vld [vmem:[#allocation6 + $0xc0] sm:$0xff]  ;;  %v158_v32 = vld [vmem:[#allocation6 + $0xc8] sm:$0xff]  ;;  %v3772_v34 = vcombine.low %v165_v22, %v169_v23  ;;  %v3774_v35 = vcombine.low %v166_v24, %v170_v25 }
  0x58   :  { %911 = vmatpush1.bf16.msra.mxu0 %v3788_v18  ;;  %952 = vmatpush1.bf16.msra.mxu1 %v3790_v19  ;;  %v161_v31 = vld [vmem:[#allocation6 + $0xe0] sm:$0xff]  ;;  %v162_v33 = vld [vmem:[#allocation6 + $0xe8] sm:$0xff] }
  0x59   :  { %912 = vmatprep.subr.bf16.mxu0 %v3781_v20  ;;  %953 = vmatprep.subr.bf16.mxu1 %v3783_v21  ;;  %v3765_v36 = vcombine.high %v157_v30, %v161_v31  ;;  %v3767_v37 = vcombine.high %v158_v32, %v162_v33  ;;  %v149_v38 = vld [vmem:[#allocation6 + $0x80] sm:$0xff]  ;;  %v150_v40 = vld [vmem:[#allocation6 + $0x88] sm:$0xff]  ;;  %v3764_v42 = vcombine.low %v157_v30, %v161_v31 }
  0x5a   :  { %v153_v39 = vld [vmem:[#allocation6 + $0xa0] sm:$0xff]  ;;  %v154_v41 = vld [vmem:[#allocation6 + $0xa8] sm:$0xff]  ;;  %v3766_v43 = vcombine.low %v158_v32, %v162_v33 }
  0x5b   :  { %v3757_v44 = vcombine.high %v149_v38, %v153_v39  ;;  %v3759_v45 = vcombine.high %v150_v40, %v154_v41  ;;  %v141_v46 = vld [vmem:[#allocation6 + $0x40] sm:$0xff]  ;;  %v142_v48 = vld [vmem:[#allocation6 + $0x48] sm:$0xff]  ;;  %v3756_v50 = vcombine.low %v149_v38, %v153_v39  ;;  %v3758_v51 = vcombine.low %v150_v40, %v154_v41 }
  0x5c   :  { %913 = vmatpush1.bf16.msra.mxu0 %v3780_v26  ;;  %954 = vmatpush1.bf16.msra.mxu1 %v3782_v27  ;;  %v145_v47 = vld [vmem:[#allocation6 + $0x60] sm:$0xff]  ;;  %v146_v49 = vld [vmem:[#allocation6 + $0x68] sm:$0xff] }
  0x5d   :  { %914 = vmatprep.subr.bf16.mxu0 %v3773_v28  ;;  %955 = vmatprep.subr.bf16.mxu1 %v3775_v29  ;;  %v3749_v52 = vcombine.high %v141_v46, %v145_v47  ;;  %v3751_v54 = vcombine.high %v142_v48, %v146_v49  ;;  %v133_v55 = vld [vmem:[#allocation6] sm:$0xff]  ;;  %v134_v58 = vld [vmem:[#allocation6 + $0x8] sm:$0xff]  ;;  %v3748_v60 = vcombine.low %v141_v46, %v145_v47 }
  0x5e   :  { %v137_v56 = vld [vmem:[#allocation6 + $0x20] sm:$0xff]  ;;  %v138_v59 = vld [vmem:[#allocation6 + $0x28] sm:$0xff]  ;;  %v3750_v61 = vcombine.low %v142_v48, %v146_v49 }
  0x5f   :  { %v3741_v62 = vcombine.high %v133_v55, %v137_v56  ;;  %v3743_v63 = vcombine.high %v134_v58, %v138_v59  ;;  %v253_v0 = vld [vmem:[#allocation6 + $0x3c0] sm:$0xff]  ;;  %v254_v2 = vld [vmem:[#allocation6 + $0x3c8] sm:$0xff]  ;;  %v3740_v4 = vcombine.low %v133_v55, %v137_v56  ;;  %v3742_v5 = vcombine.low %v134_v58, %v138_v59 }
  0x60   :  { %915 = vmatpush1.bf16.msra.mxu0 %v3772_v34  ;;  %956 = vmatpush1.bf16.msra.mxu1 %v3774_v35  ;;  %v257_v1 = vld [vmem:[#allocation6 + $0x3e0] sm:$0xff]  ;;  %v258_v3 = vld [vmem:[#allocation6 + $0x3e8] sm:$0xff] }
  0x61   :  { %916 = vmatprep.subr.bf16.mxu0 %v3765_v36  ;;  %957 = vmatprep.subr.bf16.mxu1 %v3767_v37  ;;  %v3861_v6 = vcombine.high %v253_v0, %v257_v1  ;;  %v3863_v7 = vcombine.high %v254_v2, %v258_v3  ;;  %v245_v8 = vld [vmem:[#allocation6 + $0x380] sm:$0xff]  ;;  %v246_v10 = vld [vmem:[#allocation6 + $0x388] sm:$0xff]  ;;  %v3860_v12 = vcombine.low %v253_v0, %v257_v1  ;;  %v191_v1 = vld [vmem:[#allocation6 + $0x1d0] sm:$0xff] }
  0x62   :  { %v249_v9 = vld [vmem:[#allocation6 + $0x3a0] sm:$0xff]  ;;  %v250_v11 = vld [vmem:[#allocation6 + $0x3a8] sm:$0xff]  ;;  %v3862_v13 = vcombine.low %v254_v2, %v258_v3  ;;  %v195_v3 = vld [vmem:[#allocation6 + $0x1f0] sm:$0xff] }
  0x63   :  { %v3853_v14 = vcombine.high %v245_v8, %v249_v9  ;;  %v3855_v15 = vcombine.high %v246_v10, %v250_v11  ;;  %v237_v16 = vld [vmem:[#allocation6 + $0x340] sm:$0xff]  ;;  %v238_v18 = vld [vmem:[#allocation6 + $0x348] sm:$0xff]  ;;  %v3852_v20 = vcombine.low %v245_v8, %v249_v9  ;;  %v3854_v21 = vcombine.low %v246_v10, %v250_v11  ;;  %v183_v9 = vld [vmem:[#allocation6 + $0x190] sm:$0xff] }
  0x64   :  { %917 = vmatpush1.bf16.msra.mxu0 %v3764_v42  ;;  %958 = vmatpush1.bf16.msra.mxu1 %v3766_v43  ;;  %v241_v17 = vld [vmem:[#allocation6 + $0x360] sm:$0xff]  ;;  %v242_v19 = vld [vmem:[#allocation6 + $0x368] sm:$0xff]  ;;  %v3801_v8 = vcombine.high %v191_v1, %v195_v3  ;;  %v187_v11 = vld [vmem:[#allocation6 + $0x1b0] sm:$0xff] }
  0x65   :  { %918 = vmatprep.subr.bf16.mxu0 %v3757_v44  ;;  %959 = vmatprep.subr.bf16.mxu1 %v3759_v45  ;;  %v3845_v22 = vcombine.high %v237_v16, %v241_v17  ;;  %v3847_v23 = vcombine.high %v238_v18, %v242_v19  ;;  %v229_v24 = vld [vmem:[#allocation6 + $0x300] sm:$0xff]  ;;  %v230_v26 = vld [vmem:[#allocation6 + $0x308] sm:$0xff]  ;;  %v3844_v28 = vcombine.low %v237_v16, %v241_v17 }
  0x66   :  { %v233_v25 = vld [vmem:[#allocation6 + $0x320] sm:$0xff]  ;;  %v234_v27 = vld [vmem:[#allocation6 + $0x328] sm:$0xff]  ;;  %v3846_v29 = vcombine.low %v238_v18, %v242_v19  ;;  %v3793_v17 = vcombine.high %v183_v9, %v187_v11  ;;  %v175_v18 = vld [vmem:[#allocation6 + $0x150] sm:$0xff] }
  0x67   :  { %v3837_v30 = vcombine.high %v229_v24, %v233_v25  ;;  %v3839_v31 = vcombine.high %v230_v26, %v234_v27  ;;  %v221_v32 = vld [vmem:[#allocation6 + $0x2c0] sm:$0xff]  ;;  %v222_v34 = vld [vmem:[#allocation6 + $0x2c8] sm:$0xff]  ;;  %v3836_v36 = vcombine.low %v229_v24, %v233_v25  ;;  %v3838_v37 = vcombine.low %v230_v26, %v234_v27  ;;  %v167_v25 = vld [vmem:[#allocation6 + $0x110] sm:$0xff] }
  0x68   :  { %919 = vmatpush1.bf16.msra.mxu0 %v3756_v50  ;;  %960 = vmatpush1.bf16.msra.mxu1 %v3758_v51  ;;  %v225_v33 = vld [vmem:[#allocation6 + $0x2e0] sm:$0xff]  ;;  %v226_v35 = vld [vmem:[#allocation6 + $0x2e8] sm:$0xff]  ;;  %v171_v27 = vld [vmem:[#allocation6 + $0x130] sm:$0xff] }
  0x69   :  { %920 = vmatprep.subr.bf16.mxu0 %v3749_v52  ;;  %961 = vmatprep.subr.bf16.mxu1 %v3751_v54  ;;  %v3829_v38 = vcombine.high %v221_v32, %v225_v33  ;;  %v213_v39 = vld [vmem:[#allocation6 + $0x280] sm:$0xff]  ;;  %v3831_v40 = vcombine.high %v222_v34, %v226_v35  ;;  %v214_v42 = vld [vmem:[#allocation6 + $0x288] sm:$0xff]  ;;  %v3828_v44 = vcombine.low %v221_v32, %v225_v33  ;;  %v163_v32 = vld [vmem:[#allocation6 + $0xf0] sm:$0xff] }
  0x6a   :  { %v217_v41 = vld [vmem:[#allocation6 + $0x2a0] sm:$0xff]  ;;  %v218_v43 = vld [vmem:[#allocation6 + $0x2a8] sm:$0xff]  ;;  %v3830_v45 = vcombine.low %v222_v34, %v226_v35  ;;  %v3777_v34 = vcombine.high %v167_v25, %v171_v27  ;;  %v160_v35 = vld [vmem:[#allocation6 + $0xd8] sm:$0xff] }
  0x6b   :  { %v3821_v46 = vcombine.high %v213_v39, %v217_v41  ;;  %v205_v47 = vld [vmem:[#allocation6 + $0x240] sm:$0xff]  ;;  %v3823_v48 = vcombine.high %v214_v42, %v218_v43  ;;  %v206_v50 = vld [vmem:[#allocation6 + $0x248] sm:$0xff]  ;;  %v3820_v52 = vcombine.low %v213_v39, %v217_v41  ;;  %v3822_v54 = vcombine.low %v214_v42, %v218_v43  ;;  %v151_v39 = vld [vmem:[#allocation6 + $0x90] sm:$0xff] }
  0x6c   :  { %921 = vmatpush1.bf16.msra.mxu0 %v3748_v60  ;;  %962 = vmatpush1.bf16.msra.mxu1 %v3750_v61  ;;  %v209_v49 = vld [vmem:[#allocation6 + $0x260] sm:$0xff]  ;;  %v210_v51 = vld [vmem:[#allocation6 + $0x268] sm:$0xff]  ;;  %v152_v42 = vld [vmem:[#allocation6 + $0x98] sm:$0xff] }
  0x6d   :  { %922 = vmatprep.subr.bf16.mxu0 %v3741_v62  ;;  %963 = vmatprep.subr.bf16.mxu1 %v3743_v63  ;;  %v3813_v55 = vcombine.high %v205_v47, %v209_v49  ;;  %v197_v56 = vld [vmem:[#allocation6 + $0x200] sm:$0xff]  ;;  %v3815_v58 = vcombine.high %v206_v50, %v210_v51  ;;  %v198_v60 = vld [vmem:[#allocation6 + $0x208] sm:$0xff]  ;;  %v3812_v62 = vcombine.low %v205_v47, %v209_v49  ;;  %v156_v43 = vld [vmem:[#allocation6 + $0xb8] sm:$0xff] }
  0x6e   :  { %v201_v59 = vld [vmem:[#allocation6 + $0x220] sm:$0xff]  ;;  %v202_v61 = vld [vmem:[#allocation6 + $0x228] sm:$0xff]  ;;  %v3814_v63 = vcombine.low %v206_v50, %v210_v51  ;;  %v147_v47 = vld [vmem:[#allocation6 + $0x70] sm:$0xff] }
  0x6f   :  { %v3805_v0 = vcombine.high %v197_v56, %v201_v59  ;;  %v3807_v2 = vcombine.high %v198_v60, %v202_v61  ;;  %v144_v50 = vld [vmem:[#allocation6 + $0x58] sm:$0xff] }
  0x70   :  { %923 = vmatpush1.bf16.msra.mxu0 %v3740_v4  ;;  %964 = vmatpush1.bf16.msra.mxu1 %v3742_v5  ;;  %v192_v4 = vld [vmem:[#allocation6 + $0x1d8] sm:$0xff] }
  0x71   :  { %924 = vmatprep.subr.bf16.mxu0 %v3861_v6  ;;  %965 = vmatprep.subr.bf16.mxu1 %v3863_v7  ;;  %v196_v5 = vld [vmem:[#allocation6 + $0x1f8] sm:$0xff]  ;;  %v3804_v6 = vcombine.low %v197_v56, %v201_v59  ;;  %v3806_v7 = vcombine.low %v198_v60, %v202_v61  ;;  %v139_v56 = vld [vmem:[#allocation6 + $0x30] sm:$0xff] }
  0x72   :  { %v3803_v10 = vcombine.high %v192_v4, %v196_v5  ;;  %v3802_v16 = vcombine.low %v192_v4, %v196_v5  ;;  %v148_v51 = vld [vmem:[#allocation6 + $0x78] sm:$0xff] }
  0x73   :  { %v136_v60 = vld [vmem:[#allocation6 + $0x18] sm:$0xff] }
  0x74   :  { %925 = vmatpush2.bf16.msra.mxu0 %v3860_v12  ;;  %966 = vmatpush2.bf16.msra.mxu1 %v3862_v13  ;;  %v184_v12 = vld [vmem:[#allocation6 + $0x198] sm:$0xff]  ;;  %v5013_v13 = vcombine.low %v5003_v53, %v5003_v53  ;;  %v3792_v53 = vcombine.low %v183_v9, %v187_v11  ;;  %v251_v9 = vld [vmem:[#allocation6 + $0x3b0] sm:$0xff] }
  0x75   :  { %926 = vmatprep.subr.bf16.mxu0 %v3853_v14  ;;  %967 = vmatprep.subr.bf16.mxu1 %v3855_v15  ;;  %v188_v14 = vld [vmem:[#allocation6 + $0x1b8] sm:$0xff]  ;;  %v3800_v15 = vcombine.low %v191_v1, %v195_v3  ;;  %v259_v1 = vld [vmem:[#allocation6 + $0x3f0] sm:$0xff] }
  0x76   :  { %v3795_v19 = vcombine.high %v184_v12, %v188_v14  ;;  %v140_v61 = vld [vmem:[#allocation6 + $0x38] sm:$0xff] }
  0x77   :  { %v256_v4 = vld [vmem:[#allocation6 + $0x3d8] sm:$0xff] }
  0x78   :  { %927 = vmatpush2.bf16.msra.mxu0 %v3852_v20  ;;  %968 = vmatpush2.bf16.msra.mxu1 %v3854_v21  ;;  %v179_v20 = vld [vmem:[#allocation6 + $0x170] sm:$0xff]  ;;  %v176_v21 = vld [vmem:[#allocation6 + $0x158] sm:$0xff] }
  0x79   :  { %928 = vmatprep.subr.bf16.mxu0 %v3845_v22  ;;  %969 = vmatprep.subr.bf16.mxu1 %v3847_v23  ;;  %v180_v22 = vld [vmem:[#allocation6 + $0x178] sm:$0xff]  ;;  %v3794_v23 = vcombine.low %v184_v12, %v188_v14  ;;  %v3785_v24 = vcombine.high %v175_v18, %v179_v20 }
  0x7a   :  { %v3787_v26 = vcombine.high %v176_v21, %v180_v22  ;;  %v3786_v33 = vcombine.low %v176_v21, %v180_v22  ;;  %v260_v5 = vld [vmem:[#allocation6 + $0x3f8] sm:$0xff] }
  0x7b   :  { %v248_v12 = vld [vmem:[#allocation6 + $0x398] sm:$0xff] }
  0x7c   :  { %929 = vmatpush2.bf16.msra.mxu0 %v3844_v28  ;;  %970 = vmatpush2.bf16.msra.mxu1 %v3846_v29  ;;  %v168_v28 = vld [vmem:[#allocation6 + $0x118] sm:$0xff] }
  0x7d   :  { %930 = vmatprep.subr.bf16.mxu0 %v3837_v30  ;;  %971 = vmatprep.subr.bf16.mxu1 %v3839_v31  ;;  %v172_v29 = vld [vmem:[#allocation6 + $0x138] sm:$0xff]  ;;  %v3784_v30 = vcombine.low %v175_v18, %v179_v20  ;;  %v159_v31 = vld [vmem:[#allocation6 + $0xd0] sm:$0xff] }
  0x7e   :  { %v3778_v41 = vcombine.low %v168_v28, %v172_v29  ;;  %v252_v14 = vld [vmem:[#allocation6 + $0x3b8] sm:$0xff]  ;;  %v243_v18 = vld [vmem:[#allocation6 + $0x370] sm:$0xff] }
  0x7f   :  { %v240_v21 = vld [vmem:[#allocation6 + $0x358] sm:$0xff] }
  0x80   :  { %931 = vmatpush2.bf16.msra.mxu0 %v3836_v36  ;;  %972 = vmatpush2.bf16.msra.mxu1 %v3838_v37  ;;  %v164_v36 = vld [vmem:[#allocation6 + $0xf8] sm:$0xff]  ;;  %v3779_v37 = vcombine.high %v168_v28, %v172_v29 }
  0x81   :  { %932 = vmatprep.subr.bf16.mxu0 %v3829_v38  ;;  %973 = vmatprep.subr.bf16.mxu1 %v3831_v40  ;;  %v3776_v38 = vcombine.low %v167_v25, %v171_v27  ;;  %v155_v40 = vld [vmem:[#allocation6 + $0xb0] sm:$0xff]  ;;  %v244_v22 = vld [vmem:[#allocation6 + $0x378] sm:$0xff] }
  0x82   :  { %v3761_v49 = vcombine.high %v151_v39, %v155_v40  ;;  %v235_v25 = vld [vmem:[#allocation6 + $0x330] sm:$0xff]  ;;  %v232_v28 = vld [vmem:[#allocation6 + $0x318] sm:$0xff] }
  0x83   :  { %v236_v29 = vld [vmem:[#allocation6 + $0x338] sm:$0xff] }
  0x84   :  { %933 = vmatpush2.bf16.msra.mxu0 %v3828_v44  ;;  %974 = vmatpush2.bf16.msra.mxu1 %v3830_v45  ;;  %v3771_v44 = vcombine.high %v160_v35, %v164_v36  ;;  %v3768_v45 = vcombine.low %v159_v31, %v163_v32 }
  0x85   :  { %934 = vmatprep.subr.bf16.mxu0 %v3821_v46  ;;  %975 = vmatprep.subr.bf16.mxu1 %v3823_v48  ;;  %v143_v46 = vld [vmem:[#allocation6 + $0x50] sm:$0xff]  ;;  %v3770_v48 = vcombine.low %v160_v35, %v164_v36  ;;  %v224_v36 = vld [vmem:[#allocation6 + $0x2d8] sm:$0xff] }
  0x86   :  { %v3753_v59 = vcombine.high %v143_v46, %v147_v47 }
  0x88   :  { %935 = vmatpush2.bf16.msra.mxu0 %v3820_v52  ;;  %976 = vmatpush2.bf16.msra.mxu1 %v3822_v54  ;;  %v3763_v52 = vcombine.high %v152_v42, %v156_v43  ;;  %v3760_v54 = vcombine.low %v151_v39, %v155_v40  ;;  %v215_v40 = vld [vmem:[#allocation6 + $0x290] sm:$0xff] }
  0x89   :  { %936 = vmatprep.subr.bf16.mxu0 %v3813_v55  ;;  %977 = vmatprep.subr.bf16.mxu1 %v3815_v58  ;;  %v135_v55 = vld [vmem:[#allocation6 + $0x10] sm:$0xff]  ;;  %v3762_v58 = vcombine.low %v152_v42, %v156_v43  ;;  %v216_v43 = vld [vmem:[#allocation6 + $0x298] sm:$0xff] }
  0x8a   :  { %v3745_v3 = vcombine.high %v135_v55, %v139_v56 }
  0x8c   :  { %937 = vmatpush2.bf16.msra.mxu0 %v3812_v62  ;;  %978 = vmatpush2.bf16.msra.mxu1 %v3814_v63  ;;  %v3755_v62 = vcombine.high %v144_v50, %v148_v51  ;;  %v3752_v63 = vcombine.low %v143_v46, %v147_v47  ;;  %v207_v47 = vld [vmem:[#allocation6 + $0x250] sm:$0xff] }
  0x8d   :  { %938 = vmatprep.subr.bf16.mxu0 %v3805_v0  ;;  %979 = vmatprep.subr.bf16.mxu1 %v3807_v2  ;;  %v255_v0 = vld [vmem:[#allocation6 + $0x3d0] sm:$0xff]  ;;  %v3754_v2 = vcombine.low %v144_v50, %v148_v51  ;;  %v208_v51 = vld [vmem:[#allocation6 + $0x258] sm:$0xff] }
  0x8e   :  { %v3865_v11 = vcombine.high %v255_v0, %v259_v1 }
  0x90   :  { %939 = vmatpush2.bf16.msra.mxu0 %v3804_v6  ;;  %980 = vmatpush2.bf16.msra.mxu1 %v3806_v7  ;;  %v3747_v6 = vcombine.high %v136_v60, %v140_v61  ;;  %v3744_v7 = vcombine.low %v135_v55, %v139_v56  ;;  %v199_v56 = vld [vmem:[#allocation6 + $0x210] sm:$0xff] }
  0x91   :  { %990 = vmatprep.subr.bf16.mxu0 %v3801_v8  ;;  %1031 = vmatprep.subr.bf16.mxu1 %v3803_v10  ;;  %v247_v8 = vld [vmem:[#allocation6 + $0x390] sm:$0xff]  ;;  %v3746_v10 = vcombine.low %v136_v60, %v140_v61  ;;  %v200_v61 = vld [vmem:[#allocation6 + $0x218] sm:$0xff] }
  0x92   :  { %v3857_v20 = vcombine.high %v247_v8, %v251_v9 }
  0x93   :  { %941 = vmatmul.mubr.bf16.vlgmr.msra.gmra.mxu0 %v5013_v13  ;;  %982 = vmatmul.mubr.bf16.vlgmr.msra.gmra.mxu1 %v5013_v13 }
  0x94   :  { %991 = vmatpush1.bf16.msra.mxu0 %v3800_v15  ;;  %1032 = vmatpush1.bf16.msra.mxu1 %v3802_v16  ;;  %v3867_v15 = vcombine.high %v256_v4, %v260_v5  ;;  %v3864_v16 = vcombine.low %v255_v0, %v259_v1 }
  0x95   :  { %992 = vmatprep.subr.bf16.mxu0 %v3793_v17  ;;  %1033 = vmatprep.subr.bf16.mxu1 %v3795_v19  ;;  %v239_v17 = vld [vmem:[#allocation6 + $0x350] sm:$0xff]  ;;  %v3866_v19 = vcombine.low %v256_v4, %v260_v5  ;;  %v4246_v4 = vld [vmem:[#allocation9 + $0xe4] ss:$16 sps:$4 sm:$0xff]  }
  0x96   :  { %1022 = vmatprep.mubr.bf16.mxu0 %v5007_v57  ;;  %1063 = vmatprep.mubr.bf16.mxu1 %v5007_v57  ;;  %v3769_v57 = vcombine.high %v159_v31, %v163_v32  ;;  %v3849_v27 = vcombine.high %v239_v17, %v243_v18  ;;  %v3848_v31 = vcombine.low %v239_v17, %v243_v18  ;;  %v223_v32 = vld [vmem:[#allocation6 + $0x2d0] sm:$0xff]  ;;  %v4256_v17 = vld [vmem:[#allocation9 + $0xa0] ss:$16 sps:$4 sm:$0xff]  }
  0x97   :  { %v4259_v18 = vld [vmem:[#allocation9 + $0x2a0] ss:$16 sps:$4 sm:$0xff]  }
  0x98   :  { %993 = vmatpush1.bf16.msra.mxu0 %v3792_v53  ;;  %1034 = vmatpush1.bf16.msra.mxu1 %v3794_v23  ;;  %v3859_v53 = vcombine.high %v248_v12, %v252_v14  ;;  %v3856_v23 = vcombine.low %v247_v8, %v251_v9  ;;  %v4244_v8 = vld [vmem:[#allocation9 + $0xe0] ss:$16 sps:$4 sm:$0xff]  }
  0x99   :  { %994 = vmatprep.subr.bf16.mxu0 %v3785_v24  ;;  %1035 = vmatprep.subr.bf16.mxu1 %v3787_v26  ;;  %v231_v24 = vld [vmem:[#allocation6 + $0x310] sm:$0xff]  ;;  %v3858_v26 = vcombine.low %v248_v12, %v252_v14  ;;  %v4247_v9 = vld [vmem:[#allocation9 + $0x2e0] ss:$16 sps:$4 sm:$0xff]  }
  0x9a   :  { %v3841_v35 = vcombine.high %v231_v24, %v235_v25  ;;  %v3840_v39 = vcombine.low %v231_v24, %v235_v25  ;;  %v4250_v12 = vld [vmem:[#allocation9 + $0xc0] ss:$16 sps:$4 sm:$0xff]   ;;  %v4276_v25 = vld [vmem:[#allocation9 + $0x44] ss:$16 sps:$4 sm:$0xff]  }
  0x9b   :  { %v4253_v14 = vld [vmem:[#allocation9 + $0x2c0] ss:$16 sps:$4 sm:$0xff]  }
  0x9c   :  { %995 = vmatpush1.bf16.msra.mxu0 %v3784_v30  ;;  %1036 = vmatpush1.bf16.msra.mxu1 %v3786_v33  ;;  %v3851_v30 = vcombine.high %v240_v21, %v244_v22  ;;  %v227_v33 = vld [vmem:[#allocation6 + $0x2f0] sm:$0xff]  ;;  %v4271_v24 = vld [vmem:[#allocation9 + $0x260] ss:$16 sps:$4 sm:$0xff]  }
  0x9d   :  { %996 = vmatprep.subr.bf16.mxu0 %v3777_v34  ;;  %1037 = vmatprep.subr.bf16.mxu1 %v3779_v37  ;;  %v3850_v34 = vcombine.low %v240_v21, %v244_v22  ;;  %v228_v37 = vld [vmem:[#allocation6 + $0x2f8] sm:$0xff]  ;;  %v3833_v42 = vcombine.high %v223_v32, %v227_v33  ;;  %v3832_v46 = vcombine.low %v223_v32, %v227_v33 }
  0x9e   :  { %v4262_v21 = vld [vmem:[#allocation9 + $0x80] ss:$16 sps:$4 sm:$0xff]   ;;  %v4288_v33 = vld [vmem:[#allocation9 + $0x4] ss:$16 sps:$4 sm:$0xff]  }
  0x9f   :  { %v4265_v22 = vld [vmem:[#allocation9 + $0x280] ss:$16 sps:$4 sm:$0xff]  }
  0xa0   :  { %997 = vmatpush1.bf16.msra.mxu0 %v3776_v38  ;;  %1038 = vmatpush1.bf16.msra.mxu1 %v3778_v41  ;;  %v3843_v38 = vcombine.high %v232_v28, %v236_v29  ;;  %v219_v41 = vld [vmem:[#allocation6 + $0x2b0] sm:$0xff]  ;;  %v4283_v32 = vld [vmem:[#allocation9 + $0x220] ss:$16 sps:$4 sm:$0xff]  }
  0xa1   :  { %998 = vmatprep.subr.bf16.mxu0 %v3769_v57  ;;  %1039 = vmatprep.subr.bf16.mxu1 %v3771_v44  ;;  %v3842_v57 = vcombine.low %v232_v28, %v236_v29  ;;  %v220_v44 = vld [vmem:[#allocation6 + $0x2b8] sm:$0xff]  ;;  %v3825_v50 = vcombine.high %v215_v40, %v219_v41  ;;  %v3824_v55 = vcombine.low %v215_v40, %v219_v41 }
  0xa2   :  { %v4277_v28 = vld [vmem:[#allocation9 + $0x240] ss:$16 sps:$4 sm:$0xff]   ;;  %v4282_v29 = vld [vmem:[#allocation9 + $0x24] ss:$16 sps:$4 sm:$0xff]  }
  0xa3   :  { %v4295_v40 = vld [vmem:[#allocation9 + $0x3e0] ss:$16 sps:$4 sm:$0xff]   ;;  %v4300_v41 = vld [vmem:[#allocation9 + $0x1c4] ss:$16 sps:$4 sm:$0xff]  }
  0xa4   :  { %999 = vmatpush1.bf16.msra.mxu0 %v3768_v45  ;;  %1040 = vmatpush1.bf16.msra.mxu1 %v3770_v48  ;;  %v3835_v45 = vcombine.high %v224_v36, %v228_v37  ;;  %v211_v48 = vld [vmem:[#allocation6 + $0x270] sm:$0xff] }
  0xa5   :  { %1000 = vmatprep.subr.bf16.mxu0 %v3761_v49  ;;  %1041 = vmatprep.subr.bf16.mxu1 %v3763_v52  ;;  %v3834_v49 = vcombine.low %v224_v36, %v228_v37  ;;  %v212_v52 = vld [vmem:[#allocation6 + $0x278] sm:$0xff]  ;;  %v3817_v60 = vcombine.high %v207_v47, %v211_v48  ;;  %v3816_v0 = vcombine.low %v207_v47, %v211_v48 }
  0xa6   :  { %v3818_v1 = vcombine.low %v208_v51, %v212_v52  ;;  %v4289_v36 = vld [vmem:[#allocation9 + $0x200] ss:$16 sps:$4 sm:$0xff]   ;;  %v4294_v37 = vld [vmem:[#allocation9 + $0x1e4] ss:$16 sps:$4 sm:$0xff]  }
  0xa7   :  { %v4307_v47 = vld [vmem:[#allocation9 + $0x3a0] ss:$16 sps:$4 sm:$0xff]   ;;  %v4312_v48 = vld [vmem:[#allocation9 + $0x184] ss:$16 sps:$4 sm:$0xff]  }
  0xa8   :  { %1001 = vmatpush1.bf16.msra.mxu0 %v3760_v54  ;;  %1042 = vmatpush1.bf16.msra.mxu1 %v3762_v58  ;;  %v3827_v54 = vcombine.high %v216_v43, %v220_v44  ;;  %v203_v58 = vld [vmem:[#allocation6 + $0x230] sm:$0xff] }
  0xa9   :  { %1002 = vmatprep.subr.bf16.mxu0 %v3753_v59  ;;  %1043 = vmatprep.subr.bf16.mxu1 %v3755_v62  ;;  %v3826_v59 = vcombine.low %v216_v43, %v220_v44  ;;  %v204_v62 = vld [vmem:[#allocation6 + $0x238] sm:$0xff]  ;;  %v3808_v5 = vcombine.low %v199_v56, %v203_v58 }
  0xaa   :  { %v4301_v43 = vld [vmem:[#allocation9 + $0x3c0] ss:$16 sps:$4 sm:$0xff]   ;;  %v4306_v44 = vld [vmem:[#allocation9 + $0x1a4] ss:$16 sps:$4 sm:$0xff]  }
  0xac   :  { %1003 = vmatpush1.bf16.msra.mxu0 %v3752_v63  ;;  %1044 = vmatpush1.bf16.msra.mxu1 %v3754_v2  ;;  %v3819_v63 = vcombine.high %v208_v51, %v212_v52  ;;  %v3809_v2 = vcombine.high %v199_v56, %v203_v58  ;;  %v4313_v51 = vld [vmem:[#allocation9 + $0x380] ss:$16 sps:$4 sm:$0xff]   ;;  %v4318_v52 = vld [vmem:[#allocation9 + $0x164] ss:$16 sps:$4 sm:$0xff]  }
  0xad   :  { %1004 = vmatprep.subr.bf16.mxu0 %v3745_v3  ;;  %1045 = vmatprep.subr.bf16.mxu1 %v3747_v6  ;;  %v3811_v3 = vcombine.high %v200_v61, %v204_v62  ;;  %v4249_v6 = vld [vmem:[#allocation9 + $0x2e4] ss:$16 sps:$4 sm:$0xff]   ;;  %v4319_v56 = vld [vmem:[#allocation9 + $0x360] ss:$16 sps:$4 sm:$0xff]  }
  0xae   :  { %v4324_v58 = vld [vmem:[#allocation9 + $0x144] ss:$16 sps:$4 sm:$0xff]  }
  0xb0   :  { %1005 = vmatpush1.bf16.msra.mxu0 %v3744_v7  ;;  %1046 = vmatpush1.bf16.msra.mxu1 %v3746_v10  ;;  %v3810_v7 = vcombine.low %v200_v61, %v204_v62  ;;  %v4252_v10 = vld [vmem:[#allocation9 + $0xc4] ss:$16 sps:$4 sm:$0xff]   ;;  %v4325_v61 = vld [vmem:[#allocation9 + $0x340] ss:$16 sps:$4 sm:$0xff]  }
  0xb1   :  { %1006 = vmatprep.subr.bf16.mxu0 %v3865_v11  ;;  %1047 = vmatprep.subr.bf16.mxu1 %v3867_v15  ;;  %v4255_v11 = vld [vmem:[#allocation9 + $0x2c4] ss:$16 sps:$4 sm:$0xff]  }
  0xb2   :  { %v4258_v15 = vld [vmem:[#allocation9 + $0xa4] ss:$16 sps:$4 sm:$0xff]  }
  0xb3   :  { %v4330_v62 = vld [vmem:[#allocation9 + $0x124] ss:$16 sps:$4 sm:$0xff]  }
  0xb4   :  { %1007 = vmatpush2.bf16.msra.mxu0 %v3864_v16  ;;  %1048 = vmatpush2.bf16.msra.mxu1 %v3866_v19  ;;  %v4261_v16 = vld [vmem:[#allocation9 + $0x2a4] ss:$16 sps:$4 sm:$0xff]  }
  0xb5   :  { %1008 = vmatprep.subr.bf16.mxu0 %v3857_v20  ;;  %1049 = vmatprep.subr.bf16.mxu1 %v3859_v53  ;;  %v4264_v19 = vld [vmem:[#allocation9 + $0x84] ss:$16 sps:$4 sm:$0xff]  }
  0xb6   :  { %v4267_v20 = vld [vmem:[#allocation9 + $0x284] ss:$16 sps:$4 sm:$0xff]  }
  0xb7   :  { %v4270_v53 = vld [vmem:[#allocation9 + $0x64] ss:$16 sps:$4 sm:$0xff]  }
  0xb8   :  { %1009 = vmatpush2.bf16.msra.mxu0 %v3856_v23  ;;  %1050 = vmatpush2.bf16.msra.mxu1 %v3858_v26  ;;  %v4273_v23 = vld [vmem:[#allocation9 + $0x264] ss:$16 sps:$4 sm:$0xff]  }
  0xb9   :  { %1010 = vmatprep.subr.bf16.mxu0 %v3849_v27  ;;  %1051 = vmatprep.subr.bf16.mxu1 %v3851_v30  ;;  %v4279_v26 = vld [vmem:[#allocation9 + $0x244] ss:$16 sps:$4 sm:$0xff]   ;;  %v4274_v27 = vld [vmem:[#allocation9 + $0x40] ss:$16 sps:$4 sm:$0xff]  }
  0xba   :  { %v4285_v30 = vld [vmem:[#allocation9 + $0x224] ss:$16 sps:$4 sm:$0xff]  }
  0xbc   :  { %1011 = vmatpush2.bf16.msra.mxu0 %v3848_v31  ;;  %1052 = vmatpush2.bf16.msra.mxu1 %v3850_v34  ;;  %v4280_v31 = vld [vmem:[#allocation9 + $0x20] ss:$16 sps:$4 sm:$0xff]   ;;  %v4291_v34 = vld [vmem:[#allocation9 + $0x204] ss:$16 sps:$4 sm:$0xff]  }
  0xbd   :  { %1012 = vmatprep.subr.bf16.mxu0 %v3841_v35  ;;  %1053 = vmatprep.subr.bf16.mxu1 %v3843_v38  ;;  %v4286_v35 = vld [vmem:[#allocation9] ss:$16 sps:$4 sm:$0xff]   ;;  %v4297_v38 = vld [vmem:[#allocation9 + $0x3e4] ss:$16 sps:$4 sm:$0xff]  }
  0xc0   :  { %1013 = vmatpush2.bf16.msra.mxu0 %v3840_v39  ;;  %1054 = vmatpush2.bf16.msra.mxu1 %v3842_v57  ;;  %v4292_v39 = vld [vmem:[#allocation9 + $0x1e0] ss:$16 sps:$4 sm:$0xff]   ;;  %v4303_v57 = vld [vmem:[#allocation9 + $0x3c4] ss:$16 sps:$4 sm:$0xff]  }
  0xc1   :  { %1014 = vmatprep.subr.bf16.mxu0 %v3833_v42  ;;  %1055 = vmatprep.subr.bf16.mxu1 %v3835_v45  ;;  %v4298_v42 = vld [vmem:[#allocation9 + $0x1c0] ss:$16 sps:$4 sm:$0xff]   ;;  %v4309_v45 = vld [vmem:[#allocation9 + $0x3a4] ss:$16 sps:$4 sm:$0xff]  }
  0xc4   :  { %1015 = vmatpush2.bf16.msra.mxu0 %v3832_v46  ;;  %1056 = vmatpush2.bf16.msra.mxu1 %v3834_v49  ;;  %v4304_v46 = vld [vmem:[#allocation9 + $0x1a0] ss:$16 sps:$4 sm:$0xff]   ;;  %v4315_v49 = vld [vmem:[#allocation9 + $0x384] ss:$16 sps:$4 sm:$0xff]  }
  0xc5   :  { %1016 = vmatprep.subr.bf16.mxu0 %v3825_v50  ;;  %1057 = vmatprep.subr.bf16.mxu1 %v3827_v54  ;;  %v4310_v50 = vld [vmem:[#allocation9 + $0x180] ss:$16 sps:$4 sm:$0xff]   ;;  %v4321_v54 = vld [vmem:[#allocation9 + $0x364] ss:$16 sps:$4 sm:$0xff]  }
  0xc8   :  { %1017 = vmatpush2.bf16.msra.mxu0 %v3824_v55  ;;  %1058 = vmatpush2.bf16.msra.mxu1 %v3826_v59  ;;  %v4316_v55 = vld [vmem:[#allocation9 + $0x160] ss:$16 sps:$4 sm:$0xff]   ;;  %v4327_v59 = vld [vmem:[#allocation9 + $0x344] ss:$16 sps:$4 sm:$0xff]  }
  0xc9   :  { %1018 = vmatprep.subr.bf16.mxu0 %v3817_v60  ;;  %1059 = vmatprep.subr.bf16.mxu1 %v3819_v63  ;;  %v4322_v60 = vld [vmem:[#allocation9 + $0x140] ss:$16 sps:$4 sm:$0xff]   ;;  %v4333_v63 = vld [vmem:[#allocation9 + $0x324] ss:$16 sps:$4 sm:$0xff]  }
  0xcc   :  { %1019 = vmatpush2.bf16.msra.mxu0 %v3816_v0  ;;  %1060 = vmatpush2.bf16.msra.mxu1 %v3818_v1  ;;  %v4328_v0 = vld [vmem:[#allocation9 + $0x120] ss:$16 sps:$4 sm:$0xff]  }
  0xcd   :  { %1020 = vmatprep.subr.bf16.mxu0 %v3809_v2  ;;  %1061 = vmatprep.subr.bf16.mxu1 %v3811_v3  ;;  %v4331_v1 = vld [vmem:[#allocation9 + $0x320] ss:$16 sps:$4 sm:$0xff]   ;;  %v4336_v2 = vld [vmem:[#allocation9 + $0x104] ss:$16 sps:$4 sm:$0xff]  }
  0xce   :  { %v4339_v3 = vld [vmem:[#allocation9 + $0x304] ss:$16 sps:$4 sm:$0xff]  }
  0xd0   :  { %1021 = vmatpush2.bf16.msra.mxu0 %v3808_v5  ;;  %1062 = vmatpush2.bf16.msra.mxu1 %v3810_v7  ;;  %v4337_v5 = vld [vmem:[#allocation9 + $0x300] ss:$16 sps:$4 sm:$0xff]   ;;  %v4345_v7 = vld [vmem:[#allocation9 + $0x6e4] ss:$16 sps:$4 sm:$0xff]  }
  0xd1   :  { %2723 = vmatprep.subr.bf16.mxu0 %v4246_v4  ;;  %2764 = vmatprep.subr.bf16.mxu1 %v4249_v6  ;;  %v4334_v4 = vld [vmem:[#allocation9 + $0x100] ss:$16 sps:$4 sm:$0xff]   ;;  %v4342_v6 = vld [vmem:[#allocation9 + $0x4e4] ss:$16 sps:$4 sm:$0xff]  }
  0xd3   :  { %1023 = vmatmul.mubr.bf16.vlgmr.msra.gmra.mxu0 %v5013_v13  ;;  %1064 = vmatmul.mubr.bf16.vlgmr.msra.gmra.mxu1 %v5013_v13  ;;  %v4268_v13 = vld [vmem:[#allocation9 + $0x60] ss:$16 sps:$4 sm:$0xff]  }
  0xd4   :  { %2724 = vmatpush1.bf16.msra.mxu0 %v4244_v8  ;;  %2765 = vmatpush1.bf16.msra.mxu1 %v4247_v9  ;;  %v1101_v8 = vlaneseq }
  0xd5   :  { %2725 = vmatprep.subr.bf16.mxu0 %v4252_v10  ;;  %2766 = vmatprep.subr.bf16.mxu1 %v4255_v11  ;;  %v5026_v11 = vld [vmem:[#allocation8] sm:$0xff] }
  0xd6   :  { %v5021_v9 = vshrl.u32 %v1101_v8, 7  ;;  %v4391_v8 = vld [vmem:[#allocation9 + $0x7e0] ss:$16 sps:$4 sm:$0xff]  }
  0xd8   :  { %2726 = vmatpush1.bf16.msra.mxu0 %v4250_v12  ;;  %2767 = vmatpush1.bf16.msra.mxu1 %v4253_v14  ;;  %v5024_v10 = vsub.s32 0, %v5021_v9  ;;  %v1111_v12 = vsub.s32 2, %v5021_v9  ;;  %v5030_v14 = vsub.s32 1, %v5021_v9 }
  0xd9   :  { %2727 = vmatprep.subr.bf16.mxu0 %v4258_v15  ;;  %2768 = vmatprep.subr.bf16.mxu1 %v4261_v16  ;;  %v1115_v15 = vsub.s32 3, %v5021_v9 }
  0xda   :  { %v1104_v16 = vrot.slane %v5026_v11, %v5024_v10 }
  0xdc   :  { %2728 = vmatpush1.bf16.msra.mxu0 %v4256_v17  ;;  %2769 = vmatpush1.bf16.msra.mxu1 %v4259_v18  ;;  %v1112_v17 = vrot.slane %v5026_v11, %v1111_v12  ;;  %v1108_v18 = vrot.slane %v5026_v11, %v5030_v14 }
  0xdd   :  { %2729 = vmatprep.subr.bf16.mxu0 %v4264_v19  ;;  %2770 = vmatprep.subr.bf16.mxu1 %v4267_v20  ;;  %v1116_v20 = vrot.slane %v5026_v11, %v1115_v15 }
  0xe0   :  { %2730 = vmatpush1.bf16.msra.mxu0 %v4262_v21  ;;  %2771 = vmatpush1.bf16.msra.mxu1 %v4265_v22 }
  0xe1   :  { %2731 = vmatprep.subr.bf16.mxu0 %v4270_v53  ;;  %2772 = vmatprep.subr.bf16.mxu1 %v4273_v23 }
  0xe4   :  { %2732 = vmatpush1.bf16.msra.mxu0 %v4268_v13  ;;  %2773 = vmatpush1.bf16.msra.mxu1 %v4271_v24 }
  0xe5   :  { %2733 = vmatprep.subr.bf16.mxu0 %v4276_v25  ;;  %2774 = vmatprep.subr.bf16.mxu1 %v4279_v26 }
  0xe8   :  { %2734 = vmatpush1.bf16.msra.mxu0 %v4274_v27  ;;  %2775 = vmatpush1.bf16.msra.mxu1 %v4277_v28 }
  0xe9   :  { %2735 = vmatprep.subr.bf16.mxu0 %v4282_v29  ;;  %2776 = vmatprep.subr.bf16.mxu1 %v4285_v30 }
  0xec   :  { %2736 = vmatpush1.bf16.msra.mxu0 %v4280_v31  ;;  %2777 = vmatpush1.bf16.msra.mxu1 %v4283_v32 }
  0xed   :  { %2737 = vmatprep.subr.bf16.mxu0 %v4288_v33  ;;  %2778 = vmatprep.subr.bf16.mxu1 %v4291_v34 }
  0xf0   :  { %2738 = vmatpush1.bf16.msra.mxu0 %v4286_v35  ;;  %2779 = vmatpush1.bf16.msra.mxu1 %v4289_v36  ;;  %v4340_v36 = vld [vmem:[#allocation9 + $0x4e0] ss:$16 sps:$4 sm:$0xff]  }
  0xf1   :  { %2739 = vmatprep.subr.bf16.mxu0 %v4294_v37  ;;  %2780 = vmatprep.subr.bf16.mxu1 %v4297_v38 }
  0xf4   :  { %2740 = vmatpush2.bf16.msra.mxu0 %v4292_v39  ;;  %2781 = vmatpush2.bf16.msra.mxu1 %v4295_v40  ;;  %v4343_v39 = vld [vmem:[#allocation9 + $0x6e0] ss:$16 sps:$4 sm:$0xff]   ;;  %v4348_v40 = vld [vmem:[#allocation9 + $0x4c4] ss:$16 sps:$4 sm:$0xff]  }
  0xf5   :  { %2741 = vmatprep.subr.bf16.mxu0 %v4300_v41  ;;  %2782 = vmatprep.subr.bf16.mxu1 %v4303_v57  ;;  %v4351_v41 = vld [vmem:[#allocation9 + $0x6c4] ss:$16 sps:$4 sm:$0xff]   ;;  %v4346_v57 = vld [vmem:[#allocation9 + $0x4c0] ss:$16 sps:$4 sm:$0xff]  }
  0xf8   :  { %2742 = vmatpush2.bf16.msra.mxu0 %v4298_v42  ;;  %2783 = vmatpush2.bf16.msra.mxu1 %v4301_v43  ;;  %v4349_v42 = vld [vmem:[#allocation9 + $0x6c0] ss:$16 sps:$4 sm:$0xff]   ;;  %v4354_v43 = vld [vmem:[#allocation9 + $0x4a4] ss:$16 sps:$4 sm:$0xff]  }
  0xf9   :  { %2743 = vmatprep.subr.bf16.mxu0 %v4306_v44  ;;  %2784 = vmatprep.subr.bf16.mxu1 %v4309_v45  ;;  %v4357_v44 = vld [vmem:[#allocation9 + $0x6a4] ss:$16 sps:$4 sm:$0xff]   ;;  %v4352_v45 = vld [vmem:[#allocation9 + $0x4a0] ss:$16 sps:$4 sm:$0xff]  }
  0xfc   :  { %2744 = vmatpush2.bf16.msra.mxu0 %v4304_v46  ;;  %2785 = vmatpush2.bf16.msra.mxu1 %v4307_v47  ;;  %v4355_v46 = vld [vmem:[#allocation9 + $0x6a0] ss:$16 sps:$4 sm:$0xff]   ;;  %v4360_v47 = vld [vmem:[#allocation9 + $0x484] ss:$16 sps:$4 sm:$0xff]  }
  0xfd   :  { %2745 = vmatprep.subr.bf16.mxu0 %v4312_v48  ;;  %2786 = vmatprep.subr.bf16.mxu1 %v4315_v49  ;;  %v4363_v48 = vld [vmem:[#allocation9 + $0x684] ss:$16 sps:$4 sm:$0xff]   ;;  %v4358_v49 = vld [vmem:[#allocation9 + $0x480] ss:$16 sps:$4 sm:$0xff]  }
 0x100   :  { %2746 = vmatpush2.bf16.msra.mxu0 %v4310_v50  ;;  %2787 = vmatpush2.bf16.msra.mxu1 %v4313_v51  ;;  %v4361_v50 = vld [vmem:[#allocation9 + $0x680] ss:$16 sps:$4 sm:$0xff]   ;;  %v4366_v51 = vld [vmem:[#allocation9 + $0x464] ss:$16 sps:$4 sm:$0xff]  }
 0x101   :  { %2747 = vmatprep.subr.bf16.mxu0 %v4318_v52  ;;  %2788 = vmatprep.subr.bf16.mxu1 %v4321_v54  ;;  %v4369_v52 = vld [vmem:[#allocation9 + $0x664] ss:$16 sps:$4 sm:$0xff]   ;;  %v4364_v54 = vld [vmem:[#allocation9 + $0x460] ss:$16 sps:$4 sm:$0xff]  }
 0x104   :  { %2748 = vmatpush2.bf16.msra.mxu0 %v4316_v55  ;;  %2789 = vmatpush2.bf16.msra.mxu1 %v4319_v56  ;;  %v4367_v55 = vld [vmem:[#allocation9 + $0x660] ss:$16 sps:$4 sm:$0xff]   ;;  %v4372_v56 = vld [vmem:[#allocation9 + $0x444] ss:$16 sps:$4 sm:$0xff]  }
 0x105   :  { %2749 = vmatprep.subr.bf16.mxu0 %v4324_v58  ;;  %2790 = vmatprep.subr.bf16.mxu1 %v4327_v59  ;;  %v4375_v58 = vld [vmem:[#allocation9 + $0x644] ss:$16 sps:$4 sm:$0xff]   ;;  %v4370_v59 = vld [vmem:[#allocation9 + $0x440] ss:$16 sps:$4 sm:$0xff]  }
 0x108   :  { %2750 = vmatpush2.bf16.msra.mxu0 %v4322_v60  ;;  %2791 = vmatpush2.bf16.msra.mxu1 %v4325_v61  ;;  %v4373_v60 = vld [vmem:[#allocation9 + $0x640] ss:$16 sps:$4 sm:$0xff]   ;;  %v4378_v61 = vld [vmem:[#allocation9 + $0x424] ss:$16 sps:$4 sm:$0xff]  }
 0x109   :  { %2751 = vmatprep.subr.bf16.mxu0 %v4330_v62  ;;  %2792 = vmatprep.subr.bf16.mxu1 %v4333_v63  ;;  %v4381_v62 = vld [vmem:[#allocation9 + $0x624] ss:$16 sps:$4 sm:$0xff]   ;;  %v4376_v63 = vld [vmem:[#allocation9 + $0x420] ss:$16 sps:$4 sm:$0xff]  }
 0x10c   :  { %2752 = vmatpush2.bf16.msra.mxu0 %v4328_v0  ;;  %2793 = vmatpush2.bf16.msra.mxu1 %v4331_v1  ;;  %v4379_v0 = vld [vmem:[#allocation9 + $0x620] ss:$16 sps:$4 sm:$0xff]   ;;  %v4384_v1 = vld [vmem:[#allocation9 + $0x404] ss:$16 sps:$4 sm:$0xff]  }
 0x10d   :  { %2753 = vmatprep.subr.bf16.mxu0 %v4336_v2  ;;  %2794 = vmatprep.subr.bf16.mxu1 %v4339_v3  ;;  %v4387_v2 = vld [vmem:[#allocation9 + $0x604] ss:$16 sps:$4 sm:$0xff]   ;;  %v4382_v3 = vld [vmem:[#allocation9 + $0x400] ss:$16 sps:$4 sm:$0xff]  }
 0x110   :  { %2754 = vmatpush2.bf16.msra.mxu0 %v4334_v4  ;;  %2795 = vmatpush2.bf16.msra.mxu1 %v4337_v5  ;;  %v4385_v4 = vld [vmem:[#allocation9 + $0x600] ss:$16 sps:$4 sm:$0xff]   ;;  %v4390_v5 = vld [vmem:[#allocation9 + $0x5e4] ss:$16 sps:$4 sm:$0xff]  }
 0x111   :  { %2805 = vmatprep.subr.bf16.mxu0 %v4342_v6  ;;  %2846 = vmatprep.subr.bf16.mxu1 %v4345_v7  ;;  %v4393_v6 = vld [vmem:[#allocation9 + $0x7e4] ss:$16 sps:$4 sm:$0xff]   ;;  %v4388_v7 = vld [vmem:[#allocation9 + $0x5e0] ss:$16 sps:$4 sm:$0xff]  }
 0x153   :  { %v942_v19 = vpop.f32.mrf.mxu0  ;;  %v983_v22 = vpop.f32.mrf.mxu1 }
 0x154   :  { %v1141_v21 = vadd.f32 %v1104_v16, %v942_v19  ;;  %v1143_v53 = vadd.f32 %v1112_v17, %v983_v22  ;;  %v4396_v16 = vld [vmem:[#allocation9 + $0x5c4] ss:$16 sps:$4 sm:$0xff]   ;;  %v4397_v19 = vld [vmem:[#allocation9 + $0x7c0] ss:$16 sps:$4 sm:$0xff]   ;;  %v1119_v22 = vsub.s32 4, %v5021_v9 }
 0x155   :  { %v944_v23 = vpop.f32.mrf.mxu0  ;;  %v985_v24 = vpop.f32.mrf.mxu1  ;;  %v4399_v17 = vld [vmem:[#allocation9 + $0x7c4] ss:$16 sps:$4 sm:$0xff]  }
 0x156   :  { %4740 = vtanh.f32 %v1141_v21  ;;  %v1142_v13 = vadd.f32 %v1108_v18, %v944_v23  ;;  %v1144_v25 = vadd.f32 %v1116_v20, %v985_v24  ;;  %v4394_v18 = vld [vmem:[#allocation9 + $0x5c0] ss:$16 sps:$4 sm:$0xff]   ;;  %v4402_v20 = vld [vmem:[#allocation9 + $0x5a4] ss:$16 sps:$4 sm:$0xff]  }
 0x157   :  { %4742 = vtanh.f32 %v1143_v53  ;;  %v946_v26 = vpop.f32.mrf.mxu0  ;;  %v987_v27 = vpop.f32.mrf.mxu1  ;;  %v4405_v21 = vld [vmem:[#allocation9 + $0x7a4] ss:$16 sps:$4 sm:$0xff]   ;;  %v1127_v53 = vsub.s32 6, %v5021_v9  ;;  %v4400_v23 = vld [vmem:[#allocation9 + $0x5a0] ss:$16 sps:$4 sm:$0xff]  }
 0x158   :  { %4744 = vtanh.f32 %v1142_v13  ;;  %v1123_v13 = vsub.s32 5, %v5021_v9  ;;  %v4403_v24 = vld [vmem:[#allocation9 + $0x7a0] ss:$16 sps:$4 sm:$0xff]   ;;  %v1131_v26 = vsub.s32 7, %v5021_v9  ;;  %v1120_v27 = vrot.slane %v5026_v11, %v1119_v22  ;;  %v4447_v22 = vld [vmem:[#allocation9 + $0x2cc] ss:$16 sps:$4 sm:$0xff]  }
 0x159   :  { %4746 = vtanh.f32 %v1144_v25  ;;  %v947_v28 = vpop.f32.mrf.mxu0  ;;  %v988_v29 = vpop.f32.mrf.mxu1  ;;  %v4408_v25 = vld [vmem:[#allocation9 + $0x584] ss:$16 sps:$4 sm:$0xff]  }
 0x15a   :  { %v4411_v28 = vld [vmem:[#allocation9 + $0x784] ss:$16 sps:$4 sm:$0xff]   ;;  %v1128_v29 = vrot.slane %v5026_v11, %v1127_v53  ;;  %v4442_v53 = vld [vmem:[#allocation9 + $0xc8] ss:$16 sps:$4 sm:$0xff]  }
 0x163   :  { %v4741_v30 = vpop.eup %4740 }
 0x164   :  { %v4743_v31 = vpop.eup %4742  ;;  %v5047_v37 = vpack.c.bf16 %v4741_v30, %v4741_v30  ;;  %v4406_v30 = vld [vmem:[#allocation9 + $0x580] ss:$16 sps:$4 sm:$0xff]  }
 0x165   :  { %v4745_v32 = vpop.eup %4744  ;;  %v5043_v34 = vpack.c.bf16 %v4743_v31, %v4743_v31  ;;  %v1124_v31 = vrot.slane %v5026_v11, %v1123_v13  ;;  %v4450_v13 = vld [vmem:[#allocation9 + $0xac] ss:$16 sps:$4 sm:$0xff]  }
 0x166   :  { %v4747_v33 = vpop.eup %4746  ;;  %v5045_v35 = vpack.c.bf16 %v4745_v32, %v4745_v32 }
 0x167   :  { %v5049_v38 = vpack.c.bf16 %v4747_v33, %v4747_v33  ;;  %v4409_v33 = vld [vmem:[#allocation9 + $0x780] ss:$16 sps:$4 sm:$0xff]  }
 0x168   :  { %2755 = vmatprep.mubr.bf16.mxu0 %v5045_v35 }
 0x169   :  { %2796 = vmatprep.mubr.bf16.mxu1 %v5049_v38  ;;  %2756 = vmatmul.mubr.bf16.vlgmr.msra.gmra.mxu0 %v5047_v37 }
 0x16a   :  { %2797 = vmatmul.mubr.bf16.vlgmr.msra.gmra.mxu1 %v5043_v34  ;;  %2806 = vmatpush1.bf16.msra.mxu0 %v4340_v36  ;;  %v1132_v36 = vrot.slane %v5026_v11, %v1131_v26  ;;  %v4451_v26 = vld [vmem:[#allocation9 + $0x2a8] ss:$16 sps:$4 sm:$0xff]  }
 0x16b   :  { %2847 = vmatpush1.bf16.msra.mxu1 %v4343_v39  ;;  %2807 = vmatprep.subr.bf16.mxu0 %v4348_v40  ;;  %v4414_v39 = vld [vmem:[#allocation9 + $0x564] ss:$16 sps:$4 sm:$0xff]  }
 0x16c   :  { %2848 = vmatprep.subr.bf16.mxu1 %v4351_v41 }
 0x16e   :  { %2808 = vmatpush1.bf16.msra.mxu0 %v4346_v57  ;;  %v4417_v57 = vld [vmem:[#allocation9 + $0x764] ss:$16 sps:$4 sm:$0xff]  }
 0x16f   :  { %2849 = vmatpush1.bf16.msra.mxu1 %v4349_v42  ;;  %2809 = vmatprep.subr.bf16.mxu0 %v4354_v43 }
 0x170   :  { %2850 = vmatprep.subr.bf16.mxu1 %v4357_v44 }
 0x172   :  { %2810 = vmatpush1.bf16.msra.mxu0 %v4352_v45 }
 0x173   :  { %2851 = vmatpush1.bf16.msra.mxu1 %v4355_v46  ;;  %2811 = vmatprep.subr.bf16.mxu0 %v4360_v47  ;;  %v4412_v46 = vld [vmem:[#allocation9 + $0x560] ss:$16 sps:$4 sm:$0xff]  }
 0x174   :  { %2852 = vmatprep.subr.bf16.mxu1 %v4363_v48 }
 0x176   :  { %2812 = vmatpush1.bf16.msra.mxu0 %v4358_v49  ;;  %v4415_v49 = vld [vmem:[#allocation9 + $0x760] ss:$16 sps:$4 sm:$0xff]  }
 0x177   :  { %2853 = vmatpush1.bf16.msra.mxu1 %v4361_v50  ;;  %2813 = vmatprep.subr.bf16.mxu0 %v4366_v51  ;;  %v4420_v50 = vld [vmem:[#allocation9 + $0x544] ss:$16 sps:$4 sm:$0xff]  }
 0x178   :  { %2854 = vmatprep.subr.bf16.mxu1 %v4369_v52  ;;  %v4423_v51 = vld [vmem:[#allocation9 + $0x744] ss:$16 sps:$4 sm:$0xff]  }
 0x17a   :  { %2814 = vmatpush1.bf16.msra.mxu0 %v4364_v54 }
 0x17b   :  { %2855 = vmatpush1.bf16.msra.mxu1 %v4367_v55  ;;  %2815 = vmatprep.subr.bf16.mxu0 %v4372_v56  ;;  %v4418_v55 = vld [vmem:[#allocation9 + $0x540] ss:$16 sps:$4 sm:$0xff]  }
 0x17c   :  { %2856 = vmatprep.subr.bf16.mxu1 %v4375_v58  ;;  %v4421_v56 = vld [vmem:[#allocation9 + $0x740] ss:$16 sps:$4 sm:$0xff]   ;;  %v4426_v58 = vld [vmem:[#allocation9 + $0x524] ss:$16 sps:$4 sm:$0xff]  }
 0x17e   :  { %2816 = vmatpush1.bf16.msra.mxu0 %v4370_v59  ;;  %v4429_v59 = vld [vmem:[#allocation9 + $0x724] ss:$16 sps:$4 sm:$0xff]  }
 0x17f   :  { %2857 = vmatpush1.bf16.msra.mxu1 %v4373_v60  ;;  %2817 = vmatprep.subr.bf16.mxu0 %v4378_v61  ;;  %v4424_v60 = vld [vmem:[#allocation9 + $0x520] ss:$16 sps:$4 sm:$0xff]  }
 0x180   :  { %2858 = vmatprep.subr.bf16.mxu1 %v4381_v62  ;;  %v4427_v61 = vld [vmem:[#allocation9 + $0x720] ss:$16 sps:$4 sm:$0xff]   ;;  %v4432_v62 = vld [vmem:[#allocation9 + $0x504] ss:$16 sps:$4 sm:$0xff]  }
 0x182   :  { %2818 = vmatpush1.bf16.msra.mxu0 %v4376_v63  ;;  %v4435_v63 = vld [vmem:[#allocation9 + $0x704] ss:$16 sps:$4 sm:$0xff]  }
 0x183   :  { %2859 = vmatpush1.bf16.msra.mxu1 %v4379_v0  ;;  %2819 = vmatprep.subr.bf16.mxu0 %v4384_v1  ;;  %v4430_v0 = vld [vmem:[#allocation9 + $0x500] ss:$16 sps:$4 sm:$0xff]  }
 0x184   :  { %2860 = vmatprep.subr.bf16.mxu1 %v4387_v2  ;;  %v4433_v2 = vld [vmem:[#allocation9 + $0x700] ss:$16 sps:$4 sm:$0xff]  }
 0x186   :  { %2820 = vmatpush1.bf16.msra.mxu0 %v4382_v3  ;;  %v4438_v3 = vld [vmem:[#allocation9 + $0xec] ss:$16 sps:$4 sm:$0xff]  }
 0x187   :  { %2861 = vmatpush1.bf16.msra.mxu1 %v4385_v4  ;;  %2821 = vmatprep.subr.bf16.mxu0 %v4390_v5  ;;  %v4441_v5 = vld [vmem:[#allocation9 + $0x2ec] ss:$16 sps:$4 sm:$0xff]  }
 0x188   :  { %2862 = vmatprep.subr.bf16.mxu1 %v4393_v6 }
 0x18a   :  { %2822 = vmatpush2.bf16.msra.mxu0 %v4388_v7 }
 0x18b   :  { %2863 = vmatpush2.bf16.msra.mxu1 %v4391_v8  ;;  %2823 = vmatprep.subr.bf16.mxu0 %v4396_v16 }
 0x18c   :  { %2864 = vmatprep.subr.bf16.mxu1 %v4399_v17  ;;  %v4436_v17 = vld [vmem:[#allocation9 + $0xe8] ss:$16 sps:$4 sm:$0xff]  }
 0x18e   :  { %2824 = vmatpush2.bf16.msra.mxu0 %v4394_v18 }
 0x18f   :  { %2865 = vmatpush2.bf16.msra.mxu1 %v4397_v19  ;;  %2825 = vmatprep.subr.bf16.mxu0 %v4402_v20  ;;  %v4439_v20 = vld [vmem:[#allocation9 + $0x2e8] ss:$16 sps:$4 sm:$0xff]  }
 0x190   :  { %2866 = vmatprep.subr.bf16.mxu1 %v4405_v21  ;;  %v4444_v21 = vld [vmem:[#allocation9 + $0xcc] ss:$16 sps:$4 sm:$0xff]  }
 0x192   :  { %2826 = vmatpush2.bf16.msra.mxu0 %v4400_v23  ;;  %v4445_v23 = vld [vmem:[#allocation9 + $0x2c8] ss:$16 sps:$4 sm:$0xff]  }
 0x193   :  { %2867 = vmatpush2.bf16.msra.mxu1 %v4403_v24  ;;  %v1024_v32 = vpop.f32.mrf.mxu0  ;;  %2827 = vmatprep.subr.bf16.mxu0 %v4408_v25  ;;  %v1065_v41 = vpop.f32.mrf.mxu1  ;;  %v4453_v24 = vld [vmem:[#allocation9 + $0x2ac] ss:$16 sps:$4 sm:$0xff]   ;;  %v4448_v25 = vld [vmem:[#allocation9 + $0xa8] ss:$16 sps:$4 sm:$0xff]  }
 0x194   :  { %v1145_v40 = vadd.f32 %v1120_v27, %v1024_v32  ;;  %2868 = vmatprep.subr.bf16.mxu1 %v4411_v28  ;;  %v1147_v42 = vadd.f32 %v1128_v29, %v1065_v41  ;;  %v4456_v27 = vld [vmem:[#allocation9 + $0x8c] ss:$16 sps:$4 sm:$0xff]   ;;  %v4454_v29 = vld [vmem:[#allocation9 + $0x88] ss:$16 sps:$4 sm:$0xff]  }
 0x195   :  { %v1026_v43 = vpop.f32.mrf.mxu0  ;;  %v1067_v45 = vpop.f32.mrf.mxu1  ;;  %v4459_v28 = vld [vmem:[#allocation9 + $0x28c] ss:$16 sps:$4 sm:$0xff]   ;;  %v4463_v32 = vld [vmem:[#allocation9 + $0x268] ss:$16 sps:$4 sm:$0xff]  }
 0x196   :  { %4748 = vtanh.f32 %v1145_v40  ;;  %v1146_v44 = vadd.f32 %v1124_v31, %v1026_v43  ;;  %2828 = vmatpush2.bf16.msra.mxu0 %v4406_v30  ;;  %v1148_v47 = vadd.f32 %v1132_v36, %v1067_v45  ;;  %v4462_v30 = vld [vmem:[#allocation9 + $0x6c] ss:$16 sps:$4 sm:$0xff]   ;;  %v4469_v40 = vld [vmem:[#allocation9 + $0x248] ss:$16 sps:$4 sm:$0xff]  }
 0x197   :  { %4750 = vtanh.f32 %v1147_v42  ;;  %2869 = vmatpush2.bf16.msra.mxu1 %v4409_v33  ;;  %v1028_v48 = vpop.f32.mrf.mxu0  ;;  %2829 = vmatprep.subr.bf16.mxu0 %v4414_v39  ;;  %v1069_v11 = vpop.f32.mrf.mxu1  ;;  %v4465_v31 = vld [vmem:[#allocation9 + $0x26c] ss:$16 sps:$4 sm:$0xff]   ;;  %v4466_v39 = vld [vmem:[#allocation9 + $0x48] ss:$16 sps:$4 sm:$0xff]  }
 0x198   :  { %4752 = vtanh.f32 %v1146_v44  ;;  %2870 = vmatprep.subr.bf16.mxu1 %v4417_v57  ;;  %v4468_v33 = vld [vmem:[#allocation9 + $0x4c] ss:$16 sps:$4 sm:$0xff]   ;;  %v4472_v42 = vld [vmem:[#allocation9 + $0x28] ss:$16 sps:$4 sm:$0xff]  }
 0x199   :  { %4754 = vtanh.f32 %v1148_v47  ;;  %v1029_v52 = vpop.f32.mrf.mxu0  ;;  %v1070_v54 = vpop.f32.mrf.mxu1  ;;  %v4471_v36 = vld [vmem:[#allocation9 + $0x24c] ss:$16 sps:$4 sm:$0xff]   ;;  %v4475_v43 = vld [vmem:[#allocation9 + $0x228] ss:$16 sps:$4 sm:$0xff]  }
 0x19a   :  { %2830 = vmatpush2.bf16.msra.mxu0 %v4412_v46  ;;  %v4474_v41 = vld [vmem:[#allocation9 + $0x2c] ss:$16 sps:$4 sm:$0xff]   ;;  %v4478_v46 = vld [vmem:[#allocation9 + $0x8] ss:$16 sps:$4 sm:$0xff]  }
 0x19b   :  { %2871 = vmatpush2.bf16.msra.mxu1 %v4415_v49  ;;  %2831 = vmatprep.subr.bf16.mxu0 %v4420_v50  ;;  %v4477_v57 = vld [vmem:[#allocation9 + $0x22c] ss:$16 sps:$4 sm:$0xff]   ;;  %v4481_v47 = vld [vmem:[#allocation9 + $0x208] ss:$16 sps:$4 sm:$0xff]  }
 0x19c   :  { %2872 = vmatprep.subr.bf16.mxu1 %v4423_v51  ;;  %v4480_v44 = vld [vmem:[#allocation9 + $0xc] ss:$16 sps:$4 sm:$0xff]   ;;  %v4484_v50 = vld [vmem:[#allocation9 + $0x1e8] ss:$16 sps:$4 sm:$0xff]  }
 0x19d   :  { %v4483_v45 = vld [vmem:[#allocation9 + $0x20c] ss:$16 sps:$4 sm:$0xff]   ;;  %v4487_v11 = vld [vmem:[#allocation9 + $0x3e8] ss:$16 sps:$4 sm:$0xff]  }
 0x19e   :  { %2832 = vmatpush2.bf16.msra.mxu0 %v4418_v55  ;;  %v4486_v48 = vld [vmem:[#allocation9 + $0x1ec] ss:$16 sps:$4 sm:$0xff]   ;;  %v4490_v54 = vld [vmem:[#allocation9 + $0x1c8] ss:$16 sps:$4 sm:$0xff]  }
 0x19f   :  { %2873 = vmatpush2.bf16.msra.mxu1 %v4421_v56  ;;  %2833 = vmatprep.subr.bf16.mxu0 %v4426_v58  ;;  %v4489_v49 = vld [vmem:[#allocation9 + $0x3ec] ss:$16 sps:$4 sm:$0xff]   ;;  %v4493_v55 = vld [vmem:[#allocation9 + $0x3c8] ss:$16 sps:$4 sm:$0xff]  }
 0x1a0   :  { %2874 = vmatprep.subr.bf16.mxu1 %v4429_v59  ;;  %v4492_v51 = vld [vmem:[#allocation9 + $0x1cc] ss:$16 sps:$4 sm:$0xff]   ;;  %v4496_v59 = vld [vmem:[#allocation9 + $0x1a8] ss:$16 sps:$4 sm:$0xff]  }
 0x1a1   :  { %v4495_v52 = vld [vmem:[#allocation9 + $0x3cc] ss:$16 sps:$4 sm:$0xff]  }
 0x1a2   :  { %2834 = vmatpush2.bf16.msra.mxu0 %v4424_v60  ;;  %v4498_v56 = vld [vmem:[#allocation9 + $0x1ac] ss:$16 sps:$4 sm:$0xff]   ;;  %v4499_v60 = vld [vmem:[#allocation9 + $0x3a8] ss:$16 sps:$4 sm:$0xff]  }
 0x1a3   :  { %v4749_v1 = vpop.eup %4748  ;;  %2875 = vmatpush2.bf16.msra.mxu1 %v4427_v61  ;;  %2835 = vmatprep.subr.bf16.mxu0 %v4432_v62  ;;  %v4501_v58 = vld [vmem:[#allocation9 + $0x3ac] ss:$16 sps:$4 sm:$0xff]  }
 0x1a4   :  { %v4751_v4 = vpop.eup %4750  ;;  %2876 = vmatprep.subr.bf16.mxu1 %v4435_v63  ;;  %v5067_v18 = vpack.c.bf16 %v4749_v1, %v4749_v1  ;;  %v4504_v61 = vld [vmem:[#allocation9 + $0x18c] ss:$16 sps:$4 sm:$0xff]   ;;  %v4502_v63 = vld [vmem:[#allocation9 + $0x188] ss:$16 sps:$4 sm:$0xff]  }
 0x1a5   :  { %v4753_v6 = vpop.eup %4752  ;;  %v5063_v8 = vpack.c.bf16 %v4751_v4, %v4751_v4  ;;  %v4507_v62 = vld [vmem:[#allocation9 + $0x38c] ss:$16 sps:$4 sm:$0xff]   ;;  %v4511_v4 = vld [vmem:[#allocation9 + $0x368] ss:$16 sps:$4 sm:$0xff]  }
 0x1a6   :  { %v4755_v7 = vpop.eup %4754  ;;  %2836 = vmatpush2.bf16.msra.mxu0 %v4430_v0  ;;  %v5065_v16 = vpack.c.bf16 %v4753_v6, %v4753_v6  ;;  %v4505_v0 = vld [vmem:[#allocation9 + $0x388] ss:$16 sps:$4 sm:$0xff]   ;;  %v4510_v1 = vld [vmem:[#allocation9 + $0x16c] ss:$16 sps:$4 sm:$0xff]  }
 0x1a7   :  { %2877 = vmatpush2.bf16.msra.mxu1 %v4433_v2  ;;  %v5069_v19 = vpack.c.bf16 %v4755_v7, %v4755_v7  ;;  %2887 = vmatprep.subr.bf16.mxu0 %v4438_v3  ;;  %v4513_v2 = vld [vmem:[#allocation9 + $0x36c] ss:$16 sps:$4 sm:$0xff]   ;;  %v4508_v3 = vld [vmem:[#allocation9 + $0x168] ss:$16 sps:$4 sm:$0xff]  }
 0x1a8   :  { %2837 = vmatprep.mubr.bf16.mxu0 %v5065_v16  ;;  %2928 = vmatprep.subr.bf16.mxu1 %v4441_v5  ;;  %v4516_v5 = vld [vmem:[#allocation9 + $0x14c] ss:$16 sps:$4 sm:$0xff]   ;;  %v4514_v7 = vld [vmem:[#allocation9 + $0x148] ss:$16 sps:$4 sm:$0xff]  }
 0x1a9   :  { %2878 = vmatprep.mubr.bf16.mxu1 %v5069_v19  ;;  %2838 = vmatmul.mubr.bf16.vlgmr.msra.gmra.mxu0 %v5067_v18  ;;  %v4519_v6 = vld [vmem:[#allocation9 + $0x34c] ss:$16 sps:$4 sm:$0xff]  }
 0x1aa   :  { %2879 = vmatmul.mubr.bf16.vlgmr.msra.gmra.mxu1 %v5063_v8  ;;  %2888 = vmatpush1.bf16.msra.mxu0 %v4436_v17  ;;  %v4517_v17 = vld [vmem:[#allocation9 + $0x348] ss:$16 sps:$4 sm:$0xff]  }
 0x1ab   :  { %2929 = vmatpush1.bf16.msra.mxu1 %v4439_v20  ;;  %2919 = vmatprep.mubr.bf16.mxu0 %v5045_v35  ;;  %v4457_v35 = vld [vmem:[#allocation9 + $0x288] ss:$16 sps:$4 sm:$0xff]   ;;  %v4522_v20 = vld [vmem:[#allocation9 + $0x12c] ss:$16 sps:$4 sm:$0xff]  }
 0x1ac   :  { %2960 = vmatprep.mubr.bf16.mxu1 %v5049_v38  ;;  %2889 = vmatprep.subr.bf16.mxu0 %v4444_v21  ;;  %v4460_v38 = vld [vmem:[#allocation9 + $0x68] ss:$16 sps:$4 sm:$0xff]   ;;  %v4525_v21 = vld [vmem:[#allocation9 + $0x32c] ss:$16 sps:$4 sm:$0xff]  }
 0x1ad   :  { %2930 = vmatprep.subr.bf16.mxu1 %v4447_v22  ;;  %v4520_v22 = vld [vmem:[#allocation9 + $0x128] ss:$16 sps:$4 sm:$0xff]  }
 0x1ae   :  { %2890 = vmatpush1.bf16.msra.mxu0 %v4442_v53  ;;  %v4523_v53 = vld [vmem:[#allocation9 + $0x328] ss:$16 sps:$4 sm:$0xff]  }
 0x1af   :  { %2931 = vmatpush1.bf16.msra.mxu1 %v4445_v23  ;;  %2891 = vmatprep.subr.bf16.mxu0 %v4450_v13  ;;  %v4528_v23 = vld [vmem:[#allocation9 + $0x10c] ss:$16 sps:$4 sm:$0xff]  }
 0x1b0   :  { %2932 = vmatprep.subr.bf16.mxu1 %v4453_v24  ;;  %v4531_v13 = vld [vmem:[#allocation9 + $0x30c] ss:$16 sps:$4 sm:$0xff]   ;;  %v4526_v24 = vld [vmem:[#allocation9 + $0x108] ss:$16 sps:$4 sm:$0xff]  }
 0x1b2   :  { %2892 = vmatpush1.bf16.msra.mxu0 %v4448_v25  ;;  %v4529_v25 = vld [vmem:[#allocation9 + $0x308] ss:$16 sps:$4 sm:$0xff]  }
 0x1b3   :  { %2933 = vmatpush1.bf16.msra.mxu1 %v4451_v26  ;;  %2893 = vmatprep.subr.bf16.mxu0 %v4456_v27  ;;  %v4534_v26 = vld [vmem:[#allocation9 + $0x4ec] ss:$16 sps:$4 sm:$0xff]  }
 0x1b4   :  { %2934 = vmatprep.subr.bf16.mxu1 %v4459_v28  ;;  %v4537_v27 = vld [vmem:[#allocation9 + $0x6ec] ss:$16 sps:$4 sm:$0xff]   ;;  %v4532_v28 = vld [vmem:[#allocation9 + $0x4e8] ss:$16 sps:$4 sm:$0xff]  }
 0x1b6   :  { %2894 = vmatpush1.bf16.msra.mxu0 %v4454_v29  ;;  %v4535_v29 = vld [vmem:[#allocation9 + $0x6e8] ss:$16 sps:$4 sm:$0xff]  }
 0x1b7   :  { %2935 = vmatpush1.bf16.msra.mxu1 %v4457_v35  ;;  %2895 = vmatprep.subr.bf16.mxu0 %v4462_v30  ;;  %v4540_v35 = vld [vmem:[#allocation9 + $0x4cc] ss:$16 sps:$4 sm:$0xff]  }
 0x1b8   :  { %2936 = vmatprep.subr.bf16.mxu1 %v4465_v31  ;;  %v4543_v30 = vld [vmem:[#allocation9 + $0x6cc] ss:$16 sps:$4 sm:$0xff]   ;;  %v4538_v31 = vld [vmem:[#allocation9 + $0x4c8] ss:$16 sps:$4 sm:$0xff]  }
 0x1ba   :  { %2896 = vmatpush1.bf16.msra.mxu0 %v4460_v38  ;;  %v4541_v38 = vld [vmem:[#allocation9 + $0x6c8] ss:$16 sps:$4 sm:$0xff]  }
 0x1bb   :  { %2937 = vmatpush1.bf16.msra.mxu1 %v4463_v32  ;;  %2897 = vmatprep.subr.bf16.mxu0 %v4468_v33  ;;  %v4546_v32 = vld [vmem:[#allocation9 + $0x4ac] ss:$16 sps:$4 sm:$0xff]  }
 0x1bc   :  { %2938 = vmatprep.subr.bf16.mxu1 %v4471_v36  ;;  %v4549_v33 = vld [vmem:[#allocation9 + $0x6ac] ss:$16 sps:$4 sm:$0xff]   ;;  %v4544_v36 = vld [vmem:[#allocation9 + $0x4a8] ss:$16 sps:$4 sm:$0xff]  }
 0x1be   :  { %2898 = vmatpush1.bf16.msra.mxu0 %v4466_v39  ;;  %v4552_v39 = vld [vmem:[#allocation9 + $0x48c] ss:$16 sps:$4 sm:$0xff]  }
 0x1bf   :  { %2939 = vmatpush1.bf16.msra.mxu1 %v4469_v40  ;;  %2899 = vmatprep.subr.bf16.mxu0 %v4474_v41  ;;  %v4550_v40 = vld [vmem:[#allocation9 + $0x488] ss:$16 sps:$4 sm:$0xff]   ;;  %v4558_v41 = vld [vmem:[#allocation9 + $0x46c] ss:$16 sps:$4 sm:$0xff]  }
 0x1c0   :  { %2940 = vmatprep.subr.bf16.mxu1 %v4477_v57  ;;  %v4561_v57 = vld [vmem:[#allocation9 + $0x66c] ss:$16 sps:$4 sm:$0xff]  }
 0x1c2   :  { %2900 = vmatpush1.bf16.msra.mxu0 %v4472_v42  ;;  %v4559_v42 = vld [vmem:[#allocation9 + $0x668] ss:$16 sps:$4 sm:$0xff]  }
 0x1c3   :  { %2941 = vmatpush1.bf16.msra.mxu1 %v4475_v43  ;;  %2901 = vmatprep.subr.bf16.mxu0 %v4480_v44  ;;  %v4564_v43 = vld [vmem:[#allocation9 + $0x44c] ss:$16 sps:$4 sm:$0xff]  }
 0x1c4   :  { %2942 = vmatprep.subr.bf16.mxu1 %v4483_v45  ;;  %v4567_v44 = vld [vmem:[#allocation9 + $0x64c] ss:$16 sps:$4 sm:$0xff]   ;;  %v4562_v45 = vld [vmem:[#allocation9 + $0x448] ss:$16 sps:$4 sm:$0xff]  }
 0x1c6   :  { %2902 = vmatpush1.bf16.msra.mxu0 %v4478_v46  ;;  %v4565_v46 = vld [vmem:[#allocation9 + $0x648] ss:$16 sps:$4 sm:$0xff]  }
 0x1c7   :  { %2943 = vmatpush1.bf16.msra.mxu1 %v4481_v47  ;;  %2903 = vmatprep.subr.bf16.mxu0 %v4486_v48  ;;  %v4570_v47 = vld [vmem:[#allocation9 + $0x42c] ss:$16 sps:$4 sm:$0xff]  }
 0x1c8   :  { %2944 = vmatprep.subr.bf16.mxu1 %v4489_v49  ;;  %v4573_v48 = vld [vmem:[#allocation9 + $0x62c] ss:$16 sps:$4 sm:$0xff]   ;;  %v4568_v49 = vld [vmem:[#allocation9 + $0x428] ss:$16 sps:$4 sm:$0xff]  }
 0x1ca   :  { %2904 = vmatpush2.bf16.msra.mxu0 %v4484_v50  ;;  %v4571_v50 = vld [vmem:[#allocation9 + $0x628] ss:$16 sps:$4 sm:$0xff]  }
 0x1cb   :  { %2945 = vmatpush2.bf16.msra.mxu1 %v4487_v11  ;;  %2905 = vmatprep.subr.bf16.mxu0 %v4492_v51  ;;  %v4576_v11 = vld [vmem:[#allocation9 + $0x40c] ss:$16 sps:$4 sm:$0xff]  }
 0x1cc   :  { %2946 = vmatprep.subr.bf16.mxu1 %v4495_v52  ;;  %v4579_v51 = vld [vmem:[#allocation9 + $0x60c] ss:$16 sps:$4 sm:$0xff]   ;;  %v4574_v52 = vld [vmem:[#allocation9 + $0x408] ss:$16 sps:$4 sm:$0xff]  }
 0x1ce   :  { %2906 = vmatpush2.bf16.msra.mxu0 %v4490_v54  ;;  %v4577_v54 = vld [vmem:[#allocation9 + $0x608] ss:$16 sps:$4 sm:$0xff]  }
 0x1cf   :  { %2947 = vmatpush2.bf16.msra.mxu1 %v4493_v55  ;;  %2907 = vmatprep.subr.bf16.mxu0 %v4498_v56  ;;  %v4582_v55 = vld [vmem:[#allocation9 + $0x5ec] ss:$16 sps:$4 sm:$0xff]  }
 0x1d0   :  { %2948 = vmatprep.subr.bf16.mxu1 %v4501_v58  ;;  %v4585_v56 = vld [vmem:[#allocation9 + $0x7ec] ss:$16 sps:$4 sm:$0xff]   ;;  %v4580_v58 = vld [vmem:[#allocation9 + $0x5e8] ss:$16 sps:$4 sm:$0xff]  }
 0x1d2   :  { %2908 = vmatpush2.bf16.msra.mxu0 %v4496_v59  ;;  %v4583_v59 = vld [vmem:[#allocation9 + $0x7e8] ss:$16 sps:$4 sm:$0xff]  }
 0x1d3   :  { %2949 = vmatpush2.bf16.msra.mxu1 %v4499_v60  ;;  %2909 = vmatprep.subr.bf16.mxu0 %v4504_v61  ;;  %v4588_v60 = vld [vmem:[#allocation9 + $0x5cc] ss:$16 sps:$4 sm:$0xff]  }
 0x1d4   :  { %2950 = vmatprep.subr.bf16.mxu1 %v4507_v62  ;;  %v4591_v61 = vld [vmem:[#allocation9 + $0x7cc] ss:$16 sps:$4 sm:$0xff]   ;;  %v4586_v62 = vld [vmem:[#allocation9 + $0x5c8] ss:$16 sps:$4 sm:$0xff]  }
 0x1d6   :  { %2910 = vmatpush2.bf16.msra.mxu0 %v4502_v63  ;;  %v4589_v63 = vld [vmem:[#allocation9 + $0x7c8] ss:$16 sps:$4 sm:$0xff]  }
 0x1d7   :  { %2951 = vmatpush2.bf16.msra.mxu1 %v4505_v0  ;;  %2911 = vmatprep.subr.bf16.mxu0 %v4510_v1  ;;  %v4594_v0 = vld [vmem:[#allocation9 + $0x5ac] ss:$16 sps:$4 sm:$0xff]  }
 0x1d8   :  { %2952 = vmatprep.subr.bf16.mxu1 %v4513_v2  ;;  %v4597_v1 = vld [vmem:[#allocation9 + $0x7ac] ss:$16 sps:$4 sm:$0xff]   ;;  %v4592_v2 = vld [vmem:[#allocation9 + $0x5a8] ss:$16 sps:$4 sm:$0xff]  }
 0x1da   :  { %2912 = vmatpush2.bf16.msra.mxu0 %v4508_v3  ;;  %v4595_v3 = vld [vmem:[#allocation9 + $0x7a8] ss:$16 sps:$4 sm:$0xff]  }
 0x1db   :  { %2953 = vmatpush2.bf16.msra.mxu1 %v4511_v4  ;;  %2913 = vmatprep.subr.bf16.mxu0 %v4516_v5  ;;  %v4600_v4 = vld [vmem:[#allocation9 + $0x58c] ss:$16 sps:$4 sm:$0xff]  }
 0x1dc   :  { %2954 = vmatprep.subr.bf16.mxu1 %v4519_v6  ;;  %v4603_v5 = vld [vmem:[#allocation9 + $0x78c] ss:$16 sps:$4 sm:$0xff]   ;;  %v4598_v6 = vld [vmem:[#allocation9 + $0x588] ss:$16 sps:$4 sm:$0xff]  }
 0x1de   :  { %2914 = vmatpush2.bf16.msra.mxu0 %v4514_v7  ;;  %v4601_v7 = vld [vmem:[#allocation9 + $0x788] ss:$16 sps:$4 sm:$0xff]  }
 0x1df   :  { %2955 = vmatpush2.bf16.msra.mxu1 %v4517_v17  ;;  %2915 = vmatprep.subr.bf16.mxu0 %v4522_v20  ;;  %v4606_v17 = vld [vmem:[#allocation9 + $0x56c] ss:$16 sps:$4 sm:$0xff]  }
 0x1e0   :  { %2956 = vmatprep.subr.bf16.mxu1 %v4525_v21  ;;  %v4609_v20 = vld [vmem:[#allocation9 + $0x76c] ss:$16 sps:$4 sm:$0xff]   ;;  %v4604_v21 = vld [vmem:[#allocation9 + $0x568] ss:$16 sps:$4 sm:$0xff]  }
 0x1e2   :  { %2916 = vmatpush2.bf16.msra.mxu0 %v4520_v22  ;;  %v4607_v22 = vld [vmem:[#allocation9 + $0x768] ss:$16 sps:$4 sm:$0xff]  }
 0x1e3   :  { %2957 = vmatpush2.bf16.msra.mxu1 %v4523_v53  ;;  %2917 = vmatprep.subr.bf16.mxu0 %v4528_v23  ;;  %v4612_v53 = vld [vmem:[#allocation9 + $0x54c] ss:$16 sps:$4 sm:$0xff]  }
 0x1e4   :  { %2958 = vmatprep.subr.bf16.mxu1 %v4531_v13  ;;  %v4615_v23 = vld [vmem:[#allocation9 + $0x74c] ss:$16 sps:$4 sm:$0xff]   ;;  %v4610_v13 = vld [vmem:[#allocation9 + $0x548] ss:$16 sps:$4 sm:$0xff]  }
 0x1e6   :  { %2918 = vmatpush2.bf16.msra.mxu0 %v4526_v24  ;;  %v4613_v24 = vld [vmem:[#allocation9 + $0x748] ss:$16 sps:$4 sm:$0xff]  }
 0x1e7   :  { %2959 = vmatpush2.bf16.msra.mxu1 %v4529_v25  ;;  %2969 = vmatprep.subr.bf16.mxu0 %v4534_v26  ;;  %v4618_v25 = vld [vmem:[#allocation9 + $0x52c] ss:$16 sps:$4 sm:$0xff]  }
 0x1e8   :  { %3010 = vmatprep.subr.bf16.mxu1 %v4537_v27  ;;  %v4621_v26 = vld [vmem:[#allocation9 + $0x72c] ss:$16 sps:$4 sm:$0xff]   ;;  %v4616_v27 = vld [vmem:[#allocation9 + $0x528] ss:$16 sps:$4 sm:$0xff]  }
 0x1e9   :  { %2920 = vmatmul.mubr.bf16.vlgmr.msra.gmra.mxu0 %v5047_v37  ;;  %v4547_v37 = vld [vmem:[#allocation9 + $0x6a8] ss:$16 sps:$4 sm:$0xff]  }
 0x1ea   :  { %2961 = vmatmul.mubr.bf16.vlgmr.msra.gmra.mxu1 %v5043_v34  ;;  %2970 = vmatpush1.bf16.msra.mxu0 %v4532_v28  ;;  %v4555_v34 = vld [vmem:[#allocation9 + $0x68c] ss:$16 sps:$4 sm:$0xff]   ;;  %v4619_v28 = vld [vmem:[#allocation9 + $0x728] ss:$16 sps:$4 sm:$0xff]  }
 0x1eb   :  { %3001 = vmatprep.mubr.bf16.mxu0 %v5065_v16  ;;  %3011 = vmatpush1.bf16.msra.mxu1 %v4535_v29  ;;  %v4553_v16 = vld [vmem:[#allocation9 + $0x688] ss:$16 sps:$4 sm:$0xff]   ;;  %v4624_v29 = vld [vmem:[#allocation9 + $0x50c] ss:$16 sps:$4 sm:$0xff]  }
 0x1ec   :  { %3042 = vmatprep.mubr.bf16.mxu1 %v5069_v19  ;;  %2971 = vmatprep.subr.bf16.mxu0 %v4540_v35  ;;  %v4556_v19 = vld [vmem:[#allocation9 + $0x468] ss:$16 sps:$4 sm:$0xff]   ;;  %v4627_v35 = vld [vmem:[#allocation9 + $0x70c] ss:$16 sps:$4 sm:$0xff]  }
 0x1ed   :  { %3012 = vmatprep.subr.bf16.mxu1 %v4543_v30  ;;  %v4622_v30 = vld [vmem:[#allocation9 + $0x508] ss:$16 sps:$4 sm:$0xff]  }
 0x1ee   :  { %2972 = vmatpush1.bf16.msra.mxu0 %v4538_v31  ;;  %v4625_v31 = vld [vmem:[#allocation9 + $0x708] ss:$16 sps:$4 sm:$0xff]  }
 0x1ef   :  { %3013 = vmatpush1.bf16.msra.mxu1 %v4541_v38  ;;  %2973 = vmatprep.subr.bf16.mxu0 %v4546_v32  ;;  %v4630_v38 = vld [vmem:[#allocation11 + $0x74] ss:$8 sps:$4 sm:$0xff]   ;;  %v4628_v32 = vld [vmem:[#allocation11 + $0x70] ss:$8 sps:$4 sm:$0xff]  }
 0x1f0   :  { %3014 = vmatprep.subr.bf16.mxu1 %v4549_v33  ;;  %v4633_v33 = vld [vmem:[#allocation11 + $0x64] ss:$8 sps:$4 sm:$0xff]  }
 0x1f2   :  { %2974 = vmatpush1.bf16.msra.mxu0 %v4544_v36 }
 0x1f3   :  { %3015 = vmatpush1.bf16.msra.mxu1 %v4547_v37  ;;  %2975 = vmatprep.subr.bf16.mxu0 %v4552_v39  ;;  %v4631_v39 = vld [vmem:[#allocation11 + $0x60] ss:$8 sps:$4 sm:$0xff]  }
 0x1f4   :  { %3016 = vmatprep.subr.bf16.mxu1 %v4555_v34 }
 0x1f6   :  { %2976 = vmatpush1.bf16.msra.mxu0 %v4550_v40  ;;  %v4636_v40 = vld [vmem:[#allocation11 + $0x54] ss:$8 sps:$4 sm:$0xff]  }
 0x1f7   :  { %3017 = vmatpush1.bf16.msra.mxu1 %v4553_v16  ;;  %2977 = vmatprep.subr.bf16.mxu0 %v4558_v41 }
 0x1f8   :  { %3018 = vmatprep.subr.bf16.mxu1 %v4561_v57 }
 0x1fa   :  { %2978 = vmatpush1.bf16.msra.mxu0 %v4556_v19  ;;  %v4634_v19 = vld [vmem:[#allocation11 + $0x50] ss:$8 sps:$4 sm:$0xff]  }
 0x1fb   :  { %3019 = vmatpush1.bf16.msra.mxu1 %v4559_v42  ;;  %2979 = vmatprep.subr.bf16.mxu0 %v4564_v43 }
 0x1fc   :  { %3020 = vmatprep.subr.bf16.mxu1 %v4567_v44  ;;  %v4676_v44 = vld [vmem:[#allocation11 + $0x170] ss:$8 sps:$4 sm:$0xff]  }
 0x1fe   :  { %2980 = vmatpush1.bf16.msra.mxu0 %v4562_v45  ;;  %v4681_v45 = vld [vmem:[#allocation11 + $0x164] ss:$8 sps:$4 sm:$0xff]  }
 0x1ff   :  { %3021 = vmatpush1.bf16.msra.mxu1 %v4565_v46  ;;  %2981 = vmatprep.subr.bf16.mxu0 %v4570_v47  ;;  %v4637_v46 = vld [vmem:[#allocation11 + $0x40] ss:$8 sps:$4 sm:$0xff]   ;;  %v4642_v47 = vld [vmem:[#allocation11 + $0x34] ss:$8 sps:$4 sm:$0xff]  }
 0x200   :  { %3022 = vmatprep.subr.bf16.mxu1 %v4573_v48  ;;  %v4679_v48 = vld [vmem:[#allocation11 + $0x160] ss:$8 sps:$4 sm:$0xff]  }
 0x202   :  { %2982 = vmatpush1.bf16.msra.mxu0 %v4568_v49  ;;  %v4684_v49 = vld [vmem:[#allocation11 + $0x154] ss:$8 sps:$4 sm:$0xff]  }
 0x203   :  { %3023 = vmatpush1.bf16.msra.mxu1 %v4571_v50  ;;  %2983 = vmatprep.subr.bf16.mxu0 %v4576_v11  ;;  %v4640_v50 = vld [vmem:[#allocation11 + $0x30] ss:$8 sps:$4 sm:$0xff]   ;;  %v4645_v11 = vld [vmem:[#allocation11 + $0x24] ss:$8 sps:$4 sm:$0xff]  }
 0x204   :  { %3024 = vmatprep.subr.bf16.mxu1 %v4579_v51  ;;  %v4682_v51 = vld [vmem:[#allocation11 + $0x150] ss:$8 sps:$4 sm:$0xff]  }
 0x206   :  { %2984 = vmatpush1.bf16.msra.mxu0 %v4574_v52  ;;  %v4687_v52 = vld [vmem:[#allocation11 + $0x144] ss:$8 sps:$4 sm:$0xff]  }
 0x207   :  { %3025 = vmatpush1.bf16.msra.mxu1 %v4577_v54  ;;  %2985 = vmatprep.subr.bf16.mxu0 %v4582_v55  ;;  %v4643_v54 = vld [vmem:[#allocation11 + $0x20] ss:$8 sps:$4 sm:$0xff]   ;;  %v4648_v55 = vld [vmem:[#allocation11 + $0x14] ss:$8 sps:$4 sm:$0xff]  }
 0x208   :  { %3026 = vmatprep.subr.bf16.mxu1 %v4585_v56  ;;  %v4685_v56 = vld [vmem:[#allocation11 + $0x140] ss:$8 sps:$4 sm:$0xff]  }
 0x20a   :  { %2986 = vmatpush2.bf16.msra.mxu0 %v4580_v58  ;;  %v4690_v58 = vld [vmem:[#allocation11 + $0x134] ss:$8 sps:$4 sm:$0xff]  }
 0x20b   :  { %3027 = vmatpush2.bf16.msra.mxu1 %v4583_v59  ;;  %2987 = vmatprep.subr.bf16.mxu0 %v4588_v60  ;;  %v4646_v59 = vld [vmem:[#allocation11 + $0x10] ss:$8 sps:$4 sm:$0xff]   ;;  %v4651_v60 = vld [vmem:[#allocation11 + $0x4] ss:$8 sps:$4 sm:$0xff]  }
 0x20c   :  { %3028 = vmatprep.subr.bf16.mxu1 %v4591_v61  ;;  %v4688_v61 = vld [vmem:[#allocation11 + $0x130] ss:$8 sps:$4 sm:$0xff]  }
 0x20e   :  { %2988 = vmatpush2.bf16.msra.mxu0 %v4586_v62  ;;  %v4693_v62 = vld [vmem:[#allocation11 + $0x124] ss:$8 sps:$4 sm:$0xff]  }
 0x20f   :  { %3029 = vmatpush2.bf16.msra.mxu1 %v4589_v63  ;;  %2989 = vmatprep.subr.bf16.mxu0 %v4594_v0  ;;  %v4649_v63 = vld [vmem:[#allocation11] ss:$8 sps:$4 sm:$0xff]   ;;  %v4654_v0 = vld [vmem:[#allocation11 + $0xf4] ss:$8 sps:$4 sm:$0xff]  }
 0x210   :  { %3030 = vmatprep.subr.bf16.mxu1 %v4597_v1  ;;  %v4691_v1 = vld [vmem:[#allocation11 + $0x120] ss:$8 sps:$4 sm:$0xff]  }
 0x212   :  { %2990 = vmatpush2.bf16.msra.mxu0 %v4592_v2  ;;  %v4696_v2 = vld [vmem:[#allocation11 + $0x114] ss:$8 sps:$4 sm:$0xff]  }
 0x213   :  { %3031 = vmatpush2.bf16.msra.mxu1 %v4595_v3  ;;  %2991 = vmatprep.subr.bf16.mxu0 %v4600_v4  ;;  %v4652_v3 = vld [vmem:[#allocation11 + $0xf0] ss:$8 sps:$4 sm:$0xff]   ;;  %v4657_v4 = vld [vmem:[#allocation11 + $0xe4] ss:$8 sps:$4 sm:$0xff]  }
 0x214   :  { %3032 = vmatprep.subr.bf16.mxu1 %v4603_v5  ;;  %v4694_v5 = vld [vmem:[#allocation11 + $0x110] ss:$8 sps:$4 sm:$0xff]  }
 0x216   :  { %2992 = vmatpush2.bf16.msra.mxu0 %v4598_v6  ;;  %v4699_v6 = vld [vmem:[#allocation11 + $0x104] ss:$8 sps:$4 sm:$0xff]  }
 0x217   :  { %3033 = vmatpush2.bf16.msra.mxu1 %v4601_v7  ;;  %2993 = vmatprep.subr.bf16.mxu0 %v4606_v17  ;;  %v4655_v7 = vld [vmem:[#allocation11 + $0xe0] ss:$8 sps:$4 sm:$0xff]   ;;  %v4660_v17 = vld [vmem:[#allocation11 + $0xd4] ss:$8 sps:$4 sm:$0xff]  }
 0x218   :  { %3034 = vmatprep.subr.bf16.mxu1 %v4609_v20  ;;  %v4697_v20 = vld [vmem:[#allocation11 + $0x100] ss:$8 sps:$4 sm:$0xff]  }
 0x21a   :  { %2994 = vmatpush2.bf16.msra.mxu0 %v4604_v21  ;;  %v4702_v21 = vld [vmem:[#allocation11 + $0x1f4] ss:$8 sps:$4 sm:$0xff]  }
 0x21b   :  { %3035 = vmatpush2.bf16.msra.mxu1 %v4607_v22  ;;  %2995 = vmatprep.subr.bf16.mxu0 %v4612_v53  ;;  %v4658_v22 = vld [vmem:[#allocation11 + $0xd0] ss:$8 sps:$4 sm:$0xff]   ;;  %v4663_v53 = vld [vmem:[#allocation11 + $0xc4] ss:$8 sps:$4 sm:$0xff]  }
 0x21c   :  { %3036 = vmatprep.subr.bf16.mxu1 %v4615_v23  ;;  %v4700_v23 = vld [vmem:[#allocation11 + $0x1f0] ss:$8 sps:$4 sm:$0xff]  }
 0x21e   :  { %2996 = vmatpush2.bf16.msra.mxu0 %v4610_v13  ;;  %v4705_v13 = vld [vmem:[#allocation11 + $0x1e4] ss:$8 sps:$4 sm:$0xff]  }
 0x21f   :  { %3037 = vmatpush2.bf16.msra.mxu1 %v4613_v24  ;;  %2997 = vmatprep.subr.bf16.mxu0 %v4618_v25  ;;  %v4661_v24 = vld [vmem:[#allocation11 + $0xc0] ss:$8 sps:$4 sm:$0xff]   ;;  %v4666_v25 = vld [vmem:[#allocation11 + $0xb4] ss:$8 sps:$4 sm:$0xff]  }
 0x220   :  { %3038 = vmatprep.subr.bf16.mxu1 %v4621_v26  ;;  %v4703_v26 = vld [vmem:[#allocation11 + $0x1e0] ss:$8 sps:$4 sm:$0xff]  }
 0x222   :  { %2998 = vmatpush2.bf16.msra.mxu0 %v4616_v27  ;;  %v4664_v27 = vld [vmem:[#allocation11 + $0xb0] ss:$8 sps:$4 sm:$0xff]  }
 0x223   :  { %3039 = vmatpush2.bf16.msra.mxu1 %v4619_v28  ;;  %2999 = vmatprep.subr.bf16.mxu0 %v4624_v29  ;;  %v4669_v28 = vld [vmem:[#allocation11 + $0xa4] ss:$8 sps:$4 sm:$0xff]   ;;  %v4667_v29 = vld [vmem:[#allocation11 + $0xa0] ss:$8 sps:$4 sm:$0xff]  }
 0x224   :  { %3040 = vmatprep.subr.bf16.mxu1 %v4627_v35  ;;  %v4672_v35 = vld [vmem:[#allocation11 + $0x94] ss:$8 sps:$4 sm:$0xff]  }
 0x226   :  { %3000 = vmatpush2.bf16.msra.mxu0 %v4622_v30  ;;  %v5094_v30 = vld [vmem:[%s5125_s4] sm:$0xf] }
 0x227   :  { %3041 = vmatpush2.bf16.msra.mxu1 %v4625_v31  ;;  %3455 = vmatprep.subr.bf16.mxu0 %v4630_v38  ;;  %v4670_v31 = vld [vmem:[#allocation11 + $0x90] ss:$8 sps:$4 sm:$0xff]   ;;  %v4675_v38 = vld [vmem:[#allocation11 + $0x84] ss:$8 sps:$4 sm:$0xff]  }
 0x229   :  { %3002 = vmatmul.mubr.bf16.vlgmr.msra.gmra.mxu0 %v5067_v18  ;;  %v5082_v36 = vpop.f32.mrf.mxu0  ;;  %v4639_v18 = vld [vmem:[#allocation11 + $0x44] ss:$8 sps:$4 sm:$0xff]  }
 0x22a   :  { %3043 = vmatmul.mubr.bf16.vlgmr.msra.gmra.mxu1 %v5063_v8  ;;  %v5085_v37 = vpop.f32.mrf.mxu1  ;;  %3456 = vmatpush1.bf16.msra.mxu0 %v4628_v32  ;;  %v4678_v8 = vld [vmem:[#allocation11 + $0x174] ss:$8 sps:$4 sm:$0xff]   ;;  %v1426_v32 = vrot.slane %v5094_v30, %v5024_v10 }
 0x22b   :  { %v5087_v34 = vpop.f32.mrf.mxu0  ;;  %3457 = vmatprep.subr.bf16.mxu0 %v4633_v33  ;;  %3496 = vmatprep.subr.bf16.mxu1 %v4678_v8  ;;  %v1430_v33 = vrot.slane %v5094_v30, %v5030_v14  ;;  %v4706_v8 = vld [vmem:[#allocation11 + $0x1d0] ss:$8 sps:$4 sm:$0xff]  }
 0x22c   :  { %v5089_v16 = vpop.f32.mrf.mxu1  ;;  %3497 = vmatpush1.bf16.msra.mxu1 %v4676_v44 }
 0x22d   :  { %v2761_v41 = vpop.f32.mrf.mxu0  ;;  %3498 = vmatprep.subr.bf16.mxu1 %v4681_v45 }
 0x22e   :  { %v2802_v57 = vpop.f32.mrf.mxu1  ;;  %3458 = vmatpush1.bf16.msra.mxu0 %v4631_v39  ;;  %v4673_v39 = vld [vmem:[#allocation11 + $0x80] ss:$8 sps:$4 sm:$0xff]   ;;  %v2760_v41 = vadd.f32 %v5087_v34, %v1430_v33 }
 0x22f   :  { %v2762_v42 = vpop.f32.mrf.mxu0  ;;  %3459 = vmatprep.subr.bf16.mxu0 %v4636_v40  ;;  %v2758_v40 = vadd.f32 %v5082_v36, %v1426_v32  ;;  %v4711_v36 = vld [vmem:[#allocation11 + $0x1c4] ss:$8 sps:$4 sm:$0xff]  }
 0x230   :  { %v2803_v43 = vpop.f32.mrf.mxu1  ;;  %3499 = vmatpush1.bf16.msra.mxu1 %v4679_v48  ;;  %v4708_v42 = vld [vmem:[#allocation11 + $0x1d4] ss:$8 sps:$4 sm:$0xff]  }
 0x231   :  { %3500 = vmatprep.subr.bf16.mxu1 %v4684_v49  ;;  %v2799_v57 = vadd.f32 %v5085_v37, %v2758_v40 }
 0x232   :  { %3460 = vmatpush1.bf16.msra.mxu0 %v4634_v19 }
 0x233   :  { %3461 = vmatprep.subr.bf16.mxu0 %v4639_v18  ;;  %v2801_v18 = vadd.f32 %v5089_v16, %v2760_v41  ;;  %v4714_v16 = vld [vmem:[#allocation11 + $0x1b4] ss:$8 sps:$4 sm:$0xff]  }
 0x234   :  { %3501 = vmatpush1.bf16.msra.mxu1 %v4682_v51 }
 0x235   :  { %3502 = vmatprep.subr.bf16.mxu1 %v4687_v52  ;;  %v4712_v52 = vld [vmem:[#allocation11 + $0x1b0] ss:$8 sps:$4 sm:$0xff]  }
 0x236   :  { %3462 = vmatpush1.bf16.msra.mxu0 %v4637_v46 }
 0x237   :  { %3463 = vmatprep.subr.bf16.mxu0 %v4642_v47 }
 0x238   :  { %3503 = vmatpush1.bf16.msra.mxu1 %v4685_v56  ;;  %v4720_v56 = vld [vmem:[#allocation11 + $0x194] ss:$8 sps:$4 sm:$0xff]  }
 0x239   :  { %3504 = vmatprep.subr.bf16.mxu1 %v4690_v58  ;;  %v4718_v58 = vld [vmem:[#allocation11 + $0x190] ss:$8 sps:$4 sm:$0xff]  }
 0x23a   :  { %3464 = vmatpush1.bf16.msra.mxu0 %v4640_v50 }
 0x23b   :  { %3465 = vmatprep.subr.bf16.mxu0 %v4645_v11  ;;  %v4709_v11 = vld [vmem:[#allocation11 + $0x1c0] ss:$8 sps:$4 sm:$0xff]  }
 0x23c   :  { %3505 = vmatpush1.bf16.msra.mxu1 %v4688_v61  ;;  %v4723_v61 = vld [vmem:[#allocation11 + $0x184] ss:$8 sps:$4 sm:$0xff]  }
 0x23d   :  { %3506 = vmatprep.subr.bf16.mxu1 %v4693_v62 }
 0x23e   :  { %3466 = vmatpush1.bf16.msra.mxu0 %v4643_v54  ;;  %v4717_v54 = vld [vmem:[#allocation11 + $0x1a4] ss:$8 sps:$4 sm:$0xff]  }
 0x23f   :  { %3467 = vmatprep.subr.bf16.mxu0 %v4648_v55  ;;  %v4715_v55 = vld [vmem:[#allocation11 + $0x1a0] ss:$8 sps:$4 sm:$0xff]  }
 0x240   :  { %3507 = vmatpush1.bf16.msra.mxu1 %v4691_v1 }
 0x241   :  { %3508 = vmatprep.subr.bf16.mxu1 %v4696_v2 }
 0x242   :  { %3468 = vmatpush1.bf16.msra.mxu0 %v4646_v59 }
 0x243   :  { %3469 = vmatprep.subr.bf16.mxu0 %v4651_v60  ;;  %v4721_v60 = vld [vmem:[#allocation11 + $0x180] ss:$8 sps:$4 sm:$0xff]  }
 0x244   :  { %3509 = vmatpush1.bf16.msra.mxu1 %v4694_v5 }
 0x245   :  { %3510 = vmatprep.subr.bf16.mxu1 %v4699_v6 }
 0x246   :  { %3470 = vmatpush1.bf16.msra.mxu0 %v4649_v63 }
 0x247   :  { %3471 = vmatprep.subr.bf16.mxu0 %v4654_v0 }
 0x248   :  { %3511 = vmatpush1.bf16.msra.mxu1 %v4697_v20  ;;  %v4724_v20 = vld [vmem:[#allocation12 + $0x78] sm:$0xff]  }
 0x249   :  { %3512 = vmatprep.subr.bf16.mxu1 %v4702_v21  ;;  %v4725_v21 = vld [vmem:[#allocation12 + $0x38] sm:$0xff]  }
 0x24a   :  { %3472 = vmatpush2.bf16.msra.mxu0 %v4652_v3 }
 0x24b   :  { %3473 = vmatprep.subr.bf16.mxu0 %v4657_v4 }
 0x24c   :  { %3513 = vmatpush2.bf16.msra.mxu1 %v4700_v23  ;;  %v4728_v23 = vld [vmem:[#allocation12 + $0x68] sm:$0xff]  }
 0x24d   :  { %3514 = vmatprep.subr.bf16.mxu1 %v4705_v13  ;;  %v4729_v13 = vld [vmem:[#allocation12 + $0x28] sm:$0xff]  }
 0x24e   :  { %3474 = vmatpush2.bf16.msra.mxu0 %v4655_v7 }
 0x24f   :  { %3475 = vmatprep.subr.bf16.mxu0 %v4660_v17 }
 0x250   :  { %3515 = vmatpush2.bf16.msra.mxu1 %v4703_v26 }
 0x251   :  { %3516 = vmatprep.subr.bf16.mxu1 %v4708_v42 }
 0x252   :  { %3476 = vmatpush2.bf16.msra.mxu0 %v4658_v22  ;;  %v4726_v22 = vld [vmem:[#allocation12 + $0x70] sm:$0xff]  }
 0x253   :  { %3477 = vmatprep.subr.bf16.mxu0 %v4663_v53  ;;  %v4727_v53 = vld [vmem:[#allocation12 + $0x30] sm:$0xff]  }
 0x254   :  { %3517 = vmatpush2.bf16.msra.mxu1 %v4706_v8  ;;  %v4730_v8 = vld [vmem:[#allocation12 + $0x60] sm:$0xff]  }
 0x255   :  { %3518 = vmatprep.subr.bf16.mxu1 %v4711_v36  ;;  %v4734_v36 = vld [vmem:[#allocation12 + $0x50] sm:$0xff]  }
 0x256   :  { %3478 = vmatpush2.bf16.msra.mxu0 %v4661_v24  ;;  %v1434_v24 = vrot.slane %v5094_v30, %v1111_v12 }
 0x257   :  { %3479 = vmatprep.subr.bf16.mxu0 %v4666_v25  ;;  %v1438_v25 = vrot.slane %v5094_v30, %v1115_v15 }
 0x258   :  { %3519 = vmatpush2.bf16.msra.mxu1 %v4709_v11  ;;  %v4737_v11 = vld [vmem:[#allocation12 + $0x8] sm:$0xff]  }
 0x259   :  { %3520 = vmatprep.subr.bf16.mxu1 %v4714_v16  ;;  %v3123_v16 = vld [vmem:[%s5127_s6] sm:$0x3] }
 0x25a   :  { %3480 = vmatpush2.bf16.msra.mxu0 %v4664_v27 }
 0x25b   :  { %3481 = vmatprep.subr.bf16.mxu0 %v4669_v28 }
 0x25c   :  { %3521 = vmatpush2.bf16.msra.mxu1 %v4712_v52  ;;  %v3128_v52 = vrot.slane %v3123_v16, %v5024_v10  ;;  %v4188_v10 = vld [vmem:[%s5129_s8] ss:$0 sm:$0xff] }
 0x25d   :  { %3522 = vmatprep.subr.bf16.mxu1 %v4717_v54  ;;  %v3132_v54 = vrot.slane %v3123_v16, %v5030_v14 }
 0x25e   :  { %3482 = vmatpush2.bf16.msra.mxu0 %v4667_v29 }
 0x25f   :  { %3483 = vmatprep.subr.bf16.mxu0 %v4672_v35 }
 0x260   :  { %3523 = vmatpush2.bf16.msra.mxu1 %v4715_v55 }
 0x261   :  { %3524 = vmatprep.subr.bf16.mxu1 %v4720_v56 }
 0x262   :  { %3484 = vmatpush2.bf16.msra.mxu0 %v4670_v31 }
 0x263   :  { %3485 = vmatprep.subr.bf16.mxu0 %v4675_v38 }
 0x264   :  { %3525 = vmatpush2.bf16.msra.mxu1 %v4718_v58 }
 0x265   :  { %3526 = vmatprep.subr.bf16.mxu1 %v4723_v61 }
 0x266   :  { %3486 = vmatpush2.bf16.msra.mxu0 %v4673_v39 }
 0x267   :  { %4205 = vmatprep.subr.bf16.mxu0 %v4724_v20 }
 0x268   :  { %3527 = vmatpush2.bf16.msra.mxu1 %v4721_v60 }
 0x269   :  { %v2839_v19 = vpop.f32.mrf.mxu0 }
 0x26a   :  { %v2840_v43 = vadd.f32 %v2839_v19, %v2799_v57  ;;  %v2880_v44 = vpop.f32.mrf.mxu1 }
 0x26b   :  { %v2841_v45 = vpop.f32.mrf.mxu0 }
 0x26c   :  { %v2881_v46 = vadd.f32 %v2880_v44, %v2840_v43  ;;  %v2842_v47 = vadd.f32 %v2841_v45, %v2801_v18  ;;  %v2882_v48 = vpop.f32.mrf.mxu1  ;;  %v4731_v45 = vld [vmem:[#allocation12 + $0x20] sm:$0xff]  }
 0x26d   :  { %v2843_v49 = vpop.f32.mrf.mxu0 }
 0x26e   :  { %v2883_v50 = vadd.f32 %v2882_v48, %v2842_v47  ;;  %v2884_v34 = vpop.f32.mrf.mxu1  ;;  %4756 = vtanh.f32 %v2881_v46  ;;  %v4732_v48 = vld [vmem:[#allocation12 + $0x58] sm:$0xff]  }
 0x26f   :  { %v2844_v37 = vpop.f32.mrf.mxu0  ;;  %v4733_v49 = vld [vmem:[#allocation12 + $0x18] sm:$0xff]   ;;  %v4736_v34 = vld [vmem:[#allocation12 + $0x48] sm:$0xff]  }
 0x270   :  { %4758 = vtanh.f32 %v2883_v50  ;;  %v2885_v51 = vpop.f32.mrf.mxu1  ;;  %v4735_v50 = vld [vmem:[#allocation12 + $0x10] sm:$0xff]   ;;  %v4738_v37 = vld [vmem:[#allocation12 + $0x40] sm:$0xff]  }
 0x271   :  { %v4739_v51 = vld [vmem:[#allocation12] sm:$0xff]  }
 0x27b   :  { %v4757_v59 = vpop.eup %4756 }
 0x27c   :  { %v3055_v0 = vpack.c.bf16 %v4757_v59, %v4757_v59 }
 0x27d   :  { %v4759_v62 = vpop.eup %4758 }
 0x27e   :  { %v3056_v63 = vpack.c.bf16 %v4759_v62, %v4759_v62 }
 0x280   :  { %3487 = vmatprep.mubr.bf16.mxu0 %v3056_v63 }
 0x281   :  { %3488 = vmatmul.mubr.bf16.vlgmr.msra.gmra.mxu0 %v3055_v0 }
 0x282   :  { %4206 = vmatpush3.bf16.msra.mxu0 %v4725_v21 }
 0x283   :  { %4207 = vmatprep.subr.bf16.mxu0 %v4726_v22 }
 0x286   :  { %4208 = vmatpush3.bf16.msra.mxu0 %v4727_v53 }
 0x287   :  { %4209 = vmatprep.subr.bf16.mxu0 %v4728_v23 }
 0x28a   :  { %4210 = vmatpush3.bf16.msra.mxu0 %v4729_v13 }
 0x28b   :  { %4211 = vmatprep.subr.bf16.mxu0 %v4730_v8 }
 0x28e   :  { %4212 = vmatpush3.bf16.msra.mxu0 %v4731_v45 }
 0x28f   :  { %4213 = vmatprep.subr.bf16.mxu0 %v4732_v48 }
 0x292   :  { %4214 = vmatpush3.bf16.msra.mxu0 %v4733_v49 }
 0x293   :  { %4215 = vmatprep.subr.bf16.mxu0 %v4734_v36 }
 0x296   :  { %4216 = vmatpush3.bf16.msra.mxu0 %v4735_v50 }
 0x297   :  { %4217 = vmatprep.subr.bf16.mxu0 %v4736_v34 }
 0x29a   :  { %4218 = vmatpush3.bf16.msra.mxu0 %v4737_v11 }
 0x29b   :  { %4219 = vmatprep.subr.bf16.mxu0 %v4738_v37 }
 0x29e   :  { %4220 = vmatpush3.bf16.msra.mxu0 %v4739_v51 }
 0x2a9   :  { %v2921_v1 = vpop.f32.mrf.mxu0 }
 0x2aa   :  { %v2962_v2 = vpop.f32.mrf.mxu1  ;;  %v2922_v26 = vadd.f32 %v2921_v1, %v1434_v24 }
 0x2ab   :  { %v2923_v3 = vpop.f32.mrf.mxu0 }
 0x2ac   :  { %v2964_v4 = vpop.f32.mrf.mxu1  ;;  %v2924_v27 = vadd.f32 %v2923_v3, %v1438_v25  ;;  %v2963_v28 = vadd.f32 %v2962_v2, %v2922_v26 }
 0x2ad   :  { %v2925_v5 = vpop.f32.mrf.mxu0 }
 0x2ae   :  { %v2966_v6 = vpop.f32.mrf.mxu1  ;;  %v2965_v35 = vadd.f32 %v2964_v4, %v2924_v27 }
 0x2af   :  { %v2926_v7 = vpop.f32.mrf.mxu0 }
 0x2b0   :  { %v2967_v17 = vpop.f32.mrf.mxu1 }
 0x2e9   :  { %v3003_v29 = vpop.f32.mrf.mxu0 }
 0x2ea   :  { %v3004_v31 = vadd.f32 %v3003_v29, %v2963_v28  ;;  %v3044_v38 = vpop.f32.mrf.mxu1 }
 0x2eb   :  { %v3005_v32 = vpop.f32.mrf.mxu0 }
 0x2ec   :  { %v3045_v33 = vadd.f32 %v3044_v38, %v3004_v31  ;;  %v3006_v39 = vadd.f32 %v3005_v32, %v2965_v35  ;;  %v3046_v40 = vpop.f32.mrf.mxu1 }
 0x2ed   :  { %v3007_v41 = vpop.f32.mrf.mxu0 }
 0x2ee   :  { %v3047_v57 = vadd.f32 %v3046_v40, %v3006_v39  ;;  %v3048_v19 = vpop.f32.mrf.mxu1  ;;  %4760 = vtanh.f32 %v3045_v33 }
 0x2ef   :  { %v3008_v12 = vpop.f32.mrf.mxu0 }
 0x2f0   :  { %4762 = vtanh.f32 %v3047_v57  ;;  %v3049_v9 = vpop.f32.mrf.mxu1 }
 0x2fb   :  { %v4761_v42 = vpop.eup %4760 }
 0x2fc   :  { %v3057_v18 = vpack.c.bf16 %v4761_v42, %v4761_v42 }
 0x2fd   :  { %v4763_v15 = vpop.eup %4762 }
 0x2fe   :  { %v3058_v30 = vpack.c.bf16 %v4763_v15, %v4763_v15 }
 0x300   :  { %3528 = vmatprep.mubr.bf16.mxu1 %v3058_v30 }
 0x301   :  { %3529 = vmatmul.mubr.bf16.vlgmr.msra.gmra.mxu1 %v3057_v18 }
 0x341   :  { %v3489_v43 = vpop.f32.mrf.mxu0 }
 0x342   :  { %v3490_v55 = vadd.f32 %v3489_v43, %v3128_v52 }
 0x343   :  { %v3491_v44 = vpop.f32.mrf.mxu0 }
 0x344   :  { %v3492_v58 = vadd.f32 %v3491_v44, %v3132_v54 }
 0x345   :  { %v3493_v46 = vpop.f32.mrf.mxu0 }
 0x347   :  { %v3494_v47 = vpop.f32.mrf.mxu0 }
 0x3c1   :  { %v3530_v56 = vpop.f32.mrf.mxu1 }
 0x3c2   :  { %v3531_v59 = vadd.f32 %v3530_v56, %v3490_v55 }
 0x3c3   :  { %v3532_v60 = vpop.f32.mrf.mxu1 }
 0x3c4   :  { %v3533_v61 = vadd.f32 %v3532_v60, %v3492_v58  ;;  %4764 = vtanh.f32 %v3531_v59 }
 0x3c5   :  { %v3534_v62 = vpop.f32.mrf.mxu1 }
 0x3c6   :  { %4766 = vtanh.f32 %v3533_v61 }
 0x3c7   :  { %v3535_v63 = vpop.f32.mrf.mxu1 }
 0x3d1   :  { %v4765_v0 = vpop.eup %4764 }
 0x3d2   :  { %v3539_v3 = vpack.c.bf16 %v4765_v0, %v4765_v0 }
 0x3d3   :  { %v4767_v1 = vpop.eup %4766 }
 0x3d4   :  { %v3540_v2 = vpack.c.bf16 %v4767_v1, %v4767_v1 }
 0x3d6   :  { %3708 = vmatprep.mubr.bf16.mxu0 %v3540_v2 }
 0x3d7   :  { %3709 = vmatmul.mubr.bf16.vlgmr.msra.gmra.mxu0 %v3539_v3 }
 0x497   :  { %v4221_v4 = vpop.f32.mrf.mxu0 }
 0x499   :  { %v4222_v14 = vpop.f32.mrf.mxu0 }
 0x49a   :  { %v4223_v5 = vadd.f32 %v4222_v14, %v4221_v4 }
 0x49b   :  { %v4224_v6 = vpop.f32.mrf.mxu0 }
 0x49c   :  { %v3711_v7 = vadd.f32 %v4223_v5, %v4188_v10 }
 0x49d   :  { %v4225_v17 = vpop.f32.mrf.mxu0 }
 0x49e   :  { %4768 = vtanh.f32 %v3711_v7 }
 0x4ab   :  { %v4769_v20 = vpop.eup %4768 }
 0x4ac   :  { %v3717_v21 = vpack.c.bf16 %v4769_v20, %v4769_v20 }
 0x4ae   :  { %v3718_v22 = vunpack.c.l.bf16 %v3717_v21 }
 0x4b0   :  { %3719 = vst [vmem:[#allocation14] sm:$0xff] %v3718_v22 }
 0x4b1   :  { %4901 = shalt.err (!%p4898_p6)
}
 0x4b2   :  { %3729 = dma.vmem_to_hbm [thread:$0]  %s3727_s25, 128, %s5130_s9, [#allocation5]  }
 0x4b3   :  { %4918 = dma.done.wait [#allocation5], 128  }
 0x4b4   :  { %4919 = vsyncadd [#allocation5], 4294967168 }
 0x4b5   :  { %3733 = vsyncpa [#allocation4], 1 }
 0x4b6   :  { %3734 = vsyncpa [#allocation7], 1 }
 0x4b7   :  { %3735 = vsyncpa [#allocation10], 1 }
 0x4b8   :  { %3736 = vsyncpa [#allocation13], 1 }
 0x4b9   :  { %3737 = vsyncpa [#allocation5], 1 }

</bundles_post_ra>
